<compile_context>
chip_gen: v7x
topology: tpu7x:2x2x1
jax: 0.10.0
libtpu: 0.0.40
codegen_flags: <defaults>
</compile_context>

<pallas_src>
import functools

import jax
import jax.numpy as jnp
from jax.experimental import pallas as pl
from jax.experimental.pallas import tpu as pltpu

# ----------------------------- hyperparameters ------------------------------
EMBED_DIM = 32
NUM_HEADS = 4
HEAD_DIM = EMBED_DIM // NUM_HEADS
FF_DIM = 64
NUM_LAYERS = 2
LN_EPS = 1e-5          # torch.nn.LayerNorm default
NEG_INF = -1e30


# ------------------------- parameter packing (host) -------------------------
# One (3d + ff + 8, nh*d) f32 buffer per attention-layer type.
#   rows 0:d        cols 0:2d    -> Wqk   (head-major [q_h | k_h] column blocks)
#   rows d:2d       cols 0:nh*d  -> Wvo   (per-head folded Wv[:,h] @ Wo[h,:])
#   rows 2d:3d      cols 0:ff    -> W1
#   rows 3d:3d+ff   cols 0:d     -> W2
#   rows 3d+ff:+8   cols 0:ff    -> bias / LN vectors
def pack_layer_params(p):
    d, ff, nh, hd = EMBED_DIM, FF_DIM, NUM_HEADS, HEAD_DIM
    wqk = jnp.concatenate(
        [jnp.concatenate([p["wq"][:, h * hd:(h + 1) * hd],
                          p["wk"][:, h * hd:(h + 1) * hd]], axis=1)
         for h in range(nh)], axis=1)                                  # (d, 2d)
    wvo = jnp.concatenate(
        [p["wv"][:, h * hd:(h + 1) * hd] @ p["wo"][h * hd:(h + 1) * hd, :]
         for h in range(nh)], axis=1)                                  # (d, nh*d)
    rows = 3 * d + ff + 8
    buf = jnp.zeros((rows, nh * d), jnp.float32)
    buf = buf.at[0:d, 0:2 * d].set(wqk)
    buf = buf.at[d:2 * d, 0:nh * d].set(wvo)
    buf = buf.at[2 * d:3 * d, 0:ff].set(p["w1"])
    buf = buf.at[3 * d:3 * d + ff, 0:d].set(p["w2"])
    r0 = 3 * d + ff
    buf = buf.at[r0 + 0, 0:d].set(p["bo"][0])
    buf = buf.at[r0 + 1, 0:d].set(p["ln1g"][0])
    buf = buf.at[r0 + 2, 0:d].set(p["ln1b"][0])
    buf = buf.at[r0 + 3, 0:d].set(p["ln2g"][0])
    buf = buf.at[r0 + 4, 0:d].set(p["ln2b"][0])
    buf = buf.at[r0 + 5, 0:ff].set(p["b1"][0])
    buf = buf.at[r0 + 6, 0:d].set(p["b2"][0])
    return buf


def make_head_bias(nq, nkv):
    """Additive block-diagonal head mask (rows/cols are head-major stacked)."""
    rg = jnp.arange(nq * NUM_HEADS, dtype=jnp.int32) // nq
    cg = jnp.arange(nkv * NUM_HEADS, dtype=jnp.int32) // nkv
    return jnp.where(rg[:, None] == cg[None, :], 0.0, NEG_INF).astype(jnp.float32)


# ------------------------------ Pallas kernel --------------------------------
def _layer_norm(x, g, b):
    mu = jnp.mean(x, axis=-1, keepdims=True)
    var = jnp.mean((x - mu) ** 2, axis=-1, keepdims=True)
    return (x - mu) * jax.lax.rsqrt(var + LN_EPS) * g + b


def _unpack(pref):
    """Ref VIEWS (no loads) into the packed parameter buffer."""
    d, ff, nh = EMBED_DIM, FF_DIM, NUM_HEADS
    r0 = 3 * d + ff
    return dict(
        wqk=pref.at[0:d, 0:2 * d],            # (d, 2d)
        wvo=pref.at[d:2 * d, 0:nh * d],       # (d, nh*d)
        w1=pref.at[2 * d:3 * d, 0:ff],        # (d, ff)
        w2=pref.at[3 * d:3 * d + ff, 0:d],    # (ff, d)
        vec=pref.at[r0:r0 + 8, 0:ff],         # (8, ff) bias / LN vectors
    )


def _attn_block(xq, xkv, p, bias_ref, self_attn):
    """Post-norm MHA block: attention + residual + LN + ReLU MLP + residual + LN.
    Heads are stacked once, head-major, on the sublane axis; the additive head
    mask streams from VMEM; Wv@Wo is pre-folded so P@(V*Wo) yields per-head
    full-width contributions reduced with cheap sublane adds."""
    d, nh, hd = EMBED_DIM, NUM_HEADS, HEAD_DIM
    nq, nkv = xq.shape[0], xkv.shape[0]

    # projections; weights loaded from VMEM ref-views at their use site.
    # TODO(synk): cast matmul operands to bf16 once sizes are scaled up.
    qk_q = jnp.dot(xq, p["wqk"][...], preferred_element_type=jnp.float32)    # (nq, 2d)
    qk_k = qk_q if self_attn else jnp.dot(
        xkv, p["wqk"][...], preferred_element_type=jnp.float32)              # (nkv, 2d)
    vp = jnp.dot(xkv, p["wvo"][...], preferred_element_type=jnp.float32)     # (nkv, nh*d)

    # single head-stack per fused projection result; rows ordered (head, token).
    qk_q_st = jnp.concatenate(
        [qk_q[:, 2 * hd * h:2 * hd * (h + 1)] for h in range(nh)], axis=0)   # (nh*nq, 2hd)
    q_st = qk_q_st[:, 0:hd]
    if self_attn:
        k_st = qk_q_st[:, hd:2 * hd]
    else:
        qk_k_st = jnp.concatenate(
            [qk_k[:, 2 * hd * h:2 * hd * (h + 1)] for h in range(nh)], axis=0)
        k_st = qk_k_st[:, hd:2 * hd]                                         # (nh*nkv, hd)
    vp_st = jnp.concatenate(
        [vp[:, d * h:d * (h + 1)] for h in range(nh)], axis=0)               # (nh*nkv, d)

    # one score matmul + one masked softmax for all heads.
    s = jax.lax.dot_general(q_st, k_st, (((1,), (1,)), ((), ())),
                            preferred_element_type=jnp.float32)
    s = s * (hd ** -0.5) + bias_ref[...]          # additive mask from VMEM
    s = s - jnp.max(s, axis=-1, keepdims=True)
    e = jnp.exp(s)
    denom = jnp.sum(e, axis=-1, keepdims=True)
    inv = pl.reciprocal(denom, approx=True)       # EUP
    inv = inv * (2.0 - denom * inv)               # one Newton step -> f32-accurate
    probs = e * inv

    # P @ (V Wo): per-head full-width contributions, then reduce over heads.
    attn_st = jnp.dot(probs, vp_st, preferred_element_type=jnp.float32)      # (nh*nq, d)
    attn = attn_st[0:nq, :]
    for h in range(1, nh):
        attn = attn + attn_st[h * nq:(h + 1) * nq, :]

    vec = p["vec"][...]                           # (8, ff) one aligned load
    bo, ln1g, ln1b = vec[0:1, 0:d], vec[1:2, 0:d], vec[2:3, 0:d]
    ln2g, ln2b = vec[3:4, 0:d], vec[4:5, 0:d]
    b1, b2 = vec[5:6, :], vec[6:7, 0:d]

    x = _layer_norm(xq + attn + bo, ln1g, ln1b)
    h1 = jnp.maximum(
        jnp.dot(x, p["w1"][...], preferred_element_type=jnp.float32) + b1, 0.0)
    y = jnp.dot(h1, p["w2"][...], preferred_element_type=jnp.float32) + b2
    return _layer_norm(x + y, ln2g, ln2b)


def _encoder_kernel(xc_ref, xt_ref, sa_ref, ca_ref, sbias_ref, cbias_ref, o_ref,
                    *, num_layers):
    xc = xc_ref[...].astype(jnp.float32)          # (nc, d)   one batch element
    xt = xt_ref[...].astype(jnp.float32)          # (nt, d)
    sa = _unpack(sa_ref)
    ca = _unpack(ca_ref)

    def layer(_, carry):
        xc, xt = carry
        xc = _attn_block(xc, xc, sa, sbias_ref, True)    # MHSA on context set
        xt = _attn_block(xt, xc, ca, cbias_ref, False)   # MHCA: targets -> context
        return xc, xt

    _, xt = jax.lax.fori_loop(0, num_layers, layer, (xc, xt), unroll=True)

    # lane-dense (128-wide) store; wrapper slices the zero padding off.
    pad = o_ref.shape[-1] - xt.shape[-1]
    if pad > 0:
        xt = jnp.concatenate([xt, jnp.zeros((xt.shape[0], pad), jnp.float32)], axis=1)
    o_ref[...] = xt.astype(o_ref.dtype)


def _cost_estimate(m, nc, nt, num_layers):
    d, ff, nh, hd = EMBED_DIM, FF_DIM, NUM_HEADS, HEAD_DIM

    def block(nq, nkv):
        proj = 2 * nq * d * 2 * d + 2 * nkv * d * 2 * d + 2 * nkv * d * nh * d
        score = 2 * (nh * nq) * (nh * nkv) * hd
        pv = 2 * (nh * nq) * (nh * nkv) * d
        mlp = 2 * nq * d * ff + 2 * nq * ff * d
        return proj + score + pv + mlp

    flops = m * num_layers * (block(nc, nc) + block(nt, nc))
    trans = m * num_layers * ((nh * nc) * (nh * nc) + (nh * nt) * (nh * nc)
                              + 4 * (nc + nt))
    bytes_acc = 4 * (m * nc * d + m * nt * d + m * nt * 128
                     + 2 * (3 * d + ff + 8) * (nh * d)
                     + (nh * nc) * (nh * nc) + (nh * nt) * (nh * nc))
    return pl.CostEstimate(flops=int(flops), transcendentals=int(trans),
                           bytes_accessed=int(bytes_acc))


@functools.partial(jax.jit, static_argnames=("num_layers",))
def tnp_transformer_encoder(xc, xt, mhsa_params, mhca_params, mask=None,
                            num_layers=NUM_LAYERS):
    """Forward of TNPTransformerEncoder. `mask` is accepted but unused, exactly
    like the PyTorch module (which only warns)."""
    del mask
    m, nc, d = xc.shape
    _, nt, _ = xt.shape
    assert d == EMBED_DIM

    sa_pack = pack_layer_params(mhsa_params)
    ca_pack = pack_layer_params(mhca_params)
    sbias = make_head_bias(nc, nc)     # (nh*nc, nh*nc) additive head mask
    cbias = make_head_bias(nt, nc)     # (nh*nt, nh*nc)

    out_pad = 128 if d < 128 else d

    out = pl.pallas_call(
        functools.partial(_encoder_kernel, num_layers=num_layers),
        out_shape=jax.ShapeDtypeStruct((m, nt, out_pad), jnp.float32),
        grid=(m,),
        in_specs=[
            pl.BlockSpec((None, nc, d), lambda b: (b, 0, 0)),     # xc  (one batch)
            pl.BlockSpec((None, nt, d), lambda b: (b, 0, 0)),     # xt  (one batch)
            pl.BlockSpec(sa_pack.shape, lambda b: (0, 0)),        # packed MHSA params
            pl.BlockSpec(ca_pack.shape, lambda b: (0, 0)),        # packed MHCA params
            pl.BlockSpec(sbias.shape, lambda b: (0, 0)),          # self-attn bias mask
            pl.BlockSpec(cbias.shape, lambda b: (0, 0)),          # cross-attn bias mask
        ],
        out_specs=pl.BlockSpec((None, nt, out_pad), lambda b: (b, 0, 0)),
        compiler_params=pltpu.CompilerParams(
            dimension_semantics=("parallel",),        # v7x: shard batch over 2 TCs
            vmem_limit_bytes=32 * 1024 * 1024,
        ),
        cost_estimate=_cost_estimate(m, nc, nt, num_layers),
    )(xc, xt, sa_pack, ca_pack, sbias, cbias)

    return out[..., :d].astype(xt.dtype)


# ------------------------- deterministic parameters -------------------------
def make_layer_params(key):
    keys = jax.random.split(key, 6)
    init = lambda k, shape: (0.02 * jax.random.normal(k, shape)).astype(jnp.float32)
    return {
        "wq": init(keys[0], (EMBED_DIM, EMBED_DIM)),
        "wk": init(keys[1], (EMBED_DIM, EMBED_DIM)),
        "wv": init(keys[2], (EMBED_DIM, EMBED_DIM)),
        "wo": init(keys[3], (EMBED_DIM, EMBED_DIM)),
        "bo": jnp.zeros((1, EMBED_DIM), jnp.float32),
        "ln1g": jnp.ones((1, EMBED_DIM), jnp.float32),
        "ln1b": jnp.zeros((1, EMBED_DIM), jnp.float32),
        "ln2g": jnp.ones((1, EMBED_DIM), jnp.float32),
        "ln2b": jnp.zeros((1, EMBED_DIM), jnp.float32),
        "w1": init(keys[4], (EMBED_DIM, FF_DIM)),
        "b1": jnp.zeros((1, FF_DIM), jnp.float32),
        "w2": init(keys[5], (FF_DIM, EMBED_DIM)),
        "b2": jnp.zeros((1, EMBED_DIM), jnp.float32),
    }


# ----------------------------- pure-JAX reference ----------------------------
def _ref_layer(xq, xkv, p):
    def ln(x, g, b):
        mu = jnp.mean(x, axis=-1, keepdims=True)
        var = jnp.mean((x - mu) ** 2, axis=-1, keepdims=True)
        return (x - mu) / jnp.sqrt(var + LN_EPS) * g + b

    q = xq @ p["wq"]; k = xkv @ p["wk"]; v = xkv @ p["wv"]
    m, nq, _ = q.shape
    nkv = k.shape[1]
    qh = q.reshape(m, nq, NUM_HEADS, HEAD_DIM).transpose(0, 2, 1, 3)
    kh = k.reshape(m, nkv, NUM_HEADS, HEAD_DIM).transpose(0, 2, 1, 3)
    vh = v.reshape(m, nkv, NUM_HEADS, HEAD_DIM).transpose(0, 2, 1, 3)
    s = jnp.einsum("bhqd,bhkd->bhqk", qh, kh) * (HEAD_DIM ** -0.5)
    a = jax.nn.softmax(s, axis=-1)
    o = jnp.einsum("bhqk,bhkd->bhqd", a, vh).transpose(0, 2, 1, 3).reshape(m, nq, EMBED_DIM)
    o = o @ p["wo"] + p["bo"][0]
    x = ln(xq + o, p["ln1g"][0], p["ln1b"][0])
    ff = jnp.maximum(x @ p["w1"] + p["b1"][0], 0.0) @ p["w2"] + p["b2"][0]
    return ln(x + ff, p["ln2g"][0], p["ln2b"][0])


def _ref_encoder(xc, xt, sa, ca, num_layers=NUM_LAYERS):
    for _ in range(num_layers):
        xc = _ref_layer(xc, xc, sa)
        xt = _ref_layer(xt, xc, ca)
    return xt


# ----------------------------------- main ------------------------------------
if __name__ == "__main__":
    key = jax.random.PRNGKey(0)
    k_xc, k_xt, k_sa, k_ca = jax.random.split(key, 4)

    m, nc, nt = 2, 16, 8
    xc = jax.random.normal(k_xc, (m, nc, EMBED_DIM), jnp.float32)
    xt = jax.random.normal(k_xt, (m, nt, EMBED_DIM), jnp.float32)

    mhsa_params = make_layer_params(k_sa)
    mhca_params = make_layer_params(k_ca)

    out = tnp_transformer_encoder(xc, xt, mhsa_params, mhca_params)
    out = jax.block_until_ready(out)
    assert out.shape == (m, nt, EMBED_DIM)

    ref = _ref_encoder(xc, xt, mhsa_params, mhca_params)
    max_err = float(jnp.max(jnp.abs(out - ref)))
    assert jnp.allclose(out, ref, atol=3e-4, rtol=3e-4), max_err

    print("KERNEL_OK")
</pallas_src>

<mosaic_0001>
module attributes {stable_mosaic.version = 11 : i64} {
  func.func @_encoder_kernel(%arg0: i32, %arg1: memref<1x16x32xf32, #tpu.memory_space<vmem>>, %arg2: memref<1x8x32xf32, #tpu.memory_space<vmem>>, %arg3: memref<168x128xf32, #tpu.memory_space<vmem>>, %arg4: memref<168x128xf32, #tpu.memory_space<vmem>>, %arg5: memref<64x64xf32, #tpu.memory_space<vmem>>, %arg6: memref<32x64xf32, #tpu.memory_space<vmem>>, %arg7: memref<1x8x128xf32, #tpu.memory_space<vmem>>) attributes {dimension_semantics = [#tpu.dimension_semantics<parallel>], iteration_bounds = array<i64: 2>, scalar_prefetch = 0 : i64, scratch_operands = 0 : i64, tpu.core_type = #tpu.core_type<tc>, window_params = [{transform_indices = @transform_0, window_bounds = array<i64: 1, 16, 32>}, {transform_indices = @transform_1, window_bounds = array<i64: 1, 8, 32>}, {pipeline_mode = #tpu.pipeline_mode<synchronous>, transform_indices = @transform_2, window_bounds = array<i64: 168, 128>}, {pipeline_mode = #tpu.pipeline_mode<synchronous>, transform_indices = @transform_3, window_bounds = array<i64: 168, 128>}, {pipeline_mode = #tpu.pipeline_mode<synchronous>, transform_indices = @transform_4, window_bounds = array<i64: 64, 64>}, {pipeline_mode = #tpu.pipeline_mode<synchronous>, transform_indices = @transform_5, window_bounds = array<i64: 32, 64>}, {transform_indices = @transform_6, window_bounds = array<i64: 1, 8, 128>}]} {
    %c0 = arith.constant 0 : index
    %c0_0 = arith.constant 0 : index
    %c0_1 = arith.constant 0 : index
    %0 = vector.load %arg1[%c0, %c0_0, %c0_1] : memref<1x16x32xf32, #tpu.memory_space<vmem>>, vector<1x16x32xf32>
    %1 = vector.shape_cast %0 : vector<1x16x32xf32> to vector<16x32xf32>
    %c0_2 = arith.constant 0 : index
    %c0_3 = arith.constant 0 : index
    %c0_4 = arith.constant 0 : index
    %2 = vector.load %arg2[%c0_2, %c0_3, %c0_4] : memref<1x8x32xf32, #tpu.memory_space<vmem>>, vector<1x8x32xf32>
    %3 = vector.shape_cast %2 : vector<1x8x32xf32> to vector<8x32xf32>
    %c0_i32 = arith.constant 0 : i32
    %c0_5 = arith.constant 0 : index
    %c0_6 = arith.constant 0 : index
    %4 = vector.load %arg3[%c0_5, %c0_6] : memref<168x128xf32, #tpu.memory_space<vmem>>, vector<32x64xf32>
    %cst = arith.constant dense<0.000000e+00> : vector<16x64xf32>
    %5 = tpu.matmul %1, %4, %cst {dimension_numbers = #tpu.dot_dimension_numbers<[1], [0], [0], [1], [0, 0, 1, 1], [], []>} : vector<16x32xf32>, vector<32x64xf32>, vector<16x64xf32> -> vector<16x64xf32>
    %c32 = arith.constant 32 : index
    %c0_7 = arith.constant 0 : index
    %6 = vector.load %arg3[%c32, %c0_7] : memref<168x128xf32, #tpu.memory_space<vmem>>, vector<32x128xf32>
    %cst_8 = arith.constant dense<0.000000e+00> : vector<16x128xf32>
    %7 = tpu.matmul %1, %6, %cst_8 {dimension_numbers = #tpu.dot_dimension_numbers<[1], [0], [0], [1], [0, 0, 1, 1], [], []>} : vector<16x32xf32>, vector<32x128xf32>, vector<16x128xf32> -> vector<16x128xf32>
    %8 = vector.extract_strided_slice %5 {offsets = [0, 0], sizes = [16, 16], strides = [1, 1]} : vector<16x64xf32> to vector<16x16xf32>
    %9 = vector.extract_strided_slice %5 {offsets = [0, 16], sizes = [16, 16], strides = [1, 1]} : vector<16x64xf32> to vector<16x16xf32>
    %10 = vector.extract_strided_slice %5 {offsets = [0, 32], sizes = [16, 16], strides = [1, 1]} : vector<16x64xf32> to vector<16x16xf32>
    %11 = vector.extract_strided_slice %5 {offsets = [0, 48], sizes = [16, 16], strides = [1, 1]} : vector<16x64xf32> to vector<16x16xf32>
    %12 = tpu.concatenate %8, %9, %10, %11 in 0 : vector<16x16xf32>, vector<16x16xf32>, vector<16x16xf32>, vector<16x16xf32> -> vector<64x16xf32>
    %13 = vector.extract_strided_slice %12 {offsets = [0, 0], sizes = [64, 8], strides = [1, 1]} : vector<64x16xf32> to vector<64x8xf32>
    %14 = vector.extract_strided_slice %12 {offsets = [0, 8], sizes = [64, 8], strides = [1, 1]} : vector<64x16xf32> to vector<64x8xf32>
    %15 = vector.extract_strided_slice %7 {offsets = [0, 0], sizes = [16, 32], strides = [1, 1]} : vector<16x128xf32> to vector<16x32xf32>
    %16 = vector.extract_strided_slice %7 {offsets = [0, 32], sizes = [16, 32], strides = [1, 1]} : vector<16x128xf32> to vector<16x32xf32>
    %17 = vector.extract_strided_slice %7 {offsets = [0, 64], sizes = [16, 32], strides = [1, 1]} : vector<16x128xf32> to vector<16x32xf32>
    %18 = vector.extract_strided_slice %7 {offsets = [0, 96], sizes = [16, 32], strides = [1, 1]} : vector<16x128xf32> to vector<16x32xf32>
    %19 = tpu.concatenate %15, %16, %17, %18 in 0 : vector<16x32xf32>, vector<16x32xf32>, vector<16x32xf32>, vector<16x32xf32> -> vector<64x32xf32>
    %cst_9 = arith.constant dense<0.000000e+00> : vector<64x64xf32>
    %20 = tpu.matmul %13, %14, %cst_9 {dimension_numbers = #tpu.dot_dimension_numbers<[1], [1], [0], [0], [0, 0, 1, 0], [], []>} : vector<64x8xf32>, vector<64x8xf32>, vector<64x64xf32> -> vector<64x64xf32>
    %cst_10 = arith.constant 0.353553385 : f32
    %21 = vector.broadcast %cst_10 : f32 to vector<64x64xf32>
    %22 = arith.mulf %20, %21 : vector<64x64xf32>
    %c0_11 = arith.constant 0 : index
    %c0_12 = arith.constant 0 : index
    %23 = vector.load %arg5[%c0_11, %c0_12] : memref<64x64xf32, #tpu.memory_space<vmem>>, vector<64x64xf32>
    %24 = arith.addf %22, %23 : vector<64x64xf32>
    %cst_13 = arith.constant dense<0xFF800000> : vector<64xf32>
    %25 = vector.multi_reduction <maximumf>, %24, %cst_13 [1] : vector<64x64xf32> to vector<64xf32>
    %26 = vector.shape_cast %25 : vector<64xf32> to vector<64x1xf32>
    %27 = vector.broadcast %26 : vector<64x1xf32> to vector<64x64xf32>
    %28 = arith.subf %24, %27 : vector<64x64xf32>
    %29 = math.exp %28 : vector<64x64xf32>
    %cst_14 = arith.constant dense<0.000000e+00> : vector<64xf32>
    %30 = vector.multi_reduction <add>, %29, %cst_14 [1] : vector<64x64xf32> to vector<64xf32>
    %31 = vector.shape_cast %30 : vector<64xf32> to vector<64x1xf32>
    %32 = tpu.reciprocal %31 {approx = true} : vector<64x1xf32> -> vector<64x1xf32>
    %33 = arith.mulf %31, %32 : vector<64x1xf32>
    %cst_15 = arith.constant 2.000000e+00 : f32
    %34 = vector.broadcast %cst_15 : f32 to vector<64x1xf32>
    %35 = arith.subf %34, %33 : vector<64x1xf32>
    %36 = arith.mulf %32, %35 : vector<64x1xf32>
    %37 = vector.broadcast %36 : vector<64x1xf32> to vector<64x64xf32>
    %38 = arith.mulf %29, %37 : vector<64x64xf32>
    %cst_16 = arith.constant dense<0.000000e+00> : vector<64x32xf32>
    %39 = tpu.matmul %38, %19, %cst_16 {dimension_numbers = #tpu.dot_dimension_numbers<[1], [0], [0], [1], [0, 0, 1, 1], [], []>} : vector<64x64xf32>, vector<64x32xf32>, vector<64x32xf32> -> vector<64x32xf32>
    %40 = vector.extract_strided_slice %39 {offsets = [0, 0], sizes = [16, 32], strides = [1, 1]} : vector<64x32xf32> to vector<16x32xf32>
    %41 = vector.extract_strided_slice %39 {offsets = [16, 0], sizes = [16, 32], strides = [1, 1]} : vector<64x32xf32> to vector<16x32xf32>
    %42 = arith.addf %40, %41 : vector<16x32xf32>
    %43 = vector.extract_strided_slice %39 {offsets = [32, 0], sizes = [16, 32], strides = [1, 1]} : vector<64x32xf32> to vector<16x32xf32>
    %44 = arith.addf %42, %43 : vector<16x32xf32>
    %45 = vector.extract_strided_slice %39 {offsets = [48, 0], sizes = [16, 32], strides = [1, 1]} : vector<64x32xf32> to vector<16x32xf32>
    %46 = arith.addf %44, %45 : vector<16x32xf32>
    %c160 = arith.constant 160 : index
    %c0_17 = arith.constant 0 : index
    %47 = vector.load %arg3[%c160, %c0_17] : memref<168x128xf32, #tpu.memory_space<vmem>>, vector<8x64xf32>
    %48 = vector.extract_strided_slice %47 {offsets = [0, 0], sizes = [1, 32], strides = [1, 1]} : vector<8x64xf32> to vector<1x32xf32>
    %49 = vector.extract_strided_slice %47 {offsets = [1, 0], sizes = [1, 32], strides = [1, 1]} : vector<8x64xf32> to vector<1x32xf32>
    %50 = vector.extract_strided_slice %47 {offsets = [2, 0], sizes = [1, 32], strides = [1, 1]} : vector<8x64xf32> to vector<1x32xf32>
    %51 = vector.extract_strided_slice %47 {offsets = [3, 0], sizes = [1, 32], strides = [1, 1]} : vector<8x64xf32> to vector<1x32xf32>
    %52 = vector.extract_strided_slice %47 {offsets = [4, 0], sizes = [1, 32], strides = [1, 1]} : vector<8x64xf32> to vector<1x32xf32>
    %53 = vector.extract_strided_slice %47 {offsets = [5, 0], sizes = [1, 64], strides = [1, 1]} : vector<8x64xf32> to vector<1x64xf32>
    %54 = vector.extract_strided_slice %47 {offsets = [6, 0], sizes = [1, 32], strides = [1, 1]} : vector<8x64xf32> to vector<1x32xf32>
    %55 = arith.addf %1, %46 : vector<16x32xf32>
    %56 = vector.broadcast %48 : vector<1x32xf32> to vector<16x32xf32>
    %57 = arith.addf %55, %56 : vector<16x32xf32>
    %cst_18 = arith.constant dense<0.000000e+00> : vector<16xf32>
    %58 = vector.multi_reduction <add>, %57, %cst_18 [1] : vector<16x32xf32> to vector<16xf32>
    %59 = vector.shape_cast %58 : vector<16xf32> to vector<16x1xf32>
    %cst_19 = arith.constant 3.200000e+01 : f32
    %60 = vector.broadcast %cst_19 : f32 to vector<16x1xf32>
    %61 = arith.divf %59, %60 : vector<16x1xf32>
    %62 = vector.broadcast %61 : vector<16x1xf32> to vector<16x32xf32>
    %63 = arith.subf %57, %62 : vector<16x32xf32>
    %64 = arith.mulf %63, %63 : vector<16x32xf32>
    %cst_20 = arith.constant dense<0.000000e+00> : vector<16xf32>
    %65 = vector.multi_reduction <add>, %64, %cst_20 [1] : vector<16x32xf32> to vector<16xf32>
    %66 = vector.shape_cast %65 : vector<16xf32> to vector<16x1xf32>
    %cst_21 = arith.constant 3.200000e+01 : f32
    %67 = vector.broadcast %cst_21 : f32 to vector<16x1xf32>
    %68 = arith.divf %66, %67 : vector<16x1xf32>
    %69 = vector.broadcast %61 : vector<16x1xf32> to vector<16x32xf32>
    %70 = arith.subf %57, %69 : vector<16x32xf32>
    %cst_22 = arith.constant 9.99999974E-6 : f32
    %71 = vector.broadcast %cst_22 : f32 to vector<16x1xf32>
    %72 = arith.addf %68, %71 : vector<16x1xf32>
    %73 = math.rsqrt %72 : vector<16x1xf32>
    %74 = vector.broadcast %73 : vector<16x1xf32> to vector<16x32xf32>
    %75 = arith.mulf %70, %74 : vector<16x32xf32>
    %76 = vector.broadcast %49 : vector<1x32xf32> to vector<16x32xf32>
    %77 = arith.mulf %75, %76 : vector<16x32xf32>
    %78 = vector.broadcast %50 : vector<1x32xf32> to vector<16x32xf32>
    %79 = arith.addf %77, %78 : vector<16x32xf32>
    %c64 = arith.constant 64 : index
    %c0_23 = arith.constant 0 : index
    %80 = vector.load %arg3[%c64, %c0_23] : memref<168x128xf32, #tpu.memory_space<vmem>>, vector<32x64xf32>
    %cst_24 = arith.constant dense<0.000000e+00> : vector<16x64xf32>
    %81 = tpu.matmul %79, %80, %cst_24 {dimension_numbers = #tpu.dot_dimension_numbers<[1], [0], [0], [1], [0, 0, 1, 1], [], []>} : vector<16x32xf32>, vector<32x64xf32>, vector<16x64xf32> -> vector<16x64xf32>
    %82 = vector.broadcast %53 : vector<1x64xf32> to vector<16x64xf32>
    %83 = arith.addf %81, %82 : vector<16x64xf32>
    %cst_25 = arith.constant 0.000000e+00 : f32
    %84 = vector.broadcast %cst_25 : f32 to vector<16x64xf32>
    %85 = arith.maximumf %83, %84 : vector<16x64xf32>
    %c96 = arith.constant 96 : index
    %c0_26 = arith.constant 0 : index
    %86 = vector.load %arg3[%c96, %c0_26] : memref<168x128xf32, #tpu.memory_space<vmem>>, vector<64x32xf32>
    %cst_27 = arith.constant dense<0.000000e+00> : vector<16x32xf32>
    %87 = tpu.matmul %85, %86, %cst_27 {dimension_numbers = #tpu.dot_dimension_numbers<[1], [0], [0], [1], [0, 0, 1, 1], [], []>} : vector<16x64xf32>, vector<64x32xf32>, vector<16x32xf32> -> vector<16x32xf32>
    %88 = vector.broadcast %54 : vector<1x32xf32> to vector<16x32xf32>
    %89 = arith.addf %87, %88 : vector<16x32xf32>
    %90 = arith.addf %79, %89 : vector<16x32xf32>
    %cst_28 = arith.constant dense<0.000000e+00> : vector<16xf32>
    %91 = vector.multi_reduction <add>, %90, %cst_28 [1] : vector<16x32xf32> to vector<16xf32>
    %92 = vector.shape_cast %91 : vector<16xf32> to vector<16x1xf32>
    %cst_29 = arith.constant 3.200000e+01 : f32
    %93 = vector.broadcast %cst_29 : f32 to vector<16x1xf32>
    %94 = arith.divf %92, %93 : vector<16x1xf32>
    %95 = vector.broadcast %94 : vector<16x1xf32> to vector<16x32xf32>
    %96 = arith.subf %90, %95 : vector<16x32xf32>
    %97 = arith.mulf %96, %96 : vector<16x32xf32>
    %cst_30 = arith.constant dense<0.000000e+00> : vector<16xf32>
    %98 = vector.multi_reduction <add>, %97, %cst_30 [1] : vector<16x32xf32> to vector<16xf32>
    %99 = vector.shape_cast %98 : vector<16xf32> to vector<16x1xf32>
    %cst_31 = arith.constant 3.200000e+01 : f32
    %100 = vector.broadcast %cst_31 : f32 to vector<16x1xf32>
    %101 = arith.divf %99, %100 : vector<16x1xf32>
    %102 = vector.broadcast %94 : vector<16x1xf32> to vector<16x32xf32>
    %103 = arith.subf %90, %102 : vector<16x32xf32>
    %cst_32 = arith.constant 9.99999974E-6 : f32
    %104 = vector.broadcast %cst_32 : f32 to vector<16x1xf32>
    %105 = arith.addf %101, %104 : vector<16x1xf32>
    %106 = math.rsqrt %105 : vector<16x1xf32>
    %107 = vector.broadcast %106 : vector<16x1xf32> to vector<16x32xf32>
    %108 = arith.mulf %103, %107 : vector<16x32xf32>
    %109 = vector.broadcast %51 : vector<1x32xf32> to vector<16x32xf32>
    %110 = arith.mulf %108, %109 : vector<16x32xf32>
    %111 = vector.broadcast %52 : vector<1x32xf32> to vector<16x32xf32>
    %112 = arith.addf %110, %111 : vector<16x32xf32>
    %c0_33 = arith.constant 0 : index
    %c0_34 = arith.constant 0 : index
    %113 = vector.load %arg4[%c0_33, %c0_34] : memref<168x128xf32, #tpu.memory_space<vmem>>, vector<32x64xf32>
    %cst_35 = arith.constant dense<0.000000e+00> : vector<8x64xf32>
    %114 = tpu.matmul %3, %113, %cst_35 {dimension_numbers = #tpu.dot_dimension_numbers<[1], [0], [0], [1], [0, 0, 1, 1], [], []>} : vector<8x32xf32>, vector<32x64xf32>, vector<8x64xf32> -> vector<8x64xf32>
    %c0_36 = arith.constant 0 : index
    %c0_37 = arith.constant 0 : index
    %115 = vector.load %arg4[%c0_36, %c0_37] : memref<168x128xf32, #tpu.memory_space<vmem>>, vector<32x64xf32>
    %cst_38 = arith.constant dense<0.000000e+00> : vector<16x64xf32>
    %116 = tpu.matmul %112, %115, %cst_38 {dimension_numbers = #tpu.dot_dimension_numbers<[1], [0], [0], [1], [0, 0, 1, 1], [], []>} : vector<16x32xf32>, vector<32x64xf32>, vector<16x64xf32> -> vector<16x64xf32>
    %c32_39 = arith.constant 32 : index
    %c0_40 = arith.constant 0 : index
    %117 = vector.load %arg4[%c32_39, %c0_40] : memref<168x128xf32, #tpu.memory_space<vmem>>, vector<32x128xf32>
    %cst_41 = arith.constant dense<0.000000e+00> : vector<16x128xf32>
    %118 = tpu.matmul %112, %117, %cst_41 {dimension_numbers = #tpu.dot_dimension_numbers<[1], [0], [0], [1], [0, 0, 1, 1], [], []>} : vector<16x32xf32>, vector<32x128xf32>, vector<16x128xf32> -> vector<16x128xf32>
    %119 = vector.extract_strided_slice %114 {offsets = [0, 0], sizes = [8, 16], strides = [1, 1]} : vector<8x64xf32> to vector<8x16xf32>
    %120 = vector.extract_strided_slice %114 {offsets = [0, 16], sizes = [8, 16], strides = [1, 1]} : vector<8x64xf32> to vector<8x16xf32>
    %121 = vector.extract_strided_slice %114 {offsets = [0, 32], sizes = [8, 16], strides = [1, 1]} : vector<8x64xf32> to vector<8x16xf32>
    %122 = vector.extract_strided_slice %114 {offsets = [0, 48], sizes = [8, 16], strides = [1, 1]} : vector<8x64xf32> to vector<8x16xf32>
    %123 = tpu.concatenate %119, %120, %121, %122 in 0 : vector<8x16xf32>, vector<8x16xf32>, vector<8x16xf32>, vector<8x16xf32> -> vector<32x16xf32>
    %124 = vector.extract_strided_slice %123 {offsets = [0, 0], sizes = [32, 8], strides = [1, 1]} : vector<32x16xf32> to vector<32x8xf32>
    %125 = vector.extract_strided_slice %116 {offsets = [0, 0], sizes = [16, 16], strides = [1, 1]} : vector<16x64xf32> to vector<16x16xf32>
    %126 = vector.extract_strided_slice %116 {offsets = [0, 16], sizes = [16, 16], strides = [1, 1]} : vector<16x64xf32> to vector<16x16xf32>
    %127 = vector.extract_strided_slice %116 {offsets = [0, 32], sizes = [16, 16], strides = [1, 1]} : vector<16x64xf32> to vector<16x16xf32>
    %128 = vector.extract_strided_slice %116 {offsets = [0, 48], sizes = [16, 16], strides = [1, 1]} : vector<16x64xf32> to vector<16x16xf32>
    %129 = tpu.concatenate %125, %126, %127, %128 in 0 : vector<16x16xf32>, vector<16x16xf32>, vector<16x16xf32>, vector<16x16xf32> -> vector<64x16xf32>
    %130 = vector.extract_strided_slice %129 {offsets = [0, 8], sizes = [64, 8], strides = [1, 1]} : vector<64x16xf32> to vector<64x8xf32>
    %131 = vector.extract_strided_slice %118 {offsets = [0, 0], sizes = [16, 32], strides = [1, 1]} : vector<16x128xf32> to vector<16x32xf32>
    %132 = vector.extract_strided_slice %118 {offsets = [0, 32], sizes = [16, 32], strides = [1, 1]} : vector<16x128xf32> to vector<16x32xf32>
    %133 = vector.extract_strided_slice %118 {offsets = [0, 64], sizes = [16, 32], strides = [1, 1]} : vector<16x128xf32> to vector<16x32xf32>
    %134 = vector.extract_strided_slice %118 {offsets = [0, 96], sizes = [16, 32], strides = [1, 1]} : vector<16x128xf32> to vector<16x32xf32>
    %135 = tpu.concatenate %131, %132, %133, %134 in 0 : vector<16x32xf32>, vector<16x32xf32>, vector<16x32xf32>, vector<16x32xf32> -> vector<64x32xf32>
    %cst_42 = arith.constant dense<0.000000e+00> : vector<32x64xf32>
    %136 = tpu.matmul %124, %130, %cst_42 {dimension_numbers = #tpu.dot_dimension_numbers<[1], [1], [0], [0], [0, 0, 1, 0], [], []>} : vector<32x8xf32>, vector<64x8xf32>, vector<32x64xf32> -> vector<32x64xf32>
    %cst_43 = arith.constant 0.353553385 : f32
    %137 = vector.broadcast %cst_43 : f32 to vector<32x64xf32>
    %138 = arith.mulf %136, %137 : vector<32x64xf32>
    %c0_44 = arith.constant 0 : index
    %c0_45 = arith.constant 0 : index
    %139 = vector.load %arg6[%c0_44, %c0_45] : memref<32x64xf32, #tpu.memory_space<vmem>>, vector<32x64xf32>
    %140 = arith.addf %138, %139 : vector<32x64xf32>
    %cst_46 = arith.constant dense<0xFF800000> : vector<32xf32>
    %141 = vector.multi_reduction <maximumf>, %140, %cst_46 [1] : vector<32x64xf32> to vector<32xf32>
    %142 = vector.shape_cast %141 : vector<32xf32> to vector<32x1xf32>
    %143 = vector.broadcast %142 : vector<32x1xf32> to vector<32x64xf32>
    %144 = arith.subf %140, %143 : vector<32x64xf32>
    %145 = math.exp %144 : vector<32x64xf32>
    %cst_47 = arith.constant dense<0.000000e+00> : vector<32xf32>
    %146 = vector.multi_reduction <add>, %145, %cst_47 [1] : vector<32x64xf32> to vector<32xf32>
    %147 = vector.shape_cast %146 : vector<32xf32> to vector<32x1xf32>
    %148 = tpu.reciprocal %147 {approx = true} : vector<32x1xf32> -> vector<32x1xf32>
    %149 = arith.mulf %147, %148 : vector<32x1xf32>
    %cst_48 = arith.constant 2.000000e+00 : f32
    %150 = vector.broadcast %cst_48 : f32 to vector<32x1xf32>
    %151 = arith.subf %150, %149 : vector<32x1xf32>
    %152 = arith.mulf %148, %151 : vector<32x1xf32>
    %153 = vector.broadcast %152 : vector<32x1xf32> to vector<32x64xf32>
    %154 = arith.mulf %145, %153 : vector<32x64xf32>
    %cst_49 = arith.constant dense<0.000000e+00> : vector<32x32xf32>
    %155 = tpu.matmul %154, %135, %cst_49 {dimension_numbers = #tpu.dot_dimension_numbers<[1], [0], [0], [1], [0, 0, 1, 1], [], []>} : vector<32x64xf32>, vector<64x32xf32>, vector<32x32xf32> -> vector<32x32xf32>
    %156 = vector.extract_strided_slice %155 {offsets = [0, 0], sizes = [8, 32], strides = [1, 1]} : vector<32x32xf32> to vector<8x32xf32>
    %157 = vector.extract_strided_slice %155 {offsets = [8, 0], sizes = [8, 32], strides = [1, 1]} : vector<32x32xf32> to vector<8x32xf32>
    %158 = arith.addf %156, %157 : vector<8x32xf32>
    %159 = vector.extract_strided_slice %155 {offsets = [16, 0], sizes = [8, 32], strides = [1, 1]} : vector<32x32xf32> to vector<8x32xf32>
    %160 = arith.addf %158, %159 : vector<8x32xf32>
    %161 = vector.extract_strided_slice %155 {offsets = [24, 0], sizes = [8, 32], strides = [1, 1]} : vector<32x32xf32> to vector<8x32xf32>
    %162 = arith.addf %160, %161 : vector<8x32xf32>
    %c160_50 = arith.constant 160 : index
    %c0_51 = arith.constant 0 : index
    %163 = vector.load %arg4[%c160_50, %c0_51] : memref<168x128xf32, #tpu.memory_space<vmem>>, vector<8x64xf32>
    %164 = vector.extract_strided_slice %163 {offsets = [0, 0], sizes = [1, 32], strides = [1, 1]} : vector<8x64xf32> to vector<1x32xf32>
    %165 = vector.extract_strided_slice %163 {offsets = [1, 0], sizes = [1, 32], strides = [1, 1]} : vector<8x64xf32> to vector<1x32xf32>
    %166 = vector.extract_strided_slice %163 {offsets = [2, 0], sizes = [1, 32], strides = [1, 1]} : vector<8x64xf32> to vector<1x32xf32>
    %167 = vector.extract_strided_slice %163 {offsets = [3, 0], sizes = [1, 32], strides = [1, 1]} : vector<8x64xf32> to vector<1x32xf32>
    %168 = vector.extract_strided_slice %163 {offsets = [4, 0], sizes = [1, 32], strides = [1, 1]} : vector<8x64xf32> to vector<1x32xf32>
    %169 = vector.extract_strided_slice %163 {offsets = [5, 0], sizes = [1, 64], strides = [1, 1]} : vector<8x64xf32> to vector<1x64xf32>
    %170 = vector.extract_strided_slice %163 {offsets = [6, 0], sizes = [1, 32], strides = [1, 1]} : vector<8x64xf32> to vector<1x32xf32>
    %171 = arith.addf %3, %162 : vector<8x32xf32>
    %172 = vector.broadcast %164 : vector<1x32xf32> to vector<8x32xf32>
    %173 = arith.addf %171, %172 : vector<8x32xf32>
    %cst_52 = arith.constant dense<0.000000e+00> : vector<8xf32>
    %174 = vector.multi_reduction <add>, %173, %cst_52 [1] : vector<8x32xf32> to vector<8xf32>
    %175 = vector.shape_cast %174 : vector<8xf32> to vector<8x1xf32>
    %cst_53 = arith.constant 3.200000e+01 : f32
    %176 = vector.broadcast %cst_53 : f32 to vector<8x1xf32>
    %177 = arith.divf %175, %176 : vector<8x1xf32>
    %178 = vector.broadcast %177 : vector<8x1xf32> to vector<8x32xf32>
    %179 = arith.subf %173, %178 : vector<8x32xf32>
    %180 = arith.mulf %179, %179 : vector<8x32xf32>
    %cst_54 = arith.constant dense<0.000000e+00> : vector<8xf32>
    %181 = vector.multi_reduction <add>, %180, %cst_54 [1] : vector<8x32xf32> to vector<8xf32>
    %182 = vector.shape_cast %181 : vector<8xf32> to vector<8x1xf32>
    %cst_55 = arith.constant 3.200000e+01 : f32
    %183 = vector.broadcast %cst_55 : f32 to vector<8x1xf32>
    %184 = arith.divf %182, %183 : vector<8x1xf32>
    %185 = vector.broadcast %177 : vector<8x1xf32> to vector<8x32xf32>
    %186 = arith.subf %173, %185 : vector<8x32xf32>
    %cst_56 = arith.constant 9.99999974E-6 : f32
    %187 = vector.broadcast %cst_56 : f32 to vector<8x1xf32>
    %188 = arith.addf %184, %187 : vector<8x1xf32>
    %189 = math.rsqrt %188 : vector<8x1xf32>
    %190 = vector.broadcast %189 : vector<8x1xf32> to vector<8x32xf32>
    %191 = arith.mulf %186, %190 : vector<8x32xf32>
    %192 = vector.broadcast %165 : vector<1x32xf32> to vector<8x32xf32>
    %193 = arith.mulf %191, %192 : vector<8x32xf32>
    %194 = vector.broadcast %166 : vector<1x32xf32> to vector<8x32xf32>
    %195 = arith.addf %193, %194 : vector<8x32xf32>
    %c64_57 = arith.constant 64 : index
    %c0_58 = arith.constant 0 : index
    %196 = vector.load %arg4[%c64_57, %c0_58] : memref<168x128xf32, #tpu.memory_space<vmem>>, vector<32x64xf32>
    %cst_59 = arith.constant dense<0.000000e+00> : vector<8x64xf32>
    %197 = tpu.matmul %195, %196, %cst_59 {dimension_numbers = #tpu.dot_dimension_numbers<[1], [0], [0], [1], [0, 0, 1, 1], [], []>} : vector<8x32xf32>, vector<32x64xf32>, vector<8x64xf32> -> vector<8x64xf32>
    %198 = vector.broadcast %169 : vector<1x64xf32> to vector<8x64xf32>
    %199 = arith.addf %197, %198 : vector<8x64xf32>
    %cst_60 = arith.constant 0.000000e+00 : f32
    %200 = vector.broadcast %cst_60 : f32 to vector<8x64xf32>
    %201 = arith.maximumf %199, %200 : vector<8x64xf32>
    %c96_61 = arith.constant 96 : index
    %c0_62 = arith.constant 0 : index
    %202 = vector.load %arg4[%c96_61, %c0_62] : memref<168x128xf32, #tpu.memory_space<vmem>>, vector<64x32xf32>
    %cst_63 = arith.constant dense<0.000000e+00> : vector<8x32xf32>
    %203 = tpu.matmul %201, %202, %cst_63 {dimension_numbers = #tpu.dot_dimension_numbers<[1], [0], [0], [1], [0, 0, 1, 1], [], []>} : vector<8x64xf32>, vector<64x32xf32>, vector<8x32xf32> -> vector<8x32xf32>
    %204 = vector.broadcast %170 : vector<1x32xf32> to vector<8x32xf32>
    %205 = arith.addf %203, %204 : vector<8x32xf32>
    %206 = arith.addf %195, %205 : vector<8x32xf32>
    %cst_64 = arith.constant dense<0.000000e+00> : vector<8xf32>
    %207 = vector.multi_reduction <add>, %206, %cst_64 [1] : vector<8x32xf32> to vector<8xf32>
    %208 = vector.shape_cast %207 : vector<8xf32> to vector<8x1xf32>
    %cst_65 = arith.constant 3.200000e+01 : f32
    %209 = vector.broadcast %cst_65 : f32 to vector<8x1xf32>
    %210 = arith.divf %208, %209 : vector<8x1xf32>
    %211 = vector.broadcast %210 : vector<8x1xf32> to vector<8x32xf32>
    %212 = arith.subf %206, %211 : vector<8x32xf32>
    %213 = arith.mulf %212, %212 : vector<8x32xf32>
    %cst_66 = arith.constant dense<0.000000e+00> : vector<8xf32>
    %214 = vector.multi_reduction <add>, %213, %cst_66 [1] : vector<8x32xf32> to vector<8xf32>
    %215 = vector.shape_cast %214 : vector<8xf32> to vector<8x1xf32>
    %cst_67 = arith.constant 3.200000e+01 : f32
    %216 = vector.broadcast %cst_67 : f32 to vector<8x1xf32>
    %217 = arith.divf %215, %216 : vector<8x1xf32>
    %218 = vector.broadcast %210 : vector<8x1xf32> to vector<8x32xf32>
    %219 = arith.subf %206, %218 : vector<8x32xf32>
    %cst_68 = arith.constant 9.99999974E-6 : f32
    %220 = vector.broadcast %cst_68 : f32 to vector<8x1xf32>
    %221 = arith.addf %217, %220 : vector<8x1xf32>
    %222 = math.rsqrt %221 : vector<8x1xf32>
    %223 = vector.broadcast %222 : vector<8x1xf32> to vector<8x32xf32>
    %224 = arith.mulf %219, %223 : vector<8x32xf32>
    %225 = vector.broadcast %167 : vector<1x32xf32> to vector<8x32xf32>
    %226 = arith.mulf %224, %225 : vector<8x32xf32>
    %227 = vector.broadcast %168 : vector<1x32xf32> to vector<8x32xf32>
    %228 = arith.addf %226, %227 : vector<8x32xf32>
    %c1_i32 = arith.constant 1 : i32
    %c0_69 = arith.constant 0 : index
    %c0_70 = arith.constant 0 : index
    %229 = vector.load %arg3[%c0_69, %c0_70] : memref<168x128xf32, #tpu.memory_space<vmem>>, vector<32x64xf32>
    %cst_71 = arith.constant dense<0.000000e+00> : vector<16x64xf32>
    %230 = tpu.matmul %112, %229, %cst_71 {dimension_numbers = #tpu.dot_dimension_numbers<[1], [0], [0], [1], [0, 0, 1, 1], [], []>} : vector<16x32xf32>, vector<32x64xf32>, vector<16x64xf32> -> vector<16x64xf32>
    %c32_72 = arith.constant 32 : index
    %c0_73 = arith.constant 0 : index
    %231 = vector.load %arg3[%c32_72, %c0_73] : memref<168x128xf32, #tpu.memory_space<vmem>>, vector<32x128xf32>
    %cst_74 = arith.constant dense<0.000000e+00> : vector<16x128xf32>
    %232 = tpu.matmul %112, %231, %cst_74 {dimension_numbers = #tpu.dot_dimension_numbers<[1], [0], [0], [1], [0, 0, 1, 1], [], []>} : vector<16x32xf32>, vector<32x128xf32>, vector<16x128xf32> -> vector<16x128xf32>
    %233 = vector.extract_strided_slice %230 {offsets = [0, 0], sizes = [16, 16], strides = [1, 1]} : vector<16x64xf32> to vector<16x16xf32>
    %234 = vector.extract_strided_slice %230 {offsets = [0, 16], sizes = [16, 16], strides = [1, 1]} : vector<16x64xf32> to vector<16x16xf32>
    %235 = vector.extract_strided_slice %230 {offsets = [0, 32], sizes = [16, 16], strides = [1, 1]} : vector<16x64xf32> to vector<16x16xf32>
    %236 = vector.extract_strided_slice %230 {offsets = [0, 48], sizes = [16, 16], strides = [1, 1]} : vector<16x64xf32> to vector<16x16xf32>
    %237 = tpu.concatenate %233, %234, %235, %236 in 0 : vector<16x16xf32>, vector<16x16xf32>, vector<16x16xf32>, vector<16x16xf32> -> vector<64x16xf32>
    %238 = vector.extract_strided_slice %237 {offsets = [0, 0], sizes = [64, 8], strides = [1, 1]} : vector<64x16xf32> to vector<64x8xf32>
    %239 = vector.extract_strided_slice %237 {offsets = [0, 8], sizes = [64, 8], strides = [1, 1]} : vector<64x16xf32> to vector<64x8xf32>
    %240 = vector.extract_strided_slice %232 {offsets = [0, 0], sizes = [16, 32], strides = [1, 1]} : vector<16x128xf32> to vector<16x32xf32>
    %241 = vector.extract_strided_slice %232 {offsets = [0, 32], sizes = [16, 32], strides = [1, 1]} : vector<16x128xf32> to vector<16x32xf32>
    %242 = vector.extract_strided_slice %232 {offsets = [0, 64], sizes = [16, 32], strides = [1, 1]} : vector<16x128xf32> to vector<16x32xf32>
    %243 = vector.extract_strided_slice %232 {offsets = [0, 96], sizes = [16, 32], strides = [1, 1]} : vector<16x128xf32> to vector<16x32xf32>
    %244 = tpu.concatenate %240, %241, %242, %243 in 0 : vector<16x32xf32>, vector<16x32xf32>, vector<16x32xf32>, vector<16x32xf32> -> vector<64x32xf32>
    %cst_75 = arith.constant dense<0.000000e+00> : vector<64x64xf32>
    %245 = tpu.matmul %238, %239, %cst_75 {dimension_numbers = #tpu.dot_dimension_numbers<[1], [1], [0], [0], [0, 0, 1, 0], [], []>} : vector<64x8xf32>, vector<64x8xf32>, vector<64x64xf32> -> vector<64x64xf32>
    %cst_76 = arith.constant 0.353553385 : f32
    %246 = vector.broadcast %cst_76 : f32 to vector<64x64xf32>
    %247 = arith.mulf %245, %246 : vector<64x64xf32>
    %c0_77 = arith.constant 0 : index
    %c0_78 = arith.constant 0 : index
    %248 = vector.load %arg5[%c0_77, %c0_78] : memref<64x64xf32, #tpu.memory_space<vmem>>, vector<64x64xf32>
    %249 = arith.addf %247, %248 : vector<64x64xf32>
    %cst_79 = arith.constant dense<0xFF800000> : vector<64xf32>
    %250 = vector.multi_reduction <maximumf>, %249, %cst_79 [1] : vector<64x64xf32> to vector<64xf32>
    %251 = vector.shape_cast %250 : vector<64xf32> to vector<64x1xf32>
    %252 = vector.broadcast %251 : vector<64x1xf32> to vector<64x64xf32>
    %253 = arith.subf %249, %252 : vector<64x64xf32>
    %254 = math.exp %253 : vector<64x64xf32>
    %cst_80 = arith.constant dense<0.000000e+00> : vector<64xf32>
    %255 = vector.multi_reduction <add>, %254, %cst_80 [1] : vector<64x64xf32> to vector<64xf32>
    %256 = vector.shape_cast %255 : vector<64xf32> to vector<64x1xf32>
    %257 = tpu.reciprocal %256 {approx = true} : vector<64x1xf32> -> vector<64x1xf32>
    %258 = arith.mulf %256, %257 : vector<64x1xf32>
    %cst_81 = arith.constant 2.000000e+00 : f32
    %259 = vector.broadcast %cst_81 : f32 to vector<64x1xf32>
    %260 = arith.subf %259, %258 : vector<64x1xf32>
    %261 = arith.mulf %257, %260 : vector<64x1xf32>
    %262 = vector.broadcast %261 : vector<64x1xf32> to vector<64x64xf32>
    %263 = arith.mulf %254, %262 : vector<64x64xf32>
    %cst_82 = arith.constant dense<0.000000e+00> : vector<64x32xf32>
    %264 = tpu.matmul %263, %244, %cst_82 {dimension_numbers = #tpu.dot_dimension_numbers<[1], [0], [0], [1], [0, 0, 1, 1], [], []>} : vector<64x64xf32>, vector<64x32xf32>, vector<64x32xf32> -> vector<64x32xf32>
    %265 = vector.extract_strided_slice %264 {offsets = [0, 0], sizes = [16, 32], strides = [1, 1]} : vector<64x32xf32> to vector<16x32xf32>
    %266 = vector.extract_strided_slice %264 {offsets = [16, 0], sizes = [16, 32], strides = [1, 1]} : vector<64x32xf32> to vector<16x32xf32>
    %267 = arith.addf %265, %266 : vector<16x32xf32>
    %268 = vector.extract_strided_slice %264 {offsets = [32, 0], sizes = [16, 32], strides = [1, 1]} : vector<64x32xf32> to vector<16x32xf32>
    %269 = arith.addf %267, %268 : vector<16x32xf32>
    %270 = vector.extract_strided_slice %264 {offsets = [48, 0], sizes = [16, 32], strides = [1, 1]} : vector<64x32xf32> to vector<16x32xf32>
    %271 = arith.addf %269, %270 : vector<16x32xf32>
    %c160_83 = arith.constant 160 : index
    %c0_84 = arith.constant 0 : index
    %272 = vector.load %arg3[%c160_83, %c0_84] : memref<168x128xf32, #tpu.memory_space<vmem>>, vector<8x64xf32>
    %273 = vector.extract_strided_slice %272 {offsets = [0, 0], sizes = [1, 32], strides = [1, 1]} : vector<8x64xf32> to vector<1x32xf32>
    %274 = vector.extract_strided_slice %272 {offsets = [1, 0], sizes = [1, 32], strides = [1, 1]} : vector<8x64xf32> to vector<1x32xf32>
    %275 = vector.extract_strided_slice %272 {offsets = [2, 0], sizes = [1, 32], strides = [1, 1]} : vector<8x64xf32> to vector<1x32xf32>
    %276 = vector.extract_strided_slice %272 {offsets = [3, 0], sizes = [1, 32], strides = [1, 1]} : vector<8x64xf32> to vector<1x32xf32>
    %277 = vector.extract_strided_slice %272 {offsets = [4, 0], sizes = [1, 32], strides = [1, 1]} : vector<8x64xf32> to vector<1x32xf32>
    %278 = vector.extract_strided_slice %272 {offsets = [5, 0], sizes = [1, 64], strides = [1, 1]} : vector<8x64xf32> to vector<1x64xf32>
    %279 = vector.extract_strided_slice %272 {offsets = [6, 0], sizes = [1, 32], strides = [1, 1]} : vector<8x64xf32> to vector<1x32xf32>
    %280 = arith.addf %112, %271 : vector<16x32xf32>
    %281 = vector.broadcast %273 : vector<1x32xf32> to vector<16x32xf32>
    %282 = arith.addf %280, %281 : vector<16x32xf32>
    %cst_85 = arith.constant dense<0.000000e+00> : vector<16xf32>
    %283 = vector.multi_reduction <add>, %282, %cst_85 [1] : vector<16x32xf32> to vector<16xf32>
    %284 = vector.shape_cast %283 : vector<16xf32> to vector<16x1xf32>
    %cst_86 = arith.constant 3.200000e+01 : f32
    %285 = vector.broadcast %cst_86 : f32 to vector<16x1xf32>
    %286 = arith.divf %284, %285 : vector<16x1xf32>
    %287 = vector.broadcast %286 : vector<16x1xf32> to vector<16x32xf32>
    %288 = arith.subf %282, %287 : vector<16x32xf32>
    %289 = arith.mulf %288, %288 : vector<16x32xf32>
    %cst_87 = arith.constant dense<0.000000e+00> : vector<16xf32>
    %290 = vector.multi_reduction <add>, %289, %cst_87 [1] : vector<16x32xf32> to vector<16xf32>
    %291 = vector.shape_cast %290 : vector<16xf32> to vector<16x1xf32>
    %cst_88 = arith.constant 3.200000e+01 : f32
    %292 = vector.broadcast %cst_88 : f32 to vector<16x1xf32>
    %293 = arith.divf %291, %292 : vector<16x1xf32>
    %294 = vector.broadcast %286 : vector<16x1xf32> to vector<16x32xf32>
    %295 = arith.subf %282, %294 : vector<16x32xf32>
    %cst_89 = arith.constant 9.99999974E-6 : f32
    %296 = vector.broadcast %cst_89 : f32 to vector<16x1xf32>
    %297 = arith.addf %293, %296 : vector<16x1xf32>
    %298 = math.rsqrt %297 : vector<16x1xf32>
    %299 = vector.broadcast %298 : vector<16x1xf32> to vector<16x32xf32>
    %300 = arith.mulf %295, %299 : vector<16x32xf32>
    %301 = vector.broadcast %274 : vector<1x32xf32> to vector<16x32xf32>
    %302 = arith.mulf %300, %301 : vector<16x32xf32>
    %303 = vector.broadcast %275 : vector<1x32xf32> to vector<16x32xf32>
    %304 = arith.addf %302, %303 : vector<16x32xf32>
    %c64_90 = arith.constant 64 : index
    %c0_91 = arith.constant 0 : index
    %305 = vector.load %arg3[%c64_90, %c0_91] : memref<168x128xf32, #tpu.memory_space<vmem>>, vector<32x64xf32>
    %cst_92 = arith.constant dense<0.000000e+00> : vector<16x64xf32>
    %306 = tpu.matmul %304, %305, %cst_92 {dimension_numbers = #tpu.dot_dimension_numbers<[1], [0], [0], [1], [0, 0, 1, 1], [], []>} : vector<16x32xf32>, vector<32x64xf32>, vector<16x64xf32> -> vector<16x64xf32>
    %307 = vector.broadcast %278 : vector<1x64xf32> to vector<16x64xf32>
    %308 = arith.addf %306, %307 : vector<16x64xf32>
    %cst_93 = arith.constant 0.000000e+00 : f32
    %309 = vector.broadcast %cst_93 : f32 to vector<16x64xf32>
    %310 = arith.maximumf %308, %309 : vector<16x64xf32>
    %c96_94 = arith.constant 96 : index
    %c0_95 = arith.constant 0 : index
    %311 = vector.load %arg3[%c96_94, %c0_95] : memref<168x128xf32, #tpu.memory_space<vmem>>, vector<64x32xf32>
    %cst_96 = arith.constant dense<0.000000e+00> : vector<16x32xf32>
    %312 = tpu.matmul %310, %311, %cst_96 {dimension_numbers = #tpu.dot_dimension_numbers<[1], [0], [0], [1], [0, 0, 1, 1], [], []>} : vector<16x64xf32>, vector<64x32xf32>, vector<16x32xf32> -> vector<16x32xf32>
    %313 = vector.broadcast %279 : vector<1x32xf32> to vector<16x32xf32>
    %314 = arith.addf %312, %313 : vector<16x32xf32>
    %315 = arith.addf %304, %314 : vector<16x32xf32>
    %cst_97 = arith.constant dense<0.000000e+00> : vector<16xf32>
    %316 = vector.multi_reduction <add>, %315, %cst_97 [1] : vector<16x32xf32> to vector<16xf32>
    %317 = vector.shape_cast %316 : vector<16xf32> to vector<16x1xf32>
    %cst_98 = arith.constant 3.200000e+01 : f32
    %318 = vector.broadcast %cst_98 : f32 to vector<16x1xf32>
    %319 = arith.divf %317, %318 : vector<16x1xf32>
    %320 = vector.broadcast %319 : vector<16x1xf32> to vector<16x32xf32>
    %321 = arith.subf %315, %320 : vector<16x32xf32>
    %322 = arith.mulf %321, %321 : vector<16x32xf32>
    %cst_99 = arith.constant dense<0.000000e+00> : vector<16xf32>
    %323 = vector.multi_reduction <add>, %322, %cst_99 [1] : vector<16x32xf32> to vector<16xf32>
    %324 = vector.shape_cast %323 : vector<16xf32> to vector<16x1xf32>
    %cst_100 = arith.constant 3.200000e+01 : f32
    %325 = vector.broadcast %cst_100 : f32 to vector<16x1xf32>
    %326 = arith.divf %324, %325 : vector<16x1xf32>
    %327 = vector.broadcast %319 : vector<16x1xf32> to vector<16x32xf32>
    %328 = arith.subf %315, %327 : vector<16x32xf32>
    %cst_101 = arith.constant 9.99999974E-6 : f32
    %329 = vector.broadcast %cst_101 : f32 to vector<16x1xf32>
    %330 = arith.addf %326, %329 : vector<16x1xf32>
    %331 = math.rsqrt %330 : vector<16x1xf32>
    %332 = vector.broadcast %331 : vector<16x1xf32> to vector<16x32xf32>
    %333 = arith.mulf %328, %332 : vector<16x32xf32>
    %334 = vector.broadcast %276 : vector<1x32xf32> to vector<16x32xf32>
    %335 = arith.mulf %333, %334 : vector<16x32xf32>
    %336 = vector.broadcast %277 : vector<1x32xf32> to vector<16x32xf32>
    %337 = arith.addf %335, %336 : vector<16x32xf32>
    %c0_102 = arith.constant 0 : index
    %c0_103 = arith.constant 0 : index
    %338 = vector.load %arg4[%c0_102, %c0_103] : memref<168x128xf32, #tpu.memory_space<vmem>>, vector<32x64xf32>
    %cst_104 = arith.constant dense<0.000000e+00> : vector<8x64xf32>
    %339 = tpu.matmul %228, %338, %cst_104 {dimension_numbers = #tpu.dot_dimension_numbers<[1], [0], [0], [1], [0, 0, 1, 1], [], []>} : vector<8x32xf32>, vector<32x64xf32>, vector<8x64xf32> -> vector<8x64xf32>
    %c0_105 = arith.constant 0 : index
    %c0_106 = arith.constant 0 : index
    %340 = vector.load %arg4[%c0_105, %c0_106] : memref<168x128xf32, #tpu.memory_space<vmem>>, vector<32x64xf32>
    %cst_107 = arith.constant dense<0.000000e+00> : vector<16x64xf32>
    %341 = tpu.matmul %337, %340, %cst_107 {dimension_numbers = #tpu.dot_dimension_numbers<[1], [0], [0], [1], [0, 0, 1, 1], [], []>} : vector<16x32xf32>, vector<32x64xf32>, vector<16x64xf32> -> vector<16x64xf32>
    %c32_108 = arith.constant 32 : index
    %c0_109 = arith.constant 0 : index
    %342 = vector.load %arg4[%c32_108, %c0_109] : memref<168x128xf32, #tpu.memory_space<vmem>>, vector<32x128xf32>
    %cst_110 = arith.constant dense<0.000000e+00> : vector<16x128xf32>
    %343 = tpu.matmul %337, %342, %cst_110 {dimension_numbers = #tpu.dot_dimension_numbers<[1], [0], [0], [1], [0, 0, 1, 1], [], []>} : vector<16x32xf32>, vector<32x128xf32>, vector<16x128xf32> -> vector<16x128xf32>
    %344 = vector.extract_strided_slice %339 {offsets = [0, 0], sizes = [8, 16], strides = [1, 1]} : vector<8x64xf32> to vector<8x16xf32>
    %345 = vector.extract_strided_slice %339 {offsets = [0, 16], sizes = [8, 16], strides = [1, 1]} : vector<8x64xf32> to vector<8x16xf32>
    %346 = vector.extract_strided_slice %339 {offsets = [0, 32], sizes = [8, 16], strides = [1, 1]} : vector<8x64xf32> to vector<8x16xf32>
    %347 = vector.extract_strided_slice %339 {offsets = [0, 48], sizes = [8, 16], strides = [1, 1]} : vector<8x64xf32> to vector<8x16xf32>
    %348 = tpu.concatenate %344, %345, %346, %347 in 0 : vector<8x16xf32>, vector<8x16xf32>, vector<8x16xf32>, vector<8x16xf32> -> vector<32x16xf32>
    %349 = vector.extract_strided_slice %348 {offsets = [0, 0], sizes = [32, 8], strides = [1, 1]} : vector<32x16xf32> to vector<32x8xf32>
    %350 = vector.extract_strided_slice %341 {offsets = [0, 0], sizes = [16, 16], strides = [1, 1]} : vector<16x64xf32> to vector<16x16xf32>
    %351 = vector.extract_strided_slice %341 {offsets = [0, 16], sizes = [16, 16], strides = [1, 1]} : vector<16x64xf32> to vector<16x16xf32>
    %352 = vector.extract_strided_slice %341 {offsets = [0, 32], sizes = [16, 16], strides = [1, 1]} : vector<16x64xf32> to vector<16x16xf32>
    %353 = vector.extract_strided_slice %341 {offsets = [0, 48], sizes = [16, 16], strides = [1, 1]} : vector<16x64xf32> to vector<16x16xf32>
    %354 = tpu.concatenate %350, %351, %352, %353 in 0 : vector<16x16xf32>, vector<16x16xf32>, vector<16x16xf32>, vector<16x16xf32> -> vector<64x16xf32>
    %355 = vector.extract_strided_slice %354 {offsets = [0, 8], sizes = [64, 8], strides = [1, 1]} : vector<64x16xf32> to vector<64x8xf32>
    %356 = vector.extract_strided_slice %343 {offsets = [0, 0], sizes = [16, 32], strides = [1, 1]} : vector<16x128xf32> to vector<16x32xf32>
    %357 = vector.extract_strided_slice %343 {offsets = [0, 32], sizes = [16, 32], strides = [1, 1]} : vector<16x128xf32> to vector<16x32xf32>
    %358 = vector.extract_strided_slice %343 {offsets = [0, 64], sizes = [16, 32], strides = [1, 1]} : vector<16x128xf32> to vector<16x32xf32>
    %359 = vector.extract_strided_slice %343 {offsets = [0, 96], sizes = [16, 32], strides = [1, 1]} : vector<16x128xf32> to vector<16x32xf32>
    %360 = tpu.concatenate %356, %357, %358, %359 in 0 : vector<16x32xf32>, vector<16x32xf32>, vector<16x32xf32>, vector<16x32xf32> -> vector<64x32xf32>
    %cst_111 = arith.constant dense<0.000000e+00> : vector<32x64xf32>
    %361 = tpu.matmul %349, %355, %cst_111 {dimension_numbers = #tpu.dot_dimension_numbers<[1], [1], [0], [0], [0, 0, 1, 0], [], []>} : vector<32x8xf32>, vector<64x8xf32>, vector<32x64xf32> -> vector<32x64xf32>
    %cst_112 = arith.constant 0.353553385 : f32
    %362 = vector.broadcast %cst_112 : f32 to vector<32x64xf32>
    %363 = arith.mulf %361, %362 : vector<32x64xf32>
    %c0_113 = arith.constant 0 : index
    %c0_114 = arith.constant 0 : index
    %364 = vector.load %arg6[%c0_113, %c0_114] : memref<32x64xf32, #tpu.memory_space<vmem>>, vector<32x64xf32>
    %365 = arith.addf %363, %364 : vector<32x64xf32>
    %cst_115 = arith.constant dense<0xFF800000> : vector<32xf32>
    %366 = vector.multi_reduction <maximumf>, %365, %cst_115 [1] : vector<32x64xf32> to vector<32xf32>
    %367 = vector.shape_cast %366 : vector<32xf32> to vector<32x1xf32>
    %368 = vector.broadcast %367 : vector<32x1xf32> to vector<32x64xf32>
    %369 = arith.subf %365, %368 : vector<32x64xf32>
    %370 = math.exp %369 : vector<32x64xf32>
    %cst_116 = arith.constant dense<0.000000e+00> : vector<32xf32>
    %371 = vector.multi_reduction <add>, %370, %cst_116 [1] : vector<32x64xf32> to vector<32xf32>
    %372 = vector.shape_cast %371 : vector<32xf32> to vector<32x1xf32>
    %373 = tpu.reciprocal %372 {approx = true} : vector<32x1xf32> -> vector<32x1xf32>
    %374 = arith.mulf %372, %373 : vector<32x1xf32>
    %cst_117 = arith.constant 2.000000e+00 : f32
    %375 = vector.broadcast %cst_117 : f32 to vector<32x1xf32>
    %376 = arith.subf %375, %374 : vector<32x1xf32>
    %377 = arith.mulf %373, %376 : vector<32x1xf32>
    %378 = vector.broadcast %377 : vector<32x1xf32> to vector<32x64xf32>
    %379 = arith.mulf %370, %378 : vector<32x64xf32>
    %cst_118 = arith.constant dense<0.000000e+00> : vector<32x32xf32>
    %380 = tpu.matmul %379, %360, %cst_118 {dimension_numbers = #tpu.dot_dimension_numbers<[1], [0], [0], [1], [0, 0, 1, 1], [], []>} : vector<32x64xf32>, vector<64x32xf32>, vector<32x32xf32> -> vector<32x32xf32>
    %381 = vector.extract_strided_slice %380 {offsets = [0, 0], sizes = [8, 32], strides = [1, 1]} : vector<32x32xf32> to vector<8x32xf32>
    %382 = vector.extract_strided_slice %380 {offsets = [8, 0], sizes = [8, 32], strides = [1, 1]} : vector<32x32xf32> to vector<8x32xf32>
    %383 = arith.addf %381, %382 : vector<8x32xf32>
    %384 = vector.extract_strided_slice %380 {offsets = [16, 0], sizes = [8, 32], strides = [1, 1]} : vector<32x32xf32> to vector<8x32xf32>
    %385 = arith.addf %383, %384 : vector<8x32xf32>
    %386 = vector.extract_strided_slice %380 {offsets = [24, 0], sizes = [8, 32], strides = [1, 1]} : vector<32x32xf32> to vector<8x32xf32>
    %387 = arith.addf %385, %386 : vector<8x32xf32>
    %c160_119 = arith.constant 160 : index
    %c0_120 = arith.constant 0 : index
    %388 = vector.load %arg4[%c160_119, %c0_120] : memref<168x128xf32, #tpu.memory_space<vmem>>, vector<8x64xf32>
    %389 = vector.extract_strided_slice %388 {offsets = [0, 0], sizes = [1, 32], strides = [1, 1]} : vector<8x64xf32> to vector<1x32xf32>
    %390 = vector.extract_strided_slice %388 {offsets = [1, 0], sizes = [1, 32], strides = [1, 1]} : vector<8x64xf32> to vector<1x32xf32>
    %391 = vector.extract_strided_slice %388 {offsets = [2, 0], sizes = [1, 32], strides = [1, 1]} : vector<8x64xf32> to vector<1x32xf32>
    %392 = vector.extract_strided_slice %388 {offsets = [3, 0], sizes = [1, 32], strides = [1, 1]} : vector<8x64xf32> to vector<1x32xf32>
    %393 = vector.extract_strided_slice %388 {offsets = [4, 0], sizes = [1, 32], strides = [1, 1]} : vector<8x64xf32> to vector<1x32xf32>
    %394 = vector.extract_strided_slice %388 {offsets = [5, 0], sizes = [1, 64], strides = [1, 1]} : vector<8x64xf32> to vector<1x64xf32>
    %395 = vector.extract_strided_slice %388 {offsets = [6, 0], sizes = [1, 32], strides = [1, 1]} : vector<8x64xf32> to vector<1x32xf32>
    %396 = arith.addf %228, %387 : vector<8x32xf32>
    %397 = vector.broadcast %389 : vector<1x32xf32> to vector<8x32xf32>
    %398 = arith.addf %396, %397 : vector<8x32xf32>
    %cst_121 = arith.constant dense<0.000000e+00> : vector<8xf32>
    %399 = vector.multi_reduction <add>, %398, %cst_121 [1] : vector<8x32xf32> to vector<8xf32>
    %400 = vector.shape_cast %399 : vector<8xf32> to vector<8x1xf32>
    %cst_122 = arith.constant 3.200000e+01 : f32
    %401 = vector.broadcast %cst_122 : f32 to vector<8x1xf32>
    %402 = arith.divf %400, %401 : vector<8x1xf32>
    %403 = vector.broadcast %402 : vector<8x1xf32> to vector<8x32xf32>
    %404 = arith.subf %398, %403 : vector<8x32xf32>
    %405 = arith.mulf %404, %404 : vector<8x32xf32>
    %cst_123 = arith.constant dense<0.000000e+00> : vector<8xf32>
    %406 = vector.multi_reduction <add>, %405, %cst_123 [1] : vector<8x32xf32> to vector<8xf32>
    %407 = vector.shape_cast %406 : vector<8xf32> to vector<8x1xf32>
    %cst_124 = arith.constant 3.200000e+01 : f32
    %408 = vector.broadcast %cst_124 : f32 to vector<8x1xf32>
    %409 = arith.divf %407, %408 : vector<8x1xf32>
    %410 = vector.broadcast %402 : vector<8x1xf32> to vector<8x32xf32>
    %411 = arith.subf %398, %410 : vector<8x32xf32>
    %cst_125 = arith.constant 9.99999974E-6 : f32
    %412 = vector.broadcast %cst_125 : f32 to vector<8x1xf32>
    %413 = arith.addf %409, %412 : vector<8x1xf32>
    %414 = math.rsqrt %413 : vector<8x1xf32>
    %415 = vector.broadcast %414 : vector<8x1xf32> to vector<8x32xf32>
    %416 = arith.mulf %411, %415 : vector<8x32xf32>
    %417 = vector.broadcast %390 : vector<1x32xf32> to vector<8x32xf32>
    %418 = arith.mulf %416, %417 : vector<8x32xf32>
    %419 = vector.broadcast %391 : vector<1x32xf32> to vector<8x32xf32>
    %420 = arith.addf %418, %419 : vector<8x32xf32>
    %c64_126 = arith.constant 64 : index
    %c0_127 = arith.constant 0 : index
    %421 = vector.load %arg4[%c64_126, %c0_127] : memref<168x128xf32, #tpu.memory_space<vmem>>, vector<32x64xf32>
    %cst_128 = arith.constant dense<0.000000e+00> : vector<8x64xf32>
    %422 = tpu.matmul %420, %421, %cst_128 {dimension_numbers = #tpu.dot_dimension_numbers<[1], [0], [0], [1], [0, 0, 1, 1], [], []>} : vector<8x32xf32>, vector<32x64xf32>, vector<8x64xf32> -> vector<8x64xf32>
    %423 = vector.broadcast %394 : vector<1x64xf32> to vector<8x64xf32>
    %424 = arith.addf %422, %423 : vector<8x64xf32>
    %cst_129 = arith.constant 0.000000e+00 : f32
    %425 = vector.broadcast %cst_129 : f32 to vector<8x64xf32>
    %426 = arith.maximumf %424, %425 : vector<8x64xf32>
    %c96_130 = arith.constant 96 : index
    %c0_131 = arith.constant 0 : index
    %427 = vector.load %arg4[%c96_130, %c0_131] : memref<168x128xf32, #tpu.memory_space<vmem>>, vector<64x32xf32>
    %cst_132 = arith.constant dense<0.000000e+00> : vector<8x32xf32>
    %428 = tpu.matmul %426, %427, %cst_132 {dimension_numbers = #tpu.dot_dimension_numbers<[1], [0], [0], [1], [0, 0, 1, 1], [], []>} : vector<8x64xf32>, vector<64x32xf32>, vector<8x32xf32> -> vector<8x32xf32>
    %429 = vector.broadcast %395 : vector<1x32xf32> to vector<8x32xf32>
    %430 = arith.addf %428, %429 : vector<8x32xf32>
    %431 = arith.addf %420, %430 : vector<8x32xf32>
    %cst_133 = arith.constant dense<0.000000e+00> : vector<8xf32>
    %432 = vector.multi_reduction <add>, %431, %cst_133 [1] : vector<8x32xf32> to vector<8xf32>
    %433 = vector.shape_cast %432 : vector<8xf32> to vector<8x1xf32>
    %cst_134 = arith.constant 3.200000e+01 : f32
    %434 = vector.broadcast %cst_134 : f32 to vector<8x1xf32>
    %435 = arith.divf %433, %434 : vector<8x1xf32>
    %436 = vector.broadcast %435 : vector<8x1xf32> to vector<8x32xf32>
    %437 = arith.subf %431, %436 : vector<8x32xf32>
    %438 = arith.mulf %437, %437 : vector<8x32xf32>
    %cst_135 = arith.constant dense<0.000000e+00> : vector<8xf32>
    %439 = vector.multi_reduction <add>, %438, %cst_135 [1] : vector<8x32xf32> to vector<8xf32>
    %440 = vector.shape_cast %439 : vector<8xf32> to vector<8x1xf32>
    %cst_136 = arith.constant 3.200000e+01 : f32
    %441 = vector.broadcast %cst_136 : f32 to vector<8x1xf32>
    %442 = arith.divf %440, %441 : vector<8x1xf32>
    %443 = vector.broadcast %435 : vector<8x1xf32> to vector<8x32xf32>
    %444 = arith.subf %431, %443 : vector<8x32xf32>
    %cst_137 = arith.constant 9.99999974E-6 : f32
    %445 = vector.broadcast %cst_137 : f32 to vector<8x1xf32>
    %446 = arith.addf %442, %445 : vector<8x1xf32>
    %447 = math.rsqrt %446 : vector<8x1xf32>
    %448 = vector.broadcast %447 : vector<8x1xf32> to vector<8x32xf32>
    %449 = arith.mulf %444, %448 : vector<8x32xf32>
    %450 = vector.broadcast %392 : vector<1x32xf32> to vector<8x32xf32>
    %451 = arith.mulf %449, %450 : vector<8x32xf32>
    %452 = vector.broadcast %393 : vector<1x32xf32> to vector<8x32xf32>
    %453 = arith.addf %451, %452 : vector<8x32xf32>
    %cst_138 = arith.constant 0.000000e+00 : f32
    %454 = vector.broadcast %cst_138 : f32 to vector<8x96xf32>
    %455 = tpu.concatenate %453, %454 in 1 : vector<8x32xf32>, vector<8x96xf32> -> vector<8x128xf32>
    %c0_139 = arith.constant 0 : index
    %c0_140 = arith.constant 0 : index
    %c0_141 = arith.constant 0 : index
    %456 = vector.load %arg7[%c0_139, %c0_140, %c0_141] : memref<1x8x128xf32, #tpu.memory_space<vmem>>, vector<1x8x128xf32>
    %457 = vector.shape_cast %456 : vector<1x8x128xf32> to vector<8x128xf32>
    %458 = vector.shape_cast %455 : vector<8x128xf32> to vector<1x8x128xf32>
    tpu.vector_store %arg7[%c0_139, %c0_140, %c0_141], %458 {strides = array<i32>} : memref<1x8x128xf32, #tpu.memory_space<vmem>>, vector<1x8x128xf32>,
    return
  }
  func.func @transform_0(%arg0: i32) -> (i32, i32, i32) {
    %c0_i32 = arith.constant 0 : i32
    %c0_i32_0 = arith.constant 0 : i32
    %c0_i32_1 = arith.constant 0 : i32
    return %arg0, %c0_i32, %c0_i32_0 : i32, i32, i32
  }
  func.func @transform_1(%arg0: i32) -> (i32, i32, i32) {
    %c0_i32 = arith.constant 0 : i32
    %c0_i32_0 = arith.constant 0 : i32
    %c0_i32_1 = arith.constant 0 : i32
    return %arg0, %c0_i32, %c0_i32_0 : i32, i32, i32
  }
  func.func @transform_2(%arg0: i32) -> (i32, i32) {
    %c0_i32 = arith.constant 0 : i32
    %c0_i32_0 = arith.constant 0 : i32
    %c0_i32_1 = arith.constant 0 : i32
    return %c0_i32, %c0_i32_0 : i32, i32
  }
  func.func @transform_3(%arg0: i32) -> (i32, i32) {
    %c0_i32 = arith.constant 0 : i32
    %c0_i32_0 = arith.constant 0 : i32
    %c0_i32_1 = arith.constant 0 : i32
    return %c0_i32, %c0_i32_0 : i32, i32
  }
  func.func @transform_4(%arg0: i32) -> (i32, i32) {
    %c0_i32 = arith.constant 0 : i32
    %c0_i32_0 = arith.constant 0 : i32
    %c0_i32_1 = arith.constant 0 : i32
    return %c0_i32, %c0_i32_0 : i32, i32
  }
  func.func @transform_5(%arg0: i32) -> (i32, i32) {
    %c0_i32 = arith.constant 0 : i32
    %c0_i32_0 = arith.constant 0 : i32
    %c0_i32_1 = arith.constant 0 : i32
    return %c0_i32, %c0_i32_0 : i32, i32
  }
  func.func @transform_6(%arg0: i32) -> (i32, i32, i32) {
    %c0_i32 = arith.constant 0 : i32
    %c0_i32_0 = arith.constant 0 : i32
    %c0_i32_1 = arith.constant 0 : i32
    return %arg0, %c0_i32, %c0_i32_0 : i32, i32, i32
  }
}

</mosaic_0001>

<bundles_post_ra>
// kernel: tnp_transformer_encoder.1
= control target key start
LH: loop header
LB: loop body
LE: loop exit
PB: predicated region body
PF: predicated region fallthrough
CT: control target
= control target key end

     0   :  { %11 = vsyncpa [#allocation3], 0  ;;  %s6211_s0 = inlined_call_operand.vmem [shape: f32[2,16,32], index: 0, kind: input, shape index: {}]   ;;  %s6212_s1 = inlined_call_operand.vmem [shape: f32[2,8,32], index: 1, kind: input, shape index: {}]   ;;  %s6213_s2 = inlined_call_operand.vmem [shape: f32[168,128], index: 2, kind: input, shape index: {}]   ;;  %s6214_s3 = inlined_call_operand.vmem [shape: f32[168,128], index: 3, kind: input, shape index: {}]   ;;  %s6215_s4 = inlined_call_operand.vmem [shape: f32[64,64], index: 4, kind: input, shape index: {}]   ;;  %s6216_s5 = inlined_call_operand.vmem [shape: f32[32,64], index: 5, kind: input, shape index: {}]   ;;  %s6217_s6 = inlined_call_operand.hbm [shape: f32[2,8,128], index: 6, kind: output, shape index: {}]  }
   0x1   :  { %13 = vsyncpa [#allocation3 + $0x1], 0  ;;  %s5189_s21 = smov 0   ;;  %s5191_s22 = smov 0  }
   0x2   :  { %s5193_s23 = smov 0   ;;  %s5195_s24 = smov 0  }
   0x3 LB: > { %s5210_s25 = sadd.s32 4294967295, %s5142_s24   ;;  %s3615_s26 = sadd.s32 4294967294, %s5142_s24   ;;  %s5142_s24 = sphi %s5195_s24, %s6246_s24   ;;  %s5138_s23 = sphi %s5193_s23, %s6245_s23   ;;  %s5134_s22 = sphi %s5191_s22, %s6244_s22   ;;  %s5130_s21 = sphi %s5189_s21, %s6243_s21  }
   0x4   : > { %s5214_s27 = sadd.s32 1, %s5142_s24   ;;  %s162_s28 = sadd.s32 1, %s5138_s23 }
   0x5   : > { %s159_s29 = ssub.s32 %s5142_s24, %s5214_s27  ;;  %p172_p0 = scmp.ne.s32.totalorder %s5138_s23, %s5134_s22 }
   0x6   : > { %p160_p1 = scmp.eq.s32.totalorder %s159_s29, 0  ;;  %p173_p2 = scmp.eq.s32.totalorder %s5210_s25, 1 }
   0x7   : > { %p178_p3 = scmp.ne.s32.totalorder %s5134_s22, %s5130_s21  ;;  %p179_p4 = scmp.eq.s32.totalorder %s3615_s26, 1 }
   0x8   : > { %s5225_s30 = scalar_select %p160_p1, %s5138_s23, %s162_s28  }
   0x9   : > { %p5227_p5 = por %p173_p2, %p172_p0  ;;  %p5231_p6 = por %p179_p4, %p178_p3 }
   0xa   : > { %p3618_p7 = scmp.ge.s32.totalorder %s5142_s24, 1  ;;  %p224_p8 = scmp.lt.s32.totalorder %s5142_s24, 3 }
   0xc   : > { %p225_p9 = pnand %p3618_p7, %p224_p8 }
   0xe   : > { %228 = sbr.rel (%p225_p9) target bundleno = 8399 (0x20cf), region = 44 }
  0x15   : > { %v270_v0 = vld [vmem:[%s6213_s2] sm:$0xff]  ;;  %v271_v1 = vld [vmem:[%s6213_s2 + $0x8] sm:$0xff]  ;;  %v272_v2 = vld [vmem:[%s6213_s2 + $0x10] sm:$0xff]  ;;  %p258_p10 = scmp.lt.s32.totalorder %s5210_s25, 1  ;;  %vm274_vm0 = vcmask 261120   ;;  %vm485_vm1 = vcmask 64512  }
  0x16   : > { %v5247_v3 = vpack.c.bf16 %v271_v1, %v270_v0  ;;  %v273_v4 = vld [vmem:[%s6213_s2 + $0x18] sm:$0xff]  ;;  %s5144_s28 = smov 96   ;;  %s5145_s29 = smov 112   ;;  %vm5294_vm2 = vmpackc.low %vm485_vm1, %vm485_vm1  ;;  %v356_v25 = vld [vmem:[%s6213_s2 + $0x20] sm:$0xff]  ;;  %vm647_vm3 = vcmask 523264   ;;  %vm5151_vm4 = vmmov 0  }
  0x17   : > { %v5252_v5 = vpack.c.bf16 %v273_v4, %v272_v2  ;;  %s5255_s17 = scalar_select %p258_p10, %s5210_s25, 1  ;;  %v357_v26 = vld [vmem:[%s6213_s2 + $0x28] sm:$0xff]  ;;  %v358_v27 = vld [vmem:[%s6213_s2 + $0x30] sm:$0xff]  ;;  %v359_v29 = vld [vmem:[%s6213_s2 + $0x38] sm:$0xff] }
  0x18   : > { %4399 = vmatprep.subr.bf16.mxu0 %v5247_v3  ;;  %s5146_s9 = smov 80   ;;  %s5147_s10 = smov 120   ;;  %v5311_v28 = vpack.c.bf16 %v357_v26, %v356_v25  ;;  %v5316_v30 = vpack.c.bf16 %v359_v29, %v358_v27  ;;  %v632_v47 = vld [vmem:[%s6215_s4 + $0x8] sm:$0xff]  ;;  %v631_v50 = vld [vmem:[%s6215_s4] sm:$0xff]  ;;  %v633_v58 = vld [vmem:[%s6215_s4 + $0x10] sm:$0xff] }
  0x19   : > { %4401 = vmatpush3.bf16.msra.mxu0 %v5247_v3  ;;  %s3737_s18 = sshll.u32 %s5255_s17, 4  ;;  %v634_v61 = vld [vmem:[%s6215_s4 + $0x18] sm:$0xff]  ;;  %v635_v2 = vld [vmem:[%s6215_s4 + $0x20] sm:$0xff]  ;;  %s6220_s15 = smov 32  }
  0x1a   : > { %4403 = vmatprep.subr.bf16.mxu0 %v5252_v5  ;;  %s262_s26 = scalar_lea.vmem %s6211_s0, %s3737_s18  ;;  %4407 = vmatprep.subr.bf16.mxu1 %v5311_v28  ;;  %s6218_s16 = smov 64  }
  0x1b   : > { %v5264_v6 = vld [vmem:[%s262_s26] sm:$0xff]  ;;  %v5271_v7 = vld [vmem:[%s262_s26 + $0x8] sm:$0xff]  ;;  %4409 = vmatpush3.bf16.msra.mxu1 %v5311_v28  ;;  %s3622_s11 = sshll.u32 %s5255_s17, 3 }
  0x1c   : > { %3976 = vmatprep.mubr.msk.f32.mxu0 %vm274_vm0, %v5264_v6  ;;  %3987 = vmatprep.mubr.msk.f32.mxu1 %vm274_vm0, %v5264_v6  ;;  %s266_s26 = scalar_lea.vmem %s6212_s1, %s3622_s11 }
  0x1d   : > { %4405 = vmatpush3.bf16.msra.mxu0 %v5252_v5  ;;  %4411 = vmatprep.subr.bf16.mxu1 %v5316_v30 }
  0x1f   : > { %4413 = vmatpush3.bf16.msra.mxu1 %v5316_v30 }
  0x20   : > { %3977 = vmatmul.mubr.msk.f32.vlgmr.msra.gmra.mrb[0].mxu0 %vm274_vm0, %v5271_v7 }
  0x22   : > { %3988 = vmatmul.mubr.msk.f32.vlgmr.msra.gmra.mrb[0].mxu1 %vm274_vm0, %v5271_v7 }
  0xf3   : > { %v5275_v8 = vpop.f32.mrb[0].mxu0 }
  0xf4   : > { %v347_v9 = vpop.f32.mrb[1].mxu0 }
  0xf5   : > { %441 = vrot.lane.b32.xlu1 %v347_v9, %s5144_s28  ;;  %437 = vrot.lane.b32.xlu0 %v347_v9, %s5145_s29  ;;  %v4778_v10 = vpack.i.bf16 %v5275_v8, %v347_v9  ;;  %v3989_v43 = vpop.f32.mrb[0].mxu1 }
  0xf6   : > { %4006 = vmatprep.mubr.msk.f32.mxu0 %vm485_vm1, %v347_v9  ;;  %v426_v44 = vpop.f32.mrb[1].mxu1 }
  0xf7   : > { %v5344_v45 = vpack.i.bf16 %v3989_v43, %v426_v44  ;;  %v4438_v27 = vpack.c.bf16 %v3989_v43, %v426_v44 }
  0xf9   : > { %443 = vrot.lane.b32.xlu1 %v5275_v8, %s5144_s28  ;;  %439 = vrot.lane.b32.xlu0 %v5275_v8, %s5145_s29 }
  0xfa   : > { %4439 = vmatprep.subr.bf16.mxu1 %v4438_v27 }
  0xfb   : > { %4441 = vmatpush3.bf16.msra.mxu1 %v4438_v27 }
  0xfd   : > { %447 = vrot.lane.b32.xlu1 %v5275_v8, %s5146_s9  ;;  %445 = vrot.lane.b32.xlu0 %v347_v9, %s5146_s9 }
 0x101   : > { %4779 = vrot.lane.b32.xlu0 %v4778_v10, %s5147_s10  ;;  %v636_v10 = vld [vmem:[%s6215_s4 + $0x28] sm:$0xff] }
 0x167   : > { %v442_v11 = vpop.permute.xlu1 %441  ;;  %v438_v12 = vpop.permute.xlu0 %437 }
 0x16b   : > { %v444_v13 = vpop.permute.xlu1 %443  ;;  %v440_v14 = vpop.permute.xlu0 %439 }
 0x16c   : > { %v4788_v15 = vpack.i.bf16 %v444_v13, %v442_v11  ;;  %v4783_v16 = vpack.i.bf16 %v440_v14, %v438_v12 }
 0x16e   : > { %4789 = vrot.lane.b32.xlu0 %v4788_v15, %s5147_s10  ;;  %4784 = vrot.lane.b32.xlu1 %v4783_v16, %s5147_s10  ;;  %v637_v15 = vld [vmem:[%s6215_s4 + $0x30] sm:$0xff] }
 0x16f   : > { %v448_v17 = vpop.permute.xlu1 %447  ;;  %v446_v18 = vpop.permute.xlu0 %445 }
 0x170   : > { %v4793_v19 = vpack.i.bf16 %v448_v17, %v446_v18 }
 0x172   : > { %4794 = vrot.lane.b32.xlu1 %v4793_v19, %s5147_s10 }
 0x173   : > { %v4780_v20 = vpop.permute.xlu0 %4779 }
 0x174   : > { %v4782_v21 = vunpack.i.h.bf16 %v4780_v20  ;;  %v4781_v22 = vunpack.i.l.bf16 %v4780_v20  ;;  %v638_v20 = vld [vmem:[%s6215_s4 + $0x38] sm:$0xff] }
 0x176   : > { %v4414_v24 = vpack.c.bf16 %v4782_v21, %v4781_v22 }
 0x178   : > { %4416 = vmatprep.subr.msk.bf16.mxu0 %vm5294_vm2, %v4414_v24 }
 0x179   : > { %4419 = vmatpush3.bf16.xpose.msk.msra.mxu0 %vm5294_vm2, %v4414_v24 }
 0x1e0   : > { %v4785_v31 = vpop.permute.xlu1 %4784  ;;  %v4790_v32 = vpop.permute.xlu0 %4789 }
 0x1e1   : > { %v4787_v33 = vunpack.i.h.bf16 %v4785_v31  ;;  %v4786_v34 = vunpack.i.l.bf16 %v4785_v31  ;;  %v4792_v35 = vunpack.i.h.bf16 %v4790_v32  ;;  %v4791_v36 = vunpack.i.l.bf16 %v4790_v32 }
 0x1e3   : > { %v4420_v37 = vpack.c.bf16 %v4787_v33, %v4786_v34  ;;  %v4426_v38 = vpack.c.bf16 %v4792_v35, %v4791_v36 }
 0x1e4   : > { %v4795_v39 = vpop.permute.xlu1 %4794 }
 0x1e5   : > { %4422 = vmatprep.subr.msk.bf16.mxu0 %vm5294_vm2, %v4420_v37  ;;  %v4797_v40 = vunpack.i.h.bf16 %v4795_v39  ;;  %v4796_v41 = vunpack.i.l.bf16 %v4795_v39 }
 0x1e6   : > { %4425 = vmatpush3.bf16.xpose.msk.msra.mxu0 %vm5294_vm2, %v4420_v37 }
 0x1e7   : > { %4428 = vmatprep.subr.msk.bf16.mxu0 %vm5294_vm2, %v4426_v38  ;;  %v4432_v42 = vpack.c.bf16 %v4797_v40, %v4796_v41 }
 0x1ee   : > { %4431 = vmatpush3.bf16.xpose.msk.msra.mxu0 %vm5294_vm2, %v4426_v38 }
 0x1ef   : > { %4434 = vmatprep.subr.msk.bf16.mxu0 %vm5294_vm2, %v4432_v42 }
 0x1f6   : > { %4437 = vmatpush3.bf16.xpose.msk.msra.mxu0 %vm5294_vm2, %v4432_v42 }
 0x1fd   : > { %4007 = vmatmul.mubr.msk.f32.vlgmr.msra.gmra.mrb[2].mxu0 %vm485_vm1, %v5275_v8 }
 0x1fe   : > { %4009 = vmatprep.mubr.msk.f32.mxu0 %vm485_vm1, %v438_v12 }
 0x201   : > { %4010 = vmatmul.mubr.msk.f32.gmra.mrb[4].mxu0 %vm485_vm1, %v440_v14 }
 0x202   : > { %4012 = vmatprep.mubr.msk.f32.mxu0 %vm485_vm1, %v442_v11 }
 0x205   : > { %4013 = vmatmul.mubr.msk.f32.gmra.mrb[6].mxu0 %vm485_vm1, %v444_v13 }
 0x206   : > { %4015 = vmatprep.mubr.msk.f32.mxu0 %vm485_vm1, %v446_v18 }
 0x209   : > { %4016 = vmatmul.mubr.msk.f32.gmra.mrb[8].mxu0 %vm485_vm1, %v448_v17 }
 0x2d0   : > { %v4008_v46 = vpop.f32.mrb[2].mxu0 }
 0x2d1   : > { %v624_v48 = vmul.f32 0.35355338, %v4008_v46  ;;  %v584_v49 = vpop.f32.mrb[3].mxu0 }
 0x2d2   : > { %v623_v51 = vmul.f32 0.35355338, %v584_v49 }
 0x2d3   : > { %v640_v52 = vadd.f32 %v632_v47, %v624_v48 }
 0x2d4   : > { %v4011_v53 = vpop.f32.mrb[4].mxu0  ;;  %v639_v54 = vadd.f32 %v631_v50, %v623_v51 }
 0x2d5   : > { %v626_v55 = vmul.f32 0.35355338, %v4011_v53  ;;  %v594_v56 = vpop.f32.mrb[5].mxu0  ;;  %v651_v57 = vsel %vm647_vm3, %v640_v52, -inf }
 0x2d6   : > { %v625_v59 = vmul.f32 0.35355338, %v594_v56  ;;  %652 = vmax.xlane.f32.xlu1 %v651_v57  ;;  %v648_v60 = vsel %vm647_vm3, %v639_v54, -inf }
 0x2d7   : > { %649 = vmax.xlane.f32.xlu0 %v648_v60  ;;  %v642_v1 = vadd.f32 %v634_v61, %v626_v55 }
 0x2d8   : > { %v4014_v62 = vpop.f32.mrb[6].mxu0  ;;  %v641_v63 = vadd.f32 %v633_v58, %v625_v59 }
 0x2d9   : > { %v604_v0 = vpop.f32.mrb[7].mxu0  ;;  %v628_v4 = vmul.f32 0.35355338, %v4014_v62  ;;  %v657_v14 = vsel %vm647_vm3, %v642_v1, -inf }
 0x2da   : > { %v627_v8 = vmul.f32 0.35355338, %v604_v0  ;;  %v654_v9 = vsel %vm647_vm3, %v641_v63, -inf }
 0x2db   : > { %655 = vmax.xlane.f32.xlu0 %v654_v9  ;;  %v644_v19 = vadd.f32 %v636_v10, %v628_v4 }
 0x2dc   : > { %v4017_v11 = vpop.f32.mrb[8].mxu0  ;;  %v643_v12 = vadd.f32 %v635_v2, %v627_v8 }
 0x2dd   : > { %v614_v13 = vpop.f32.mrb[9].mxu0  ;;  %v630_v16 = vmul.f32 0.35355338, %v4017_v11  ;;  %v663_v22 = vsel %vm647_vm3, %v644_v19, -inf }
 0x2de   : > { %v629_v17 = vmul.f32 0.35355338, %v614_v13  ;;  %v660_v18 = vsel %vm647_vm3, %v643_v12, -inf }
 0x2df   : > { %658 = vmax.xlane.f32.xlu0 %v657_v14  ;;  %661 = vmax.xlane.f32.xlu1 %v660_v18  ;;  %v5377_v25 = vadd.f32 %v638_v20, %v630_v16 }
 0x2e0   : > { %v645_v21 = vadd.f32 %v637_v15, %v629_v17 }
 0x2e1   : > { %v669_v26 = vsel %vm647_vm3, %v5377_v25, -inf }
 0x2e2   : > { %v666_v24 = vsel %vm647_vm3, %v645_v21, -inf }
 0x2e3   : > { %664 = vmax.xlane.f32.xlu0 %v663_v22  ;;  %667 = vmax.xlane.f32.xlu1 %v666_v24 }
 0x2e7   : > { %670 = vmax.xlane.f32.xlu0 %v669_v26 }
 0x2f4   : > { %4799 = vrot.lane.b32.xlu1 %v5344_v45, %s5144_s28 }
 0x363   : > { %v653_v29 = vpop.xlane.xlu1 %652 }
 0x364   : > { %v673_v31 = vsub.f32 %v640_v52, %v653_v29  ;;  %v650_v32 = vpop.xlane.xlu0 %649 }
 0x365   : > { %v672_v33 = vsub.f32 %v639_v54, %v650_v32 }
 0x366   : > { %v682_v34 = vmul.f32 1.442695, %v673_v31 }
 0x367   : > { %v680_v35 = vmul.f32 1.442695, %v672_v33 }
 0x368   : > { %4948 = vpow2.f32 %v682_v34  ;;  %v656_v36 = vpop.xlane.xlu0 %655 }
 0x369   : > { %4950 = vpow2.f32 %v680_v35  ;;  %v674_v37 = vsub.f32 %v641_v63, %v656_v36 }
 0x36b   : > { %v684_v38 = vmul.f32 1.442695, %v674_v37 }
 0x36c   : > { %v659_v39 = vpop.xlane.xlu0 %658  ;;  %v662_v40 = vpop.xlane.xlu1 %661 }
 0x36d   : > { %4952 = vpow2.f32 %v684_v38  ;;  %v675_v41 = vsub.f32 %v642_v1, %v659_v39  ;;  %v676_v42 = vsub.f32 %v643_v12, %v662_v40 }
 0x36f   : > { %v686_v43 = vmul.f32 1.442695, %v675_v41  ;;  %v688_v44 = vmul.f32 1.442695, %v676_v42 }
 0x370   : > { %v665_v46 = vpop.xlane.xlu0 %664  ;;  %v668_v47 = vpop.xlane.xlu1 %667 }
 0x371   : > { %4954 = vpow2.f32 %v686_v43  ;;  %v677_v48 = vsub.f32 %v644_v19, %v665_v46  ;;  %v678_v49 = vsub.f32 %v645_v21, %v668_v47 }
 0x372   : > { %v5383_v50 = vpop.eup %4948  ;;  %4956 = vpow2.f32 %v688_v44 }
 0x373   : > { %v5385_v51 = vpop.eup %4950  ;;  %v690_v52 = vmul.f32 1.442695, %v677_v48  ;;  %v692_v53 = vmul.f32 1.442695, %v678_v49  ;;  %v699_v54 = vsel %vm647_vm3, %v5383_v50, 0.0 }
 0x374   : > { %700 = vadd.xlane.f32.xlu0 %v699_v54  ;;  %v696_v55 = vsel %vm647_vm3, %v5385_v51, 0.0  ;;  %v4800_v56 = vpop.permute.xlu1 %4799  ;;  %v671_v10 = vpop.xlane.xlu0 %670 }
 0x375   : > { %4958 = vpow2.f32 %v690_v52  ;;  %697 = vadd.xlane.f32.xlu1 %v696_v55  ;;  %v4802_v57 = vunpack.i.h.bf16 %v4800_v56  ;;  %v4801_v58 = vunpack.i.l.bf16 %v4800_v56  ;;  %v679_v11 = vsub.f32 %v5377_v25, %v671_v10 }
 0x376   : > { %4960 = vpow2.f32 %v692_v53 }
 0x377   : > { %v5391_v59 = vpop.eup %4952  ;;  %v4442_v60 = vpack.c.bf16 %v4802_v57, %v4801_v58  ;;  %v694_v12 = vmul.f32 1.442695, %v679_v11 }
 0x378   : > { %v702_v61 = vsel %vm647_vm3, %v5391_v59, 0.0 }
 0x379   : > { %703 = vadd.xlane.f32.xlu1 %v702_v61  ;;  %4443 = vmatprep.subr.bf16.mxu1 %v4442_v60  ;;  %4962 = vpow2.f32 %v694_v12 }
 0x37a   : > { %4445 = vmatpush3.bf16.msra.mxu1 %v4442_v60 }
 0x37b   : > { %v5395_v62 = vpop.eup %4954 }
 0x37c   : > { %v5397_v63 = vpop.eup %4956  ;;  %v705_v0 = vsel %vm647_vm3, %v5395_v62, 0.0 }
 0x37d   : > { %706 = vadd.xlane.f32.xlu0 %v705_v0  ;;  %v708_v1 = vsel %vm647_vm3, %v5397_v63, 0.0 }
 0x37e   : > { %709 = vadd.xlane.f32.xlu1 %v708_v1 }
 0x37f   : > { %v5403_v2 = vpop.eup %4958 }
 0x380   : > { %v5405_v4 = vpop.eup %4960  ;;  %v711_v8 = vsel %vm647_vm3, %v5403_v2, 0.0 }
 0x381   : > { %712 = vadd.xlane.f32.xlu0 %v711_v8  ;;  %v714_v9 = vsel %vm647_vm3, %v5405_v4, 0.0 }
 0x382   : > { %715 = vadd.xlane.f32.xlu1 %v714_v9 }
 0x383   : > { %v5416_v13 = vpop.eup %4962 }
 0x384   : > { %v717_v14 = vsel %vm647_vm3, %v5416_v13, 0.0 }
 0x393   : > { %4809 = vrot.lane.b32.xlu1 %v5344_v45, %s6220_s15  ;;  %s6234_s15 = smov 32  }
 0x397   : > { %4804 = vrot.lane.b32.xlu0 %v5344_v45, %s6218_s16  ;;  %s6235_s16 = smov 64  }
 0x3b6   : > { %718 = vadd.xlane.f32.xlu0 %v717_v14 }
 0x401   : > { %v701_v15 = vpop.xlane.xlu0 %700 }
 0x402   : > { %v698_v16 = vpop.xlane.xlu1 %697 }
 0x403   : > { %4964 = vrcp.f32 %v698_v16 }
 0x404   : > { %4966 = vrcp.f32 %v701_v15 }
 0x406   : > { %v704_v17 = vpop.xlane.xlu1 %703 }
 0x407   : > { %4968 = vrcp.f32 %v704_v17 }
 0x40a   : > { %v707_v18 = vpop.xlane.xlu0 %706 }
 0x40b   : > { %v710_v19 = vpop.xlane.xlu1 %709  ;;  %4970 = vrcp.f32 %v707_v18 }
 0x40c   : > { %4972 = vrcp.f32 %v710_v19 }
 0x40d   : > { %v4965_v45 = vpop.eup %4964 }
 0x40e   : > { %v4967_v20 = vpop.eup %4966  ;;  %v728_v21 = vmul.f32 %v4965_v45, %v698_v16  ;;  %v713_v22 = vpop.xlane.xlu0 %712 }
 0x40f   : > { %v716_v24 = vpop.xlane.xlu1 %715  ;;  %v729_v27 = vmul.f32 %v4967_v20, %v701_v15  ;;  %4974 = vrcp.f32 %v713_v22 }
 0x410   : > { %v736_v25 = vsub.f32 2.0, %v728_v21  ;;  %4976 = vrcp.f32 %v716_v24 }
 0x411   : > { %v4969_v26 = vpop.eup %4968  ;;  %v737_v39 = vsub.f32 2.0, %v729_v27  ;;  %v943_v27 = vld [vmem:[%s6213_s2 + $0x40] sm:$0xff] }
 0x412   : > { %v744_v29 = vmul.f32 %v4965_v45, %v736_v25  ;;  %v730_v31 = vmul.f32 %v4969_v26, %v704_v17  ;;  %v4805_v32 = vpop.permute.xlu0 %4804  ;;  %v898_v17 = vlaneseq }
 0x413   : > { %v4807_v33 = vunpack.i.h.bf16 %v4805_v32  ;;  %v4806_v34 = vunpack.i.l.bf16 %v4805_v32  ;;  %v4810_v35 = vpop.permute.xlu1 %4809  ;;  %v745_v46 = vmul.f32 %v4967_v20, %v737_v39 }
 0x414   : > { %v4812_v36 = vunpack.i.h.bf16 %v4810_v35  ;;  %v4811_v37 = vunpack.i.l.bf16 %v4810_v35  ;;  %v752_v38 = vmul.f32 %v5385_v51, %v744_v29  ;;  %v738_v42 = vsub.f32 2.0, %v730_v31 }
 0x415   : > { %v4446_v40 = vpack.c.bf16 %v4807_v33, %v4806_v34  ;;  %v4971_v41 = vpop.eup %4970  ;;  %v753_v52 = vmul.f32 %v5383_v50, %v745_v46  ;;  %v1036_v46 = vld [vmem:[%s6213_s2 + $0x70] sm:$0xff] }
 0x416   : > { %4034 = vmatprep.mubr.msk.f32.mxu1 %vm647_vm3, %v752_v38  ;;  %v4973_v43 = vpop.eup %4972  ;;  %v4450_v44 = vpack.c.bf16 %v4812_v36, %v4811_v37  ;;  %v731_v47 = vmul.f32 %v4971_v41, %v707_v18  ;;  %v746_v48 = vmul.f32 %v4969_v26, %v738_v42  ;;  %v5436_v18 = vshrl.u32 %v898_v17, 7 }
 0x417   : > { %4447 = vmatprep.subr.bf16.mxu1 %v4446_v40  ;;  %v732_v49 = vmul.f32 %v4973_v43, %v710_v19 }
 0x418   : > { %4449 = vmatpush3.bf16.msra.mxu1 %v4446_v40  ;;  %v739_v51 = vsub.f32 2.0, %v731_v47  ;;  %v754_v55 = vmul.f32 %v5391_v59, %v746_v48  ;;  %v945_v40 = vld [vmem:[%s6213_s2 + $0x50] sm:$0xff]  ;;  %v1037_v48 = vld [vmem:[%s6213_s2 + $0x78] sm:$0xff]  ;;  %v949_v17 = vsub.s32 5, %v5436_v18 }
 0x419   : > { %4451 = vmatprep.subr.bf16.mxu1 %v4450_v44  ;;  %v4975_v53 = vpop.eup %4974  ;;  %v740_v54 = vsub.f32 2.0, %v732_v49  ;;  %v5491_v49 = vpack.c.bf16 %v1037_v48, %v1036_v46 }
 0x41a   : > { %v4977_v56 = vpop.eup %4976  ;;  %v747_v57 = vmul.f32 %v4971_v41, %v739_v51  ;;  %v733_v58 = vmul.f32 %v4975_v53, %v713_v22  ;;  %v946_v41 = vld [vmem:[%s6213_s2 + $0x58] sm:$0xff]  ;;  %v1039_v51 = vld [vmem:[%s6213_s2 + $0x88] sm:$0xff] }
 0x41b   : > { %v748_v60 = vmul.f32 %v4973_v43, %v740_v54  ;;  %v734_v61 = vmul.f32 %v4977_v56, %v716_v24  ;;  %v5473_v42 = vpack.c.bf16 %v946_v41, %v945_v40  ;;  %v1034_v43 = vld [vmem:[%s6213_s2 + $0x60] sm:$0xff] }
 0x41c   : > { %4453 = vmatpush3.bf16.msra.mxu1 %v4450_v44  ;;  %v741_v0 = vsub.f32 2.0, %v733_v58  ;;  %v755_v1 = vmul.f32 %v5395_v62, %v747_v57  ;;  %v1035_v44 = vld [vmem:[%s6213_s2 + $0x68] sm:$0xff] }
 0x41d   : > { %v742_v8 = vsub.f32 2.0, %v734_v61  ;;  %v756_v50 = vmul.f32 %v5397_v63, %v748_v60  ;;  %v5486_v47 = vpack.c.bf16 %v1035_v44, %v1034_v43  ;;  %v933_v61 = vsub.s32 1, %v5436_v18 }
 0x41e   : > { %v749_v59 = vmul.f32 %v4975_v53, %v741_v0  ;;  %v939_v0 = vsub.s32 2, %v5436_v18 }
 0x41f   : > { %4035 = vmatmul.mubr.msk.f32.vlgmr.msra.gmra.mrb[2].mxu1 %vm647_vm3, %v753_v52  ;;  %v750_v9 = vmul.f32 %v4977_v56, %v742_v8  ;;  %v1038_v52 = vld [vmem:[%s6213_s2 + $0x80] sm:$0xff]  ;;  %4463 = vmatprep.subr.bf16.mxu0 %v5486_v47 }
 0x420   : > { %4037 = vmatprep.mubr.msk.f32.mxu1 %vm647_vm3, %v754_v55  ;;  %v757_v10 = vmul.f32 %v5403_v2, %v749_v59  ;;  %v900_v2 = vsub.s32 0, %v5436_v18  ;;  %4465 = vmatpush3.bf16.msra.mxu0 %v5486_v47  ;;  %v5502_v53 = vpack.c.bf16 %v1039_v51, %v1038_v52  ;;  %v1167_v51 = vld [vmem:[%s6214_s3] sm:$0xff] }
 0x421   : > { %v758_v11 = vmul.f32 %v5405_v4, %v750_v9  ;;  %v5442_v4 = vld [vmem:[%s6213_s2 + $0xa0] sm:$0xff]  ;;  %4467 = vmatprep.subr.bf16.mxu0 %v5491_v49 }
 0x422   : > { %v5447_v45 = vrot.slane %v5442_v4, %v900_v2  ;;  %v5517_v59 = vrot.slane %v5442_v4, %v939_v0 }
 0x424   : > { %4469 = vmatpush3.bf16.msra.mxu0 %v5491_v49 }
 0x425   : > { %4471 = vmatprep.subr.bf16.mxu0 %v5502_v53 }
 0x427   : > { %4038 = vmatmul.mubr.msk.f32.gmra.mrb[2].mxu1 %vm647_vm3, %v755_v1  ;;  %v5512_v1 = vrot.slane %v5442_v4, %v933_v61 }
 0x428   : > { %4040 = vmatprep.mubr.msk.f32.mxu1 %vm647_vm3, %v756_v50  ;;  %4473 = vmatpush3.bf16.msra.mxu0 %v5502_v53 }
 0x42f   : > { %4041 = vmatmul.mubr.msk.f32.gmra.mrb[2].mxu1 %vm647_vm3, %v757_v10 }
 0x430   : > { %4043 = vmatprep.mubr.msk.f32.mxu1 %vm647_vm3, %v758_v11 }
 0x443   : > { %v719_v12 = vpop.xlane.xlu0 %718 }
 0x444   : > { %4978 = vrcp.f32 %v719_v12 }
 0x44e   : > { %v4979_v62 = vpop.eup %4978 }
 0x44f   : > { %v735_v14 = vmul.f32 %v4979_v62, %v719_v12 }
 0x451   : > { %v743_v15 = vsub.f32 2.0, %v735_v14 }
 0x453   : > { %v751_v63 = vmul.f32 %v4979_v62, %v743_v15  ;;  %v1040_v15 = vld [vmem:[%s6213_s2 + $0x90] sm:$0xff] }
 0x455   : > { %v759_v16 = vmul.f32 %v5416_v13, %v751_v63  ;;  %v1041_v63 = vld [vmem:[%s6213_s2 + $0x98] sm:$0xff] }
 0x457   : > { %4044 = vmatmul.mubr.msk.f32.gmra.mrb[2].mxu1 %vm647_vm3, %v759_v16  ;;  %v5531_v16 = vpack.c.bf16 %v1041_v63, %v1040_v15 }
 0x459   : > { %4475 = vmatprep.subr.bf16.mxu0 %v5531_v16 }
 0x45a   : > { %4477 = vmatpush3.bf16.msra.mxu0 %v5531_v16 }
 0x52a   : > { %v4045_v19 = vpop.f32.mrb[2].mxu1 }
 0x52b   : > { %v880_v20 = vpop.f32.mrb[3].mxu1  ;;  %v897_v13 = vadd.f32 %v4045_v19, %v5271_v7  ;;  %v944_v7 = vld [vmem:[%s6213_s2 + $0x48] sm:$0xff]  ;;  %v5539_v19 = vrot.slane %v5442_v4, %v949_v17 }
 0x52c   : > { %v896_v21 = vadd.f32 %v880_v20, %v5264_v6  ;;  %v5461_v29 = vpack.c.bf16 %v944_v7, %v943_v27 }
 0x52d   : > { %v903_v25 = vadd.f32 %v5447_v45, %v897_v13 }
 0x52e   : > { %v902_v22 = vadd.f32 %v5447_v45, %v896_v21  ;;  %4455 = vmatprep.subr.bf16.mxu1 %v5461_v29 }
 0x52f   : > { %v907_v26 = vsel %vm274_vm0, %v903_v25, 0.0  ;;  %4457 = vmatpush3.bf16.msra.mxu1 %v5461_v29 }
 0x530   : > { %v904_v24 = vsel %vm274_vm0, %v902_v22, 0.0  ;;  %4459 = vmatprep.subr.bf16.mxu1 %v5473_v42 }
 0x531   : > { %905 = vadd.xlane.f32.xlu0 %v904_v24 }
 0x533   : > { %4461 = vmatpush3.bf16.msra.mxu1 %v5473_v42 }
 0x535   : > { %908 = vadd.xlane.f32.xlu0 %v907_v26  ;;  %v6226_v26 = vsub.s32 6, %v5436_v18 }
 0x537   : > { %v5549_v27 = vrot.slane %v5442_v4, %v6226_v26 }
 0x5be   : > { %v906_v6 = vpop.xlane.xlu0 %905 }
 0x5bf   : > { %v911_v31 = vmul.f32 0.03125, %v906_v6 }
 0x5c1   : > { %v913_v32 = vsub.f32 %v902_v22, %v911_v31 }
 0x5c2   : > { %v909_v33 = vpop.xlane.xlu0 %908 }
 0x5c3   : > { %v912_v34 = vmul.f32 0.03125, %v909_v33  ;;  %v915_v35 = vmul.f32 %v913_v32, %v913_v32 }
 0x5c5   : > { %v914_v36 = vsub.f32 %v903_v25, %v912_v34  ;;  %v917_v37 = vsel %vm274_vm0, %v915_v35, 0.0 }
 0x5c6   : > { %918 = vadd.xlane.f32.xlu0 %v917_v37 }
 0x5c7   : > { %v916_v38 = vmul.f32 %v914_v36, %v914_v36 }
 0x5c9   : > { %v920_v39 = vsel %vm274_vm0, %v916_v38, 0.0 }
 0x5ca   : > { %921 = vadd.xlane.f32.xlu0 %v920_v39 }
 0x653   : > { %v919_v54 = vpop.xlane.xlu0 %918 }
 0x654   : > { %v923_v55 = vmul.f32 0.03125, %v919_v54  ;;  %v1168_v54 = vld [vmem:[%s6214_s3 + $0x8] sm:$0xff] }
 0x656   : > { %v925_v56 = vadd.f32 1e-05, %v923_v55  ;;  %v5563_v55 = vpack.c.bf16 %v1168_v54, %v1167_v51 }
 0x657   : > { %v922_v57 = vpop.xlane.xlu0 %921 }
 0x658   : > { %4980 = vrsqrt.f32 %v925_v56  ;;  %v924_v58 = vmul.f32 0.03125, %v922_v57  ;;  %v6227_v56 = vmov 0.0|0.0   ;;  %v1169_v57 = vld [vmem:[%s6214_s3 + $0x10] sm:$0xff] }
 0x659   : > { %4478 = vmatprep.subr.bf16.mxu1 %v6227_v56 }
 0x65a   : > { %v926_v60 = vadd.f32 1e-05, %v924_v58  ;;  %v1170_v58 = vld [vmem:[%s6214_s3 + $0x18] sm:$0xff] }
 0x65c   : > { %4982 = vrsqrt.f32 %v926_v60  ;;  %v5574_v60 = vpack.c.bf16 %v1170_v58, %v1169_v57 }
 0x662   : > { %v4981_v8 = vpop.eup %4980 }
 0x663   : > { %v929_v50 = vmul.f32 %v4981_v8, %v913_v32  ;;  %v1325_v8 = vld [vmem:[%s6214_s3 + $0x20] sm:$0xff] }
 0x665   : > { %v935_v9 = vmul.f32 %v5512_v1, %v929_v50  ;;  %v1326_v50 = vld [vmem:[%s6214_s3 + $0x28] sm:$0xff] }
 0x666   : > { %v4983_v10 = vpop.eup %4982 }
 0x667   : > { %v930_v11 = vmul.f32 %v4983_v10, %v914_v36  ;;  %v941_v12 = vadd.f32 %v5517_v59, %v935_v9  ;;  %v5588_v9 = vpack.c.bf16 %v1326_v50, %v1325_v8  ;;  %v6224_v10 = vmov 0.0  }
 0x669   : > { %v936_v62 = vmul.f32 %v5512_v1, %v930_v11  ;;  %4054 = vmatprep.mubr.msk.f32.mxu1 %vm274_vm0, %v941_v12  ;;  %v5592_v11 = vld [vmem:[%s266_s26] sm:$0xff]  ;;  %4493 = vmatprep.subr.bf16.mxu0 %v5588_v9 }
 0x66b   : > { %v942_v14 = vadd.f32 %v5517_v59, %v936_v62  ;;  %v1328_v62 = vld [vmem:[%s6214_s3 + $0x38] sm:$0xff] }
 0x66d   : > { %4055 = vmatmul.mubr.msk.f32.vlgmr.msra.gmra.mrb[4].mxu1 %vm274_vm0, %v942_v14 }
 0x66e   : > { %4480 = vmatpush3.bf16.msra.mxu1 %v5563_v55  ;;  %4084 = vmatprep.mubr.msk.f32.mxu1 %vm5151_vm4, %v6224_v10 }
 0x66f   : > { %4481 = vmatprep.subr.bf16.mxu1 %v6227_v56 }
 0x672   : > { %4483 = vmatpush3.bf16.msra.mxu1 %v5574_v60 }
 0x673   : > { %4485 = vmatprep.subr.bf16.mxu1 %v5563_v55 }
 0x675   : > { %4085 = vmatmul.mubr.msk.f32.vlgmr.msra.gmra.mrb[6].mxu1 %vm274_vm0, %v5592_v11 }
 0x676   : > { %4487 = vmatpush3.bf16.msra.mxu1 %v5563_v55 }
 0x677   : > { %4489 = vmatprep.subr.bf16.mxu1 %v5574_v60 }
 0x67a   : > { %4491 = vmatpush3.bf16.msra.mxu1 %v5574_v60 }
 0x740   : > { %v4056_v20 = vpop.f32.mrb[4].mxu1 }
 0x741   : > { %v1029_v13 = vadd.f32 %v4056_v20, %v5539_v19  ;;  %v1023_v21 = vpop.f32.mrb[5].mxu1 }
 0x742   : > { %v1024_v22 = vadd.f32 %v1023_v21, %v5539_v19 }
 0x743   : > { %v1033_v25 = vmax.f32 %v1029_v13, 0.0 }
 0x744   : > { %v1032_v24 = vmax.f32 %v1024_v22, 0.0 }
 0x746   : > { %4073 = vmatprep.mubr.msk.f32.mxu0 %vm647_vm3, %v1032_v24  ;;  %v6223_v24 = vsub.s32 3, %v5436_v18 }
 0x747   : > { %4074 = vmatmul.mubr.msk.f32.vlgmr.msra.gmra.mrb[10].mxu0 %vm647_vm3, %v1033_v25  ;;  %v6222_v25 = vsub.s32 4, %v5436_v18 }
 0x748   : > { %4495 = vmatpush3.bf16.msra.mxu0 %v5588_v9 }
 0x81a   : > { %v4075_v7 = vpop.f32.mrb[10].mxu0 }
 0x81b   : > { %v1124_v6 = vadd.f32 %v4075_v7, %v5549_v27  ;;  %v1118_v31 = vpop.f32.mrb[11].mxu0  ;;  %v5616_v7 = vrot.slane %v5442_v4, %v6223_v24 }
 0x81c   : > { %v1119_v32 = vadd.f32 %v1118_v31, %v5549_v27 }
 0x81d   : > { %v1128_v33 = vadd.f32 %v1124_v6, %v942_v14 }
 0x81e   : > { %v1127_v34 = vadd.f32 %v1119_v32, %v941_v12  ;;  %v1327_v12 = vld [vmem:[%s6214_s3 + $0x30] sm:$0xff]  ;;  %v5621_v32 = vrot.slane %v5442_v4, %v6222_v25  ;;  %v1240_v4 = vpop.f32.mrb[6].mxu1 }
 0x81f   : > { %v1132_v35 = vsel %vm274_vm0, %v1128_v33, 0.0  ;;  %v5606_v14 = vpack.c.bf16 %v1328_v62, %v1327_v12 }
 0x820   : > { %1133 = vadd.xlane.f32.xlu0 %v1132_v35  ;;  %v1129_v36 = vsel %vm274_vm0, %v1127_v34, 0.0 }
 0x821   : > { %1130 = vadd.xlane.f32.xlu1 %v1129_v36  ;;  %4497 = vmatprep.subr.bf16.mxu0 %v5606_v14 }
 0x822   : > { %4499 = vmatpush3.bf16.msra.mxu0 %v5606_v14 }
 0x8ad   : > { %v1134_v37 = vpop.xlane.xlu0 %1133 }
 0x8ae   : > { %v1136_v38 = vmul.f32 0.03125, %v1134_v37  ;;  %v1131_v39 = vpop.xlane.xlu1 %1130 }
 0x8af   : > { %v1135_v40 = vmul.f32 0.03125, %v1131_v39  ;;  %v4086_v39 = vpop.f32.mrb[7].mxu1 }
 0x8b0   : > { %v1138_v41 = vsub.f32 %v1128_v33, %v1136_v38 }
 0x8b1   : > { %v1137_v43 = vsub.f32 %v1127_v34, %v1135_v40 }
 0x8b2   : > { %v1140_v48 = vmul.f32 %v1138_v41, %v1138_v41 }
 0x8b3   : > { %v1139_v44 = vmul.f32 %v1137_v43, %v1137_v43 }
 0x8b4   : > { %v1144_v52 = vsel %vm274_vm0, %v1140_v48, 0.0 }
 0x8b5   : > { %v1141_v46 = vsel %vm274_vm0, %v1139_v44, 0.0 }
 0x8b6   : > { %1142 = vadd.xlane.f32.xlu0 %v1141_v46 }
 0x8ba   : > { %1145 = vadd.xlane.f32.xlu0 %v1144_v52 }
 0x943   : > { %v1143_v15 = vpop.xlane.xlu0 %1142 }
 0x944   : > { %v1147_v63 = vmul.f32 0.03125, %v1143_v15 }
 0x946   : > { %v1149_v20 = vadd.f32 1e-05, %v1147_v63 }
 0x947   : > { %v1146_v13 = vpop.xlane.xlu0 %1145 }
 0x948   : > { %4984 = vrsqrt.f32 %v1149_v20  ;;  %v1148_v21 = vmul.f32 0.03125, %v1146_v13 }
 0x94a   : > { %v1150_v22 = vadd.f32 1e-05, %v1148_v21 }
 0x94c   : > { %4986 = vrsqrt.f32 %v1150_v22 }
 0x952   : > { %v4985_v6 = vpop.eup %4984 }
 0x953   : > { %v1153_v31 = vmul.f32 %v4985_v6, %v1137_v43 }
 0x955   : > { %v1159_v33 = vmul.f32 %v5616_v7, %v1153_v31 }
 0x956   : > { %v4987_v34 = vpop.eup %4986 }
 0x957   : > { %v1154_v35 = vmul.f32 %v4987_v34, %v1138_v41  ;;  %v5625_v36 = vadd.f32 %v5621_v32, %v1159_v33 }
 0x959   : > { %4095 = vmatprep.mubr.msk.f32.mxu1 %vm274_vm0, %v5625_v36  ;;  %4106 = vmatprep.mubr.msk.f32.mxu0 %vm274_vm0, %v5625_v36  ;;  %v1160_v37 = vmul.f32 %v5616_v7, %v1154_v35 }
 0x95b   : > { %v5633_v38 = vadd.f32 %v5621_v32, %v1160_v37 }
 0x95d   : > { %4096 = vmatmul.mubr.msk.f32.vlgmr.msra.gmra.mrb[8].mxu1 %vm274_vm0, %v5633_v38  ;;  %4107 = vmatmul.mubr.msk.f32.vlgmr.msra.gmra.mrb[12].mxu0 %vm274_vm0, %v5633_v38 }
 0x95e   : > { %4125 = vmatprep.mubr.msk.f32.mxu1 %vm485_vm1, %v1240_v4 }
 0xa30   : > { %v4097_v40 = vpop.f32.mrb[8].mxu1  ;;  %v4108_v41 = vpop.f32.mrb[12].mxu0 }
 0xa31   : > { %v1316_v43 = vpop.f32.mrb[9].mxu1  ;;  %v1395_v44 = vpop.f32.mrb[13].mxu0 }
 0xa32   : > { %v4524_v46 = vpack.c.bf16 %v4108_v41, %v1395_v44  ;;  %v4823_v48 = vpack.i.bf16 %v4097_v40, %v1316_v43  ;;  %v5640_v52 = vpack.i.bf16 %v4108_v41, %v1395_v44 }
 0xa34   : > { %4525 = vmatprep.subr.bf16.mxu0 %v4524_v46  ;;  %4824 = vrot.lane.b32.xlu1 %v4823_v48, %s5146_s9 }
 0xa35   : > { %4814 = vrot.lane.b32.xlu0 %v4823_v48, %s5145_s29  ;;  %4527 = vmatpush3.bf16.msra.mxu0 %v4524_v46 }
 0xa38   : > { %1405 = vrot.lane.b32.xlu1 %v1240_v4, %s5145_s29 }
 0xa39   : > { %4819 = vrot.lane.b32.xlu0 %v4823_v48, %s5144_s28 }
 0xa3c   : > { %1409 = vrot.lane.b32.xlu1 %v1240_v4, %s5146_s9 }
 0xa3d   : > { %4829 = vrot.lane.b32.xlu0 %v4823_v48, %s5147_s10 }
 0xaa6   : > { %v4825_v54 = vpop.permute.xlu1 %4824 }
 0xaa7   : > { %v4815_v51 = vpop.permute.xlu0 %4814 }
 0xaa8   : > { %4834 = vrot.lane.b32.xlu0 %v4815_v51, %s5147_s10 }
 0xaaa   : > { %v1406_v37 = vpop.permute.xlu1 %1405 }
 0xaab   : > { %v4820_v57 = vpop.permute.xlu0 %4819 }
 0xaac   : > { %4839 = vrot.lane.b32.xlu0 %v4820_v57, %s5147_s10 }
 0xaae   : > { %v1410_v39 = vpop.permute.xlu1 %1409 }
 0xaaf   : > { %v4830_v58 = vpop.permute.xlu0 %4829 }
 0xab0   : > { %v4832_v8 = vunpack.i.h.bf16 %v4830_v58  ;;  %v4831_v50 = vunpack.i.l.bf16 %v4830_v58  ;;  %4844 = vrot.lane.b32.xlu0 %v4825_v54, %s5147_s10  ;;  %v1576_v54 = vld [vmem:[%s6216_s5 + $0x10] sm:$0xff] }
 0xab2   : > { %v4500_v12 = vpack.c.bf16 %v4832_v8, %v4831_v50  ;;  %v1577_v50 = vld [vmem:[%s6216_s5 + $0x18] sm:$0xff] }
 0xab4   : > { %4502 = vmatprep.subr.msk.bf16.mxu1 %vm5294_vm2, %v4500_v12  ;;  %1407 = vrot.lane.b32.xlu0 %v1240_v4, %s5144_s28 }
 0xab5   : > { %4505 = vmatpush3.bf16.xpose.msk.msra.mxu1 %vm5294_vm2, %v4500_v12 }
 0xb1a   : > { %v4835_v62 = vpop.permute.xlu0 %4834 }
 0xb1b   : > { %v4837_v15 = vunpack.i.h.bf16 %v4835_v62  ;;  %v4836_v63 = vunpack.i.l.bf16 %v4835_v62 }
 0xb1d   : > { %v4506_v20 = vpack.c.bf16 %v4837_v15, %v4836_v63 }
 0xb1e   : > { %v4840_v13 = vpop.permute.xlu0 %4839 }
 0xb1f   : > { %v4842_v21 = vunpack.i.h.bf16 %v4840_v13  ;;  %v4841_v22 = vunpack.i.l.bf16 %v4840_v13  ;;  %4508 = vmatprep.subr.msk.bf16.mxu1 %vm5294_vm2, %v4506_v20 }
 0xb20   : > { %4511 = vmatpush3.bf16.xpose.msk.msra.mxu1 %vm5294_vm2, %v4506_v20 }
 0xb21   : > { %v4512_v6 = vpack.c.bf16 %v4842_v21, %v4841_v22 }
 0xb22   : > { %v4845_v31 = vpop.permute.xlu0 %4844 }
 0xb23   : > { %v4847_v33 = vunpack.i.h.bf16 %v4845_v31  ;;  %v4846_v34 = vunpack.i.l.bf16 %v4845_v31  ;;  %4514 = vmatprep.subr.msk.bf16.mxu1 %vm5294_vm2, %v4512_v6 }
 0xb25   : > { %v4518_v35 = vpack.c.bf16 %v4847_v33, %v4846_v34 }
 0xb26   : > { %v1408_v4 = vpop.permute.xlu0 %1407 }
 0xb28   : > { %4517 = vmatpush3.bf16.xpose.msk.msra.mxu1 %vm5294_vm2, %v4512_v6 }
 0xb29   : > { %4520 = vmatprep.subr.msk.bf16.mxu1 %vm5294_vm2, %v4518_v35 }
 0xb30   : > { %4523 = vmatpush3.bf16.xpose.msk.msra.mxu1 %vm5294_vm2, %v4518_v35 }
 0xb31   : > { %4559 = vmatprep.subr.bf16.mxu1 %v5247_v3 }
 0xb37   : > { %4126 = vmatmul.mubr.msk.f32.vlgmr.msra.gmra.mrb[10].mxu1 %vm485_vm1, %v1406_v37 }
 0xb38   : > { %4128 = vmatprep.mubr.msk.f32.mxu1 %vm485_vm1, %v1408_v4  ;;  %4561 = vmatpush3.bf16.msra.mxu1 %v5247_v3 }
 0xb39   : > { %4563 = vmatprep.subr.bf16.mxu1 %v5252_v5 }
 0xb3b   : > { %4129 = vmatmul.mubr.msk.f32.gmra.mrb[12].mxu1 %vm485_vm1, %v1410_v39 }
 0xb3c   : > { %4565 = vmatpush3.bf16.msra.mxu1 %v5252_v5  ;;  %4191 = vmatprep.mubr.msk.f32.mxu1 %vm274_vm0, %v5625_v36  ;;  %v1575_v5 = vld [vmem:[%s6216_s5 + $0x8] sm:$0xff] }
 0xb3d   : > { %4567 = vmatprep.subr.bf16.mxu1 %v5311_v28 }
 0xb3f   : > { %4192 = vmatmul.mubr.msk.f32.vlgmr.msra.gmra.mrb[14].mxu1 %vm274_vm0, %v5633_v38 }
 0xb40   : > { %4569 = vmatpush3.bf16.msra.mxu1 %v5311_v28  ;;  %4202 = vmatprep.mubr.msk.f32.mxu1 %vm274_vm0, %v5625_v36  ;;  %v1574_v28 = vld [vmem:[%s6216_s5] sm:$0xff] }
 0xb41   : > { %4571 = vmatprep.subr.bf16.mxu1 %v5316_v30 }
 0xb44   : > { %4573 = vmatpush3.bf16.msra.mxu1 %v5316_v30 }
 0xb47   : > { %4203 = vmatmul.mubr.msk.f32.vlgmr.msra.gmra.mrb[16].mxu1 %vm274_vm0, %v5633_v38 }
 0xc0a   : > { %v4127_v3 = vpop.f32.mrb[10].mxu1 }
 0xc0b   : > { %v1571_v40 = vmul.f32 0.35355338, %v4127_v3  ;;  %v1551_v41 = vpop.f32.mrb[11].mxu1 }
 0xc0c   : > { %v1570_v43 = vmul.f32 0.35355338, %v1551_v41 }
 0xc0d   : > { %v1579_v44 = vadd.f32 %v1575_v5, %v1571_v40 }
 0xc0e   : > { %v4130_v46 = vpop.f32.mrb[12].mxu1  ;;  %v1578_v48 = vadd.f32 %v1574_v28, %v1570_v43 }
 0xc0f   : > { %v1561_v51 = vpop.f32.mrb[13].mxu1  ;;  %v1585_v30 = vsel %vm647_vm3, %v1579_v44, -inf  ;;  %v1573_v57 = vmul.f32 0.35355338, %v4130_v46 }
 0xc10   : > { %v1572_v58 = vmul.f32 0.35355338, %v1561_v51  ;;  %1586 = vmax.xlane.f32.xlu1 %v1585_v30  ;;  %v1582_v8 = vsel %vm647_vm3, %v1578_v48, -inf }
 0xc11   : > { %1583 = vmax.xlane.f32.xlu0 %v1582_v8  ;;  %v1581_v20 = vadd.f32 %v1577_v50, %v1573_v57 }
 0xc12   : > { %v5701_v12 = vpop.f32.mrb[14].mxu1  ;;  %v1580_v62 = vadd.f32 %v1576_v54, %v1572_v58 }
 0xc13   : > { %v5703_v15 = vpop.f32.mrb[15].mxu1  ;;  %v1591_v21 = vsel %vm647_vm3, %v1581_v20, -inf }
 0xc14   : > { %v1588_v63 = vsel %vm647_vm3, %v1580_v62, -inf  ;;  %v4863_v13 = vpack.i.bf16 %v5701_v12, %v5703_v15 }
 0xc15   : > { %1589 = vmax.xlane.f32.xlu0 %v1588_v63 }
 0xc19   : > { %1592 = vmax.xlane.f32.xlu0 %v1591_v21 }
 0xc1a   : > { %v4204_v22 = vpop.f32.mrb[16].mxu1 }
 0xc1b   : > { %v2100_v6 = vpop.f32.mrb[17].mxu1 }
 0xc1c   : > { %v5709_v31 = vpack.i.bf16 %v4204_v22, %v2100_v6  ;;  %v4598_v33 = vpack.c.bf16 %v4204_v22, %v2100_v6 }
 0xc1e   : > { %4599 = vmatprep.subr.bf16.mxu1 %v4598_v33 }
 0xc1f   : > { %4601 = vmatpush3.bf16.msra.mxu1 %v4598_v33 }
 0xc21   : > { %4849 = vrot.lane.b32.xlu1 %v5640_v52, %s5144_s28 }
 0xc9d   : > { %v1587_v34 = vpop.xlane.xlu1 %1586 }
 0xc9e   : > { %v1595_v35 = vsub.f32 %v1579_v44, %v1587_v34  ;;  %v1584_v37 = vpop.xlane.xlu0 %1583 }
 0xc9f   : > { %v1594_v4 = vsub.f32 %v1578_v48, %v1584_v37 }
 0xca0   : > { %v1600_v39 = vmul.f32 1.442695, %v1595_v35 }
 0xca1   : > { %v1598_v3 = vmul.f32 1.442695, %v1594_v4  ;;  %v4850_v5 = vpop.permute.xlu1 %4849 }
 0xca2   : > { %4988 = vpow2.f32 %v1600_v39  ;;  %v4852_v40 = vunpack.i.h.bf16 %v4850_v5  ;;  %v4851_v41 = vunpack.i.l.bf16 %v4850_v5  ;;  %v1590_v28 = vpop.xlane.xlu0 %1589 }
 0xca3   : > { %4990 = vpow2.f32 %v1598_v3  ;;  %v1596_v43 = vsub.f32 %v1580_v62, %v1590_v28 }
 0xca4   : > { %v4528_v46 = vpack.c.bf16 %v4852_v40, %v4851_v41 }
 0xca5   : > { %v1602_v51 = vmul.f32 1.442695, %v1596_v43 }
 0xca6   : > { %4529 = vmatprep.subr.bf16.mxu0 %v4528_v46  ;;  %v1593_v30 = vpop.xlane.xlu0 %1592 }
 0xca7   : > { %4992 = vpow2.f32 %v1602_v51  ;;  %v1597_v54 = vsub.f32 %v1581_v20, %v1593_v30  ;;  %4531 = vmatpush3.bf16.msra.mxu0 %v4528_v46 }
 0xca9   : > { %v1604_v57 = vmul.f32 1.442695, %v1597_v54 }
 0xcab   : > { %4994 = vpow2.f32 %v1604_v57 }
 0xcac   : > { %v4989_v44 = vpop.eup %4988 }
 0xcad   : > { %v4991_v48 = vpop.eup %4990  ;;  %v1609_v58 = vsel %vm647_vm3, %v4989_v44, 0.0 }
 0xcae   : > { %1610 = vadd.xlane.f32.xlu0 %v1609_v58  ;;  %v1606_v8 = vsel %vm647_vm3, %v4991_v48, 0.0 }
 0xcaf   : > { %1607 = vadd.xlane.f32.xlu1 %v1606_v8 }
 0xcb1   : > { %v4993_v50 = vpop.eup %4992 }
 0xcb2   : > { %v1612_v62 = vsel %vm647_vm3, %v4993_v50, 0.0 }
 0xcb3   : > { %1613 = vadd.xlane.f32.xlu1 %v1612_v62 }
 0xcb5   : > { %v4995_v63 = vpop.eup %4994 }
 0xcb6   : > { %v1615_v21 = vsel %vm647_vm3, %v4995_v63, 0.0 }
 0xcb7   : > { %1616 = vadd.xlane.f32.xlu0 %v1615_v21 }
 0xcc4   : > { %4859 = vrot.lane.b32.xlu1 %v5640_v52, %s6234_s15 }
 0xccd   : > { %4854 = vrot.lane.b32.xlu0 %v5640_v52, %s6235_s16 }
 0xd3b   : > { %v1611_v20 = vpop.xlane.xlu0 %1610 }
 0xd3c   : > { %4996 = vrcp.f32 %v1611_v20  ;;  %v1608_v22 = vpop.xlane.xlu1 %1607 }
 0xd3d   : > { %4998 = vrcp.f32 %v1608_v22 }
 0xd40   : > { %v1614_v6 = vpop.xlane.xlu1 %1613 }
 0xd41   : > { %5000 = vrcp.f32 %v1614_v6 }
 0xd44   : > { %v1617_v33 = vpop.xlane.xlu0 %1616  ;;  %v4860_v35 = vpop.permute.xlu1 %4859 }
 0xd45   : > { %5002 = vrcp.f32 %v1617_v33  ;;  %v4862_v5 = vunpack.i.h.bf16 %v4860_v35  ;;  %v4861_v40 = vunpack.i.l.bf16 %v4860_v35 }
 0xd46   : > { %v4997_v34 = vpop.eup %4996 }
 0xd47   : > { %v4999_v37 = vpop.eup %4998  ;;  %v1623_v4 = vmul.f32 %v4997_v34, %v1611_v20  ;;  %v4536_v57 = vpack.c.bf16 %v4862_v5, %v4861_v40 }
 0xd48   : > { %v1622_v39 = vmul.f32 %v4999_v37, %v1608_v22  ;;  %v4855_v3 = vpop.permute.xlu0 %4854 }
 0xd49   : > { %v4857_v41 = vunpack.i.h.bf16 %v4855_v3  ;;  %v4856_v28 = vunpack.i.l.bf16 %v4855_v3  ;;  %v1627_v46 = vsub.f32 2.0, %v1623_v4 }
 0xd4a   : > { %v1626_v43 = vsub.f32 2.0, %v1622_v39 }
 0xd4b   : > { %v5001_v52 = vpop.eup %5000  ;;  %v4532_v51 = vpack.c.bf16 %v4857_v41, %v4856_v28  ;;  %v1631_v21 = vmul.f32 %v4997_v34, %v1627_v46 }
 0xd4c   : > { %v1630_v30 = vmul.f32 %v4999_v37, %v1626_v43  ;;  %v1624_v54 = vmul.f32 %v5001_v52, %v1614_v6 }
 0xd4d   : > { %4533 = vmatprep.subr.bf16.mxu0 %v4532_v51  ;;  %v1635_v39 = vmul.f32 %v4989_v44, %v1631_v21  ;;  %v5731_v44 = vld [vmem:[%s6214_s3 + $0xa0] sm:$0xff] }
 0xd4e   : > { %v1634_v58 = vmul.f32 %v4991_v48, %v1630_v30  ;;  %v1628_v8 = vsub.f32 2.0, %v1624_v54  ;;  %4535 = vmatpush3.bf16.msra.mxu0 %v4532_v51  ;;  %v1768_v30 = vld [vmem:[%s6214_s3 + $0x40] sm:$0xff]  ;;  %v1769_v54 = vld [vmem:[%s6214_s3 + $0x48] sm:$0xff] }
 0xd4f   : > { %v5003_v62 = vpop.eup %5002  ;;  %4537 = vmatprep.subr.bf16.mxu0 %v4536_v57 }
 0xd50   : > { %v1632_v20 = vmul.f32 %v5001_v52, %v1628_v8  ;;  %v1625_v22 = vmul.f32 %v5003_v62, %v1617_v33  ;;  %4147 = vmatprep.mubr.msk.f32.mxu0 %vm647_vm3, %v1634_v58  ;;  %v1771_v58 = vld [vmem:[%s6214_s3 + $0x58] sm:$0xff] }
 0xd52   : > { %v1629_v35 = vsub.f32 2.0, %v1625_v22  ;;  %4539 = vmatpush3.bf16.msra.mxu0 %v4536_v57  ;;  %v1636_v4 = vmul.f32 %v4993_v50, %v1632_v20  ;;  %v5760_v57 = vpack.c.bf16 %v1769_v54, %v1768_v30 }
 0xd53   : > { %4540 = vmatprep.subr.bf16.mxu0 %v6227_v56 }
 0xd54   : > { %v1633_v37 = vmul.f32 %v5003_v62, %v1629_v35 }
 0xd55   : > { %4148 = vmatmul.mubr.msk.f32.vlgmr.msra.gmra.mrb[14].mxu0 %vm647_vm3, %v1635_v39 }
 0xd56   : > { %v1637_v6 = vmul.f32 %v4995_v63, %v1633_v37  ;;  %4150 = vmatprep.mubr.msk.f32.mxu0 %vm647_vm3, %v1636_v4  ;;  %v5736_v63 = vrot.slane %v5731_v44, %v900_v2  ;;  %4542 = vmatpush3.bf16.msra.mxu0 %v5760_v57 }
 0xd57   : > { %4543 = vmatprep.subr.bf16.mxu0 %v6227_v56 }
 0xd59   : > { %4151 = vmatmul.mubr.msk.f32.gmra.mrb[16].mxu0 %vm647_vm3, %v1637_v6 }
 0xd5a   : > { %4161 = vmatprep.mubr.msk.f32.mxu0 %vm5151_vm4, %v6224_v10 }
 0xe28   : > { %v4149_v48 = vpop.f32.mrb[14].mxu0 }
 0xe29   : > { %v1716_v33 = vpop.f32.mrb[15].mxu0 }
 0xe2a   : > { %v1735_v34 = vadd.f32 %v4149_v48, %v1716_v33 }
 0xe2c   : > { %v4152_v3 = vpop.f32.mrb[16].mxu0 }
 0xe2d   : > { %v1726_v5 = vpop.f32.mrb[17].mxu0 }
 0xe2e   : > { %v1736_v50 = vadd.f32 %v1735_v34, %v1726_v5 }
 0xe30   : > { %v1737_v40 = vadd.f32 %v4152_v3, %v1736_v50  ;;  %v5801_v3 = vrot.slane %v5731_v44, %v933_v61  ;;  %v5807_v50 = vrot.slane %v5731_v44, %v939_v0  ;;  %v1852_v0 = vld [vmem:[%s6214_s3 + $0x70] sm:$0xff] }
 0xe32   : > { %v1739_v41 = vadd.f32 %v1737_v40, %v5592_v11 }
 0xe34   : > { %v1744_v28 = vadd.f32 %v5736_v63, %v1739_v41  ;;  %v1850_v41 = vld [vmem:[%s6214_s3 + $0x60] sm:$0xff] }
 0xe36   : > { %v1745_v43 = vsel %vm274_vm0, %v1744_v28, 0.0 }
 0xe37   : > { %1746 = vadd.xlane.f32.xlu1 %v1745_v43 }
 0xe48   : > { %2113 = vrot.lane.b32.xlu1 %v5701_v12, %s5145_s29 }
 0xe4c   : > { %2115 = vrot.lane.b32.xlu1 %v5703_v15, %s5144_s28 }
 0xe50   : > { %2119 = vrot.lane.b32.xlu1 %v5703_v15, %s5146_s9 }
 0xe54   : > { %4864 = vrot.lane.b32.xlu1 %v4863_v13, %s5147_s10  ;;  %v1770_v13 = vld [vmem:[%s6214_s3 + $0x50] sm:$0xff] }
 0xe55   : > { %v5772_v8 = vpack.c.bf16 %v1771_v58, %v1770_v13  ;;  %v1856_v13 = vld [vmem:[%s6214_s3 + $0x90] sm:$0xff]  ;;  %v1857_v58 = vld [vmem:[%s6214_s3 + $0x98] sm:$0xff] }
 0xe57   : > { %4545 = vmatpush3.bf16.msra.mxu0 %v5772_v8 }
 0xe58   : > { %4546 = vmatprep.subr.bf16.mxu0 %v6227_v56 }
 0xec4   : > { %v1747_v2 = vpop.xlane.xlu1 %1746 }
 0xec5   : > { %v1748_v11 = vmul.f32 0.03125, %v1747_v2 }
 0xec7   : > { %v1749_v52 = vsub.f32 %v1744_v28, %v1748_v11  ;;  %v1851_v28 = vld [vmem:[%s6214_s3 + $0x68] sm:$0xff]  ;;  %v1853_v11 = vld [vmem:[%s6214_s3 + $0x78] sm:$0xff] }
 0xec8   : > { %v5778_v62 = vpop.permute.xlu1 %2113  ;;  %v5816_v43 = vpack.c.bf16 %v1851_v28, %v1850_v41 }
 0xec9   : > { %v1750_v46 = vmul.f32 %v1749_v52, %v1749_v52 }
 0xecb   : > { %v1751_v51 = vsel %vm274_vm0, %v1750_v46, 0.0  ;;  %v1854_v46 = vld [vmem:[%s6214_s3 + $0x80] sm:$0xff] }
 0xecc   : > { %1752 = vadd.xlane.f32.xlu0 %v1751_v51  ;;  %v5784_v4 = vpop.permute.xlu1 %2115  ;;  %v1855_v51 = vld [vmem:[%s6214_s3 + $0x88] sm:$0xff] }
 0xecd   : > { %v5842_v54 = vpack.c.bf16 %v1855_v51, %v1854_v46 }
 0xed0   : > { %v5792_v48 = vpop.permute.xlu1 %2119 }
 0xed4   : > { %v4865_v30 = vpop.permute.xlu1 %4864 }
 0xee2   : > { %2111 = vrot.lane.b32.xlu0 %v5703_v15, %s5145_s29 }
 0xee6   : > { %2117 = vrot.lane.b32.xlu0 %v5701_v12, %s5144_s28 }
 0xeea   : > { %2121 = vrot.lane.b32.xlu0 %v5701_v12, %s5146_s9 }
 0xf59   : > { %v1753_v21 = vpop.xlane.xlu0 %1752 }
 0xf5a   : > { %v1754_v20 = vmul.f32 0.03125, %v1753_v21  ;;  %v4867_v21 = vunpack.i.h.bf16 %v4865_v30 }
 0xf5c   : > { %v1755_v22 = vadd.f32 1e-05, %v1754_v20  ;;  %v4866_v20 = vunpack.i.l.bf16 %v4865_v30 }
 0xf5d   : > { %v5780_v35 = vpop.permute.xlu0 %2111 }
 0xf5e   : > { %5004 = vrsqrt.f32 %v1755_v22  ;;  %v4868_v39 = vpack.i.bf16 %v5778_v62, %v5780_v35  ;;  %v5852_v22 = vpack.c.bf16 %v1857_v58, %v1856_v13 }
 0xf60   : > { %4869 = vrot.lane.b32.xlu0 %v4868_v39, %s5147_s10  ;;  %v4574_v39 = vpack.c.bf16 %v4867_v21, %v4866_v20 }
 0xf61   : > { %v5787_v37 = vpop.permute.xlu0 %2117 }
 0xf62   : > { %v4873_v6 = vpack.i.bf16 %v5787_v37, %v5784_v4 }
 0xf64   : > { %4874 = vrot.lane.b32.xlu1 %v4873_v6, %s5147_s10  ;;  %v5861_v6 = vrot.slane %v5731_v44, %v949_v17 }
 0xf65   : > { %v5794_v33 = vpop.permute.xlu0 %2121 }
 0xf66   : > { %v4878_v34 = vpack.i.bf16 %v5794_v33, %v5792_v48  ;;  %6236 = vst [vmem:[#allocation5_spill] sm:$0xff] %v5861_v6 }
 0xf68   : > { %v5005_v5 = vpop.eup %5004  ;;  %4879 = vrot.lane.b32.xlu0 %v4878_v34, %s5147_s10 }
 0xf69   : > { %v1757_v40 = vmul.f32 %v5005_v5, %v1749_v52  ;;  %v5830_v52 = vpack.c.bf16 %v1853_v11, %v1852_v0 }
 0xf6b   : > { %v1762_v61 = vmul.f32 %v5801_v3, %v1757_v40 }
 0xf6d   : > { %v5819_v2 = vadd.f32 %v5807_v50, %v1762_v61 }
 0xf6f   : > { %4162 = vmatmul.mubr.msk.f32.vlgmr.msra.gmra.mrb[18].mxu0 %vm274_vm0, %v5819_v2 }
 0xf70   : > { %4548 = vmatpush3.bf16.msra.mxu0 %v5816_v43  ;;  %4180 = vmatprep.mubr.msk.f32.mxu0 %vm5151_vm4, %v6224_v10 }
 0xf71   : > { %4549 = vmatprep.subr.bf16.mxu0 %v6227_v56 }
 0xf74   : > { %4551 = vmatpush3.bf16.msra.mxu0 %v5830_v52 }
 0xf75   : > { %4552 = vmatprep.subr.bf16.mxu0 %v6227_v56 }
 0xf78   : > { %4554 = vmatpush3.bf16.msra.mxu0 %v5842_v54 }
 0xf79   : > { %4555 = vmatprep.subr.bf16.mxu0 %v6227_v56 }
 0xf7c   : > { %4557 = vmatpush3.bf16.msra.mxu0 %v5852_v22 }
 0xf7d   : > { %4576 = vmatprep.subr.msk.bf16.mxu0 %vm5294_vm2, %v4574_v39 }
 0xfd2   : > { %v4870_v34 = vpop.permute.xlu0 %4869 }
 0xfd3   : > { %v4872_v40 = vunpack.i.h.bf16 %v4870_v34  ;;  %v4871_v41 = vunpack.i.l.bf16 %v4870_v34 }
 0xfd5   : > { %v4580_v11 = vpack.c.bf16 %v4872_v40, %v4871_v41  ;;  %v5070_v41 = vld [vmem:[%s6215_s4 + $0x18] sm:$0xff] }
 0xfd6   : > { %v4875_v46 = vpop.permute.xlu1 %4874 }
 0xfd7   : > { %v4877_v17 = vunpack.i.h.bf16 %v4875_v46  ;;  %v4876_v51 = vunpack.i.l.bf16 %v4875_v46 }
 0xfd9   : > { %v4586_v30 = vpack.c.bf16 %v4877_v17, %v4876_v51 }
 0xfda   : > { %v4880_v13 = vpop.permute.xlu0 %4879 }
 0xfdb   : > { %v4882_v58 = vunpack.i.h.bf16 %v4880_v13  ;;  %v4881_v21 = vunpack.i.l.bf16 %v4880_v13 }
 0xfdd   : > { %v4592_v20 = vpack.c.bf16 %v4882_v58, %v4881_v21  ;;  %v5072_v58 = vld [vmem:[%s6215_s4 + $0x28] sm:$0xff] }
0x1042   : > { %v1845_v5 = vpop.f32.mrb[18].mxu0 }
0x1043   : > { %v1846_v28 = vadd.f32 %v1845_v5, %v5861_v6  ;;  %v4163_v61 = vpop.f32.mrb[19].mxu0 }
0x1045   : > { %v1849_v0 = vmax.f32 %v1846_v28, 0.0 }
0x1047   : > { %4181 = vmatmul.mubr.msk.f32.vlgmr.msra.gmra.mrb[20].mxu0 %vm647_vm3, %v1849_v0  ;;  %v5071_v0 = vld [vmem:[%s6215_s4 + $0x10] sm:$0xff] }
0x1048   : > { %4579 = vmatpush3.bf16.xpose.msk.msra.mxu0 %vm5294_vm2, %v4574_v39  ;;  %4221 = vmatprep.mubr.msk.f32.mxu0 %vm485_vm1, %v5703_v15 }
0x1049   : > { %4582 = vmatprep.subr.msk.bf16.mxu0 %vm5294_vm2, %v4580_v11 }
0x1050   : > { %4585 = vmatpush3.bf16.xpose.msk.msra.mxu0 %vm5294_vm2, %v4580_v11 }
0x1051   : > { %4588 = vmatprep.subr.msk.bf16.mxu0 %vm5294_vm2, %v4586_v30 }
0x1058   : > { %4591 = vmatpush3.bf16.xpose.msk.msra.mxu0 %vm5294_vm2, %v4586_v30 }
0x1059   : > { %4594 = vmatprep.subr.msk.bf16.mxu0 %vm5294_vm2, %v4592_v20 }
0x1060   : > { %4597 = vmatpush3.bf16.xpose.msk.msra.mxu0 %vm5294_vm2, %v4592_v20 }
0x1061   : > { %4623 = vmatprep.subr.bf16.mxu0 %v5486_v47 }
0x1067   : > { %4222 = vmatmul.mubr.msk.f32.vlgmr.msra.gmra.mrb[22].mxu0 %vm485_vm1, %v5701_v12 }
0x1068   : > { %4224 = vmatprep.mubr.msk.f32.mxu0 %vm485_vm1, %v5780_v35  ;;  %4625 = vmatpush3.bf16.msra.mxu0 %v5486_v47 }
0x1069   : > { %4627 = vmatprep.subr.bf16.mxu0 %v5491_v49 }
0x106b   : > { %4225 = vmatmul.mubr.msk.f32.gmra.mrb[24].mxu0 %vm485_vm1, %v5778_v62 }
0x106c   : > { %4227 = vmatprep.mubr.msk.f32.mxu0 %vm485_vm1, %v5784_v4  ;;  %4629 = vmatpush3.bf16.msra.mxu0 %v5491_v49 }
0x106d   : > { %4631 = vmatprep.subr.bf16.mxu0 %v5502_v53 }
0x106f   : > { %4228 = vmatmul.mubr.msk.f32.gmra.mrb[26].mxu0 %vm485_vm1, %v5787_v37 }
0x1070   : > { %4230 = vmatprep.mubr.msk.f32.mxu0 %vm485_vm1, %v5792_v48  ;;  %4633 = vmatpush3.bf16.msra.mxu0 %v5502_v53  ;;  %v5068_v53 = vld [vmem:[%s6215_s4 + $0x8] sm:$0xff]  ;;  %v5069_v48 = vld [vmem:[%s6215_s4] sm:$0xff] }
0x1071   : > { %4635 = vmatprep.subr.bf16.mxu0 %v5531_v16 }
0x1073   : > { %4231 = vmatmul.mubr.msk.f32.gmra.mrb[28].mxu0 %vm485_vm1, %v5794_v33 }
0x1074   : > { %4637 = vmatpush3.bf16.msra.mxu0 %v5531_v16 }
0x1075   : > { %4653 = vmatprep.subr.bf16.mxu0 %v5588_v9 }
0x111a   : > { %v5904_v47 = vpop.f32.mrb[20].mxu0 }
0x111b   : > { %v4182_v49 = vpop.f32.mrb[21].mxu0 }
0x111c   : > { %v5073_v49 = vld [vmem:[%s6215_s4 + $0x20] sm:$0xff] }
0x113a   : > { %v4223_v12 = vpop.f32.mrb[22].mxu0 }
0x113b   : > { %v2297_v15 = vmul.f32 0.35355338, %v4223_v12  ;;  %v2257_v62 = vpop.f32.mrb[23].mxu0 }
0x113c   : > { %v2296_v35 = vmul.f32 0.35355338, %v2257_v62 }
0x113d   : > { %v2305_v4 = vadd.f32 %v5068_v53, %v2297_v15 }
0x113e   : > { %v4226_v37 = vpop.f32.mrb[24].mxu0  ;;  %v2304_v16 = vadd.f32 %v5069_v48, %v2296_v35  ;;  %v5074_v48 = vld [vmem:[%s6215_s4 + $0x38] sm:$0xff] }
0x113f   : > { %v2299_v33 = vmul.f32 0.35355338, %v4226_v37  ;;  %v2267_v39 = vpop.f32.mrb[25].mxu0  ;;  %v2315_v34 = vsel %vm647_vm3, %v2305_v4, -inf }
0x1140   : > { %v2298_v5 = vmul.f32 0.35355338, %v2267_v39  ;;  %2316 = vmax.xlane.f32.xlu0 %v2315_v34  ;;  %v2312_v40 = vsel %vm647_vm3, %v2304_v16, -inf  ;;  %v5075_v39 = vld [vmem:[%s6215_s4 + $0x30] sm:$0xff] }
0x1141   : > { %2313 = vmax.xlane.f32.xlu1 %v2312_v40  ;;  %v2307_v28 = vadd.f32 %v5070_v41, %v2299_v33 }
0x1142   : > { %v4229_v61 = vpop.f32.mrb[26].mxu0  ;;  %v2306_v11 = vadd.f32 %v5071_v0, %v2298_v5 }
0x1143   : > { %v2301_v46 = vmul.f32 0.35355338, %v4229_v61  ;;  %v2277_v17 = vpop.f32.mrb[27].mxu0  ;;  %v2321_v51 = vsel %vm647_vm3, %v2307_v28, -inf }
0x1144   : > { %v2300_v30 = vmul.f32 0.35355338, %v2277_v17  ;;  %v2318_v13 = vsel %vm647_vm3, %v2306_v11, -inf }
0x1145   : > { %2322 = vmax.xlane.f32.xlu1 %v2321_v51  ;;  %2319 = vmax.xlane.f32.xlu0 %v2318_v13  ;;  %v2309_v21 = vadd.f32 %v5072_v58, %v2301_v46 }
0x1146   : > { %v4232_v20 = vpop.f32.mrb[28].mxu0  ;;  %v2308_v12 = vadd.f32 %v5073_v49, %v2300_v30 }
0x1147   : > { %v2303_v15 = vmul.f32 0.35355338, %v4232_v20  ;;  %v2287_v62 = vpop.f32.mrb[29].mxu0  ;;  %v2327_v35 = vsel %vm647_vm3, %v2309_v21, -inf }
0x1148   : > { %v2302_v53 = vmul.f32 0.35355338, %v2287_v62  ;;  %v2324_v37 = vsel %vm647_vm3, %v2308_v12, -inf }
0x1149   : > { %2328 = vmax.xlane.f32.xlu1 %v2327_v35  ;;  %2325 = vmax.xlane.f32.xlu0 %v2324_v37  ;;  %v2311_v33 = vadd.f32 %v5074_v48, %v2303_v15 }
0x114a   : > { %v5936_v34 = vadd.f32 %v5075_v39, %v2302_v53 }
0x114b   : > { %v2333_v5 = vsel %vm647_vm3, %v2311_v33, -inf }
0x114c   : > { %v2330_v40 = vsel %vm647_vm3, %v5936_v34, -inf }
0x114d   : > { %2334 = vmax.xlane.f32.xlu1 %v2333_v5  ;;  %2331 = vmax.xlane.f32.xlu0 %v2330_v40 }
0x1163   : > { %4884 = vrot.lane.b32.xlu0 %v5709_v31, %s5144_s28 }
0x11cd   : > { %v2317_v41 = vpop.xlane.xlu0 %2316 }
0x11ce   : > { %v2337_v61 = vsub.f32 %v2305_v4, %v2317_v41  ;;  %v2314_v0 = vpop.xlane.xlu1 %2313 }
0x11cf   : > { %v2336_v46 = vsub.f32 %v2304_v16, %v2314_v0 }
0x11d0   : > { %v2346_v17 = vmul.f32 1.442695, %v2337_v61 }
0x11d1   : > { %v2344_v51 = vmul.f32 1.442695, %v2336_v46 }
0x11d2   : > { %5006 = vpow2.f32 %v2346_v17  ;;  %v2323_v30 = vpop.xlane.xlu1 %2322  ;;  %v2320_v13 = vpop.xlane.xlu0 %2319 }
0x11d3   : > { %5008 = vpow2.f32 %v2344_v51  ;;  %v2339_v58 = vsub.f32 %v2307_v28, %v2323_v30  ;;  %v2338_v20 = vsub.f32 %v2306_v11, %v2320_v13 }
0x11d5   : > { %v2350_v49 = vmul.f32 1.442695, %v2339_v58  ;;  %v2348_v15 = vmul.f32 1.442695, %v2338_v20 }
0x11d6   : > { %v2329_v62 = vpop.xlane.xlu1 %2328  ;;  %v2326_v35 = vpop.xlane.xlu0 %2325 }
0x11d7   : > { %5010 = vpow2.f32 %v2350_v49  ;;  %v2341_v53 = vsub.f32 %v2309_v21, %v2329_v62  ;;  %v2340_v37 = vsub.f32 %v2308_v12, %v2326_v35 }
0x11d8   : > { %5012 = vpow2.f32 %v2348_v15 }
0x11d9   : > { %v2354_v48 = vmul.f32 1.442695, %v2341_v53  ;;  %v2352_v4 = vmul.f32 1.442695, %v2340_v37 }
0x11da   : > { %v2335_v39 = vpop.xlane.xlu1 %2334  ;;  %v2332_v16 = vpop.xlane.xlu0 %2331 }
0x11db   : > { %5014 = vpow2.f32 %v2354_v48  ;;  %v2343_v5 = vsub.f32 %v2311_v33, %v2335_v39  ;;  %v2342_v35 = vsub.f32 %v5936_v34, %v2332_v16 }
0x11dc   : > { %v5943_v40 = vpop.eup %5006  ;;  %5016 = vpow2.f32 %v2352_v4 }
0x11dd   : > { %v5945_v41 = vpop.eup %5008  ;;  %v2358_v28 = vmul.f32 1.442695, %v2343_v5  ;;  %v2363_v11 = vsel %vm647_vm3, %v5943_v40, 0.0  ;;  %v2356_v53 = vmul.f32 1.442695, %v2342_v35 }
0x11de   : > { %2364 = vadd.xlane.f32.xlu1 %v2363_v11  ;;  %v4885_v61 = vpop.permute.xlu0 %4884  ;;  %v2360_v21 = vsel %vm647_vm3, %v5945_v41, 0.0 }
0x11df   : > { %5018 = vpow2.f32 %v2358_v28  ;;  %v4887_v12 = vunpack.i.h.bf16 %v4885_v61  ;;  %v4886_v0 = vunpack.i.l.bf16 %v4885_v61  ;;  %2361 = vadd.xlane.f32.xlu0 %v2360_v21 }
0x11e0   : > { %5020 = vpow2.f32 %v2356_v53 }
0x11e1   : > { %v5951_v46 = vpop.eup %5010  ;;  %v4602_v33 = vpack.c.bf16 %v4887_v12, %v4886_v0 }
0x11e2   : > { %v5953_v17 = vpop.eup %5012  ;;  %v2369_v51 = vsel %vm647_vm3, %v5951_v46, 0.0 }
0x11e3   : > { %2370 = vadd.xlane.f32.xlu1 %v2369_v51  ;;  %v2366_v30 = vsel %vm647_vm3, %v5953_v17, 0.0  ;;  %4603 = vmatprep.subr.bf16.mxu1 %v4602_v33 }
0x11e4   : > { %2367 = vadd.xlane.f32.xlu0 %v2366_v30  ;;  %4605 = vmatpush3.bf16.msra.mxu1 %v4602_v33 }
0x11e5   : > { %v5959_v13 = vpop.eup %5014 }
0x11e6   : > { %v5961_v58 = vpop.eup %5016  ;;  %v2375_v20 = vsel %vm647_vm3, %v5959_v13, 0.0 }
0x11e7   : > { %2376 = vadd.xlane.f32.xlu1 %v2375_v20  ;;  %v2372_v49 = vsel %vm647_vm3, %v5961_v58, 0.0 }
0x11e8   : > { %2373 = vadd.xlane.f32.xlu0 %v2372_v49 }
0x11e9   : > { %v5967_v15 = vpop.eup %5018 }
0x11ea   : > { %v2381_v62 = vsel %vm647_vm3, %v5967_v15, 0.0  ;;  %v5976_v37 = vpop.eup %5020 }
0x11eb   : > { %v2378_v48 = vsel %vm647_vm3, %v5976_v37, 0.0 }
0x11ec   : > { %2382 = vadd.xlane.f32.xlu0 %v2381_v62 }
0x11f8   : > { %4889 = vrot.lane.b32.xlu1 %v5709_v31, %s6235_s16 }
0x1202   : > { %4894 = vrot.lane.b32.xlu0 %v5709_v31, %s6234_s15 }
0x121c   : > { %2379 = vadd.xlane.f32.xlu1 %v2378_v48 }
0x126b   : > { %v2365_v4 = vpop.xlane.xlu1 %2364 }
0x126c   : > { %5022 = vrcp.f32 %v2365_v4  ;;  %v2362_v39 = vpop.xlane.xlu0 %2361 }
0x126d   : > { %5024 = vrcp.f32 %v2362_v39 }
0x1270   : > { %v2371_v5 = vpop.xlane.xlu1 %2370 }
0x1271   : > { %v2368_v28 = vpop.xlane.xlu0 %2367 }
0x1272   : > { %5026 = vrcp.f32 %v2368_v28 }
0x1273   : > { %5028 = vrcp.f32 %v2371_v5 }
0x1274   : > { %v2377_v11 = vpop.xlane.xlu1 %2376 }
0x1275   : > { %v2374_v31 = vpop.xlane.xlu0 %2373 }
0x1276   : > { %v5023_v61 = vpop.eup %5022  ;;  %5030 = vrcp.f32 %v2374_v31 }
0x1277   : > { %v5025_v34 = vpop.eup %5024  ;;  %v2393_v16 = vmul.f32 %v5023_v61, %v2365_v4  ;;  %5032 = vrcp.f32 %v2377_v11 }
0x1278   : > { %v2392_v21 = vmul.f32 %v5025_v34, %v2362_v39  ;;  %v4890_v12 = vpop.permute.xlu1 %4889 }
0x1279   : > { %v4892_v0 = vunpack.i.h.bf16 %v4890_v12  ;;  %v4891_v33 = vunpack.i.l.bf16 %v4890_v12  ;;  %v2383_v51 = vpop.xlane.xlu0 %2382  ;;  %v2401_v62 = vsub.f32 2.0, %v2393_v16 }
0x127a   : > { %v2400_v30 = vsub.f32 2.0, %v2392_v21  ;;  %5034 = vrcp.f32 %v2383_v51 }
0x127b   : > { %v4606_v20 = vpack.c.bf16 %v4892_v0, %v4891_v33  ;;  %v2409_v56 = vmul.f32 %v5023_v61, %v2401_v62 }
0x127c   : > { %v5027_v49 = vpop.eup %5026  ;;  %v2408_v35 = vmul.f32 %v5025_v34, %v2400_v30 }
0x127d   : > { %v5029_v53 = vpop.eup %5028  ;;  %v2394_v48 = vmul.f32 %v5027_v49, %v2368_v28  ;;  %v4895_v25 = vpop.permute.xlu0 %4894  ;;  %4607 = vmatprep.subr.bf16.mxu1 %v4606_v20  ;;  %v2417_v28 = vmul.f32 %v5943_v40, %v2409_v56  ;;  %v6237_v40 = vmov 0.0|0.0  }
0x127e   : > { %v2416_v24 = vmul.f32 %v5945_v41, %v2408_v35  ;;  %v4897_v10 = vunpack.i.h.bf16 %v4895_v25  ;;  %v4896_v26 = vunpack.i.l.bf16 %v4895_v25  ;;  %4609 = vmatpush3.bf16.msra.mxu1 %v4606_v20  ;;  %v2395_v12 = vmul.f32 %v5029_v53, %v2371_v5 }
0x127f   : > { %v2402_v4 = vsub.f32 2.0, %v2394_v48 }
0x1280   : > { %v5031_v39 = vpop.eup %5030  ;;  %v4610_v6 = vpack.c.bf16 %v4897_v10, %v4896_v26  ;;  %4249 = vmatprep.mubr.msk.f32.mxu1 %vm647_vm3, %v2416_v24  ;;  %v2403_v34 = vsub.f32 2.0, %v2395_v12 }
0x1281   : > { %v2410_v21 = vmul.f32 %v5027_v49, %v2402_v4  ;;  %v2396_v0 = vmul.f32 %v5031_v39, %v2374_v31  ;;  %v5033_v41 = vpop.eup %5032 }
0x1282   : > { %4611 = vmatprep.subr.bf16.mxu1 %v4610_v6  ;;  %v2411_v26 = vmul.f32 %v5029_v53, %v2403_v34  ;;  %v2397_v10 = vmul.f32 %v5033_v41, %v2377_v11 }
0x1283   : > { %4613 = vmatpush3.bf16.msra.mxu1 %v4610_v6  ;;  %v2418_v25 = vmul.f32 %v5953_v17, %v2410_v21  ;;  %v2404_v16 = vsub.f32 2.0, %v2396_v0  ;;  %v6238_v21 = vsub.s32 6, %v5436_v18 }
0x1284   : > { %4615 = vmatprep.subr.bf16.mxu1 %v5461_v29  ;;  %v2419_v56 = vmul.f32 %v5951_v46, %v2411_v26  ;;  %v2405_v6 = vsub.f32 2.0, %v2397_v10 }
0x1285   : > { %v2412_v24 = vmul.f32 %v5031_v39, %v2404_v16  ;;  %v6010_v0 = vrot.slane %v5731_v44, %v6238_v21 }
0x1286   : > { %4250 = vmatmul.mubr.msk.f32.vlgmr.msra.gmra.mrb[18].mxu1 %vm647_vm3, %v2417_v28  ;;  %v2413_v5 = vmul.f32 %v5033_v41, %v2405_v6 }
0x1287   : > { %4252 = vmatprep.mubr.msk.f32.mxu1 %vm647_vm3, %v2418_v25  ;;  %4617 = vmatpush3.bf16.msra.mxu1 %v5461_v29  ;;  %v2420_v17 = vmul.f32 %v5961_v58, %v2412_v24  ;;  %v1932_v41 = vadd.f32 %v5904_v47, %v6010_v0 }
0x1288   : > { %4619 = vmatprep.subr.bf16.mxu1 %v5473_v42  ;;  %v2421_v29 = vmul.f32 %v5959_v13, %v2413_v5 }
0x1289   : > { %v1935_v10 = vadd.f32 %v1932_v41, %v5819_v2 }
0x128b   : > { %4621 = vmatpush3.bf16.msra.mxu1 %v5473_v42  ;;  %v5035_v42 = vpop.eup %5034  ;;  %v1936_v24 = vsel %vm274_vm0, %v1935_v10, 0.0 }
0x128c   : > { %4638 = vmatprep.subr.bf16.mxu1 %v6237_v40  ;;  %v2399_v31 = vmul.f32 %v5035_v42, %v2383_v51 }
0x128e   : > { %4253 = vmatmul.mubr.msk.f32.gmra.mrb[18].mxu1 %vm647_vm3, %v2419_v56  ;;  %v2407_v61 = vsub.f32 2.0, %v2399_v31 }
0x128f   : > { %4255 = vmatprep.mubr.msk.f32.mxu1 %vm647_vm3, %v2420_v17 }
0x1290   : > { %v2415_v20 = vmul.f32 %v5035_v42, %v2407_v61 }
0x1292   : > { %v2423_v62 = vmul.f32 %v5967_v15, %v2415_v20  ;;  %v6239_v20 = vmov 0.0  }
0x1296   : > { %4256 = vmatmul.mubr.msk.f32.gmra.mrb[18].mxu1 %vm647_vm3, %v2421_v29 }
0x12a9   : > { %v2380_v11 = vpop.xlane.xlu1 %2379 }
0x12aa   : > { %5036 = vrcp.f32 %v2380_v11 }
0x12b4   : > { %v5037_v46 = vpop.eup %5036 }
0x12b5   : > { %v2398_v33 = vmul.f32 %v5037_v46, %v2380_v11 }
0x12b7   : > { %v2406_v30 = vsub.f32 2.0, %v2398_v33 }
0x12b9   : > { %v2414_v58 = vmul.f32 %v5037_v46, %v2406_v30 }
0x12bb   : > { %v2422_v49 = vmul.f32 %v5976_v37, %v2414_v58 }
0x12bd   : > { %4258 = vmatprep.mubr.msk.f32.mxu1 %vm647_vm3, %v2422_v49 }
0x12be   : > { %4259 = vmatmul.mubr.msk.f32.gmra.mrb[18].mxu1 %vm647_vm3, %v2423_v62 }
0x1391   : > { %v4260_v13 = vpop.f32.mrb[18].mxu1 }
0x1392   : > { %v2544_v35 = vpop.f32.mrb[19].mxu1  ;;  %v2560_v53 = vadd.f32 %v4260_v13, %v5633_v38 }
0x1393   : > { %v2559_v51 = vadd.f32 %v2544_v35, %v5625_v36 }
0x1394   : > { %v2562_v39 = vadd.f32 %v2560_v53, %v5447_v45 }
0x1395   : > { %v2561_v48 = vadd.f32 %v2559_v51, %v5447_v45 }
0x1396   : > { %v2566_v37 = vsel %vm274_vm0, %v2562_v39, 0.0 }
0x1397   : > { %v2563_v4 = vsel %vm274_vm0, %v2561_v48, 0.0 }
0x1398   : > { %2564 = vadd.xlane.f32.xlu1 %v2563_v4 }
0x139c   : > { %2567 = vadd.xlane.f32.xlu1 %v2566_v37 }
0x1425   : > { %v2565_v15 = vpop.xlane.xlu1 %2564 }
0x1426   : > { %v2569_v12 = vmul.f32 0.03125, %v2565_v15 }
0x1428   : > { %v2571_v38 = vsub.f32 %v2561_v48, %v2569_v12 }
0x1429   : > { %v2568_v28 = vpop.xlane.xlu1 %2567 }
0x142a   : > { %v2570_v36 = vmul.f32 0.03125, %v2568_v28  ;;  %v2573_v34 = vmul.f32 %v2571_v38, %v2571_v38 }
0x142c   : > { %v2572_v25 = vsub.f32 %v2562_v39, %v2570_v36  ;;  %v2575_v45 = vsel %vm274_vm0, %v2573_v34, 0.0 }
0x142d   : > { %2576 = vadd.xlane.f32.xlu1 %v2575_v45 }
0x142e   : > { %v2574_v16 = vmul.f32 %v2572_v25, %v2572_v25 }
0x1430   : > { %v2578_v26 = vsel %vm274_vm0, %v2574_v16, 0.0 }
0x1431   : > { %2579 = vadd.xlane.f32.xlu1 %v2578_v26 }
0x1435   : > { %1937 = vadd.xlane.f32.xlu1 %v1936_v24 }
0x14ba   : > { %v2577_v56 = vpop.xlane.xlu1 %2576 }
0x14bb   : > { %v2581_v6 = vmul.f32 0.03125, %v2577_v56 }
0x14bd   : > { %v2583_v17 = vadd.f32 1e-05, %v2581_v6  ;;  %v6240_v6 = vsub.s32 3, %v5436_v18 }
0x14be   : > { %v2580_v5 = vpop.xlane.xlu1 %2579 }
0x14bf   : > { %5038 = vrsqrt.f32 %v2583_v17  ;;  %v2582_v29 = vmul.f32 0.03125, %v2580_v5  ;;  %v6047_v17 = vrot.slane %v5731_v44, %v6240_v6 }
0x14c1   : > { %v2584_v47 = vadd.f32 1e-05, %v2582_v29 }
0x14c2   : > { %v1938_v35 = vpop.xlane.xlu1 %1937 }
0x14c3   : > { %5040 = vrsqrt.f32 %v2584_v47  ;;  %v1939_v53 = vmul.f32 0.03125, %v1938_v35  ;;  %v6241_v47 = vsub.s32 4, %v5436_v18 }
0x14c5   : > { %v1940_v48 = vsub.f32 %v1935_v10, %v1939_v53 }
0x14c7   : > { %v1941_v21 = vmul.f32 %v1940_v48, %v1940_v48 }
0x14c9   : > { %v5039_v11 = vpop.eup %5038 }
0x14ca   : > { %v2587_v42 = vmul.f32 %v5039_v11, %v2571_v38  ;;  %v6052_v11 = vrot.slane %v5731_v44, %v6241_v47 }
0x14cc   : > { %v2589_v31 = vmul.f32 %v2587_v42, %v5512_v1 }
0x14cd   : > { %v5041_v46 = vpop.eup %5040 }
0x14ce   : > { %v2588_v61 = vmul.f32 %v5041_v46, %v2572_v25  ;;  %v2591_v2 = vadd.f32 %v2589_v31, %v5517_v59 }
0x14d0   : > { %v2590_v33 = vmul.f32 %v2588_v61, %v5512_v1  ;;  %4269 = vmatprep.mubr.msk.f32.mxu1 %vm274_vm0, %v2591_v2 }
0x14d2   : > { %v2592_v30 = vadd.f32 %v2590_v33, %v5517_v59 }
0x14d4   : > { %4270 = vmatmul.mubr.msk.f32.vlgmr.msra.gmra.mrb[20].mxu1 %vm274_vm0, %v2592_v30 }
0x14d5   : > { %4640 = vmatpush3.bf16.msra.mxu1 %v5563_v55  ;;  %4299 = vmatprep.mubr.msk.f32.mxu1 %vm5151_vm4, %v6239_v20 }
0x14d6   : > { %4641 = vmatprep.subr.bf16.mxu1 %v6237_v40 }
0x14d9   : > { %4643 = vmatpush3.bf16.msra.mxu1 %v5574_v60 }
0x14da   : > { %4645 = vmatprep.subr.bf16.mxu1 %v5563_v55 }
0x15a7   : > { %v4271_v58 = vpop.f32.mrb[20].mxu1 }
0x15a8   : > { %v2671_v1 = vadd.f32 %v4271_v58, %v5539_v19  ;;  %v2665_v49 = vpop.f32.mrb[21].mxu1 }
0x15a9   : > { %v2666_v62 = vadd.f32 %v2665_v49, %v5539_v19 }
0x15aa   : > { %v2675_v13 = vmax.f32 %v2671_v1, 0.0 }
0x15ab   : > { %v2674_v59 = vmax.f32 %v2666_v62, 0.0 }
0x15ad   : > { %4288 = vmatprep.mubr.msk.f32.mxu0 %vm647_vm3, %v2674_v59 }
0x15ae   : > { %4289 = vmatmul.mubr.msk.f32.vlgmr.msra.gmra.mrb[30].mxu0 %vm647_vm3, %v2675_v13 }
0x15af   : > { %4655 = vmatpush3.bf16.msra.mxu0 %v5588_v9 }
0x15b0   : > { %4657 = vmatprep.subr.bf16.mxu0 %v5606_v14 }
0x15b3   : > { %4659 = vmatpush3.bf16.msra.mxu0 %v5606_v14  ;;  %v1942_v14 = vsel %vm274_vm0, %v1941_v21, 0.0 }
0x1681   : > { %v4290_v51 = vpop.f32.mrb[30].mxu0 }
0x1682   : > { %v2754_v4 = vadd.f32 %v4290_v51, %v5549_v27  ;;  %v2748_v39 = vpop.f32.mrb[31].mxu0 }
0x1683   : > { %v2749_v19 = vadd.f32 %v2748_v39, %v5549_v27 }
0x1684   : > { %v2758_v37 = vadd.f32 %v2754_v4, %v2592_v30 }
0x1685   : > { %v2757_v15 = vadd.f32 %v2749_v19, %v2591_v2 }
0x1686   : > { %v2762_v12 = vsel %vm274_vm0, %v2758_v37, 0.0 }
0x1687   : > { %2763 = vadd.xlane.f32.xlu1 %v2762_v12  ;;  %v2759_v9 = vsel %vm274_vm0, %v2757_v15, 0.0 }
0x1688   : > { %2760 = vadd.xlane.f32.xlu0 %v2759_v9 }
0x168b   : > { %1943 = vadd.xlane.f32.xlu1 %v1942_v14 }
0x1714   : > { %v2764_v38 = vpop.xlane.xlu1 %2763 }
0x1715   : > { %v2766_v28 = vmul.f32 0.03125, %v2764_v38  ;;  %v2761_v36 = vpop.xlane.xlu0 %2760 }
0x1716   : > { %v2765_v34 = vmul.f32 0.03125, %v2761_v36 }
0x1717   : > { %v2768_v41 = vsub.f32 %v2758_v37, %v2766_v28 }
0x1718   : > { %v2767_v25 = vsub.f32 %v2757_v15, %v2765_v34  ;;  %v1944_v45 = vpop.xlane.xlu1 %1943 }
0x1719   : > { %v1945_v27 = vmul.f32 0.03125, %v1944_v45  ;;  %v2770_v24 = vmul.f32 %v2768_v41, %v2768_v41 }
0x171a   : > { %v2769_v16 = vmul.f32 %v2767_v25, %v2767_v25 }
0x171b   : > { %v1946_v26 = vadd.f32 1e-05, %v1945_v27  ;;  %v2774_v56 = vsel %vm274_vm0, %v2770_v24, 0.0 }
0x171c   : > { %v2771_v10 = vsel %vm274_vm0, %v2769_v16, 0.0 }
0x171d   : > { %5042 = vrsqrt.f32 %v1946_v26  ;;  %2772 = vadd.xlane.f32.xlu1 %v2771_v10 }
0x1721   : > { %2775 = vadd.xlane.f32.xlu1 %v2774_v56 }
0x1727   : > { %v5043_v5 = vpop.eup %5042 }
0x1728   : > { %v1948_v29 = vmul.f32 %v5043_v5, %v1940_v48 }
0x172a   : > { %v1953_v42 = vmul.f32 %v6047_v17, %v1948_v29 }
0x172c   : > { %v6056_v31 = vadd.f32 %v6052_v11, %v1953_v42 }
0x172e   : > { %4300 = vmatmul.mubr.msk.f32.vlgmr.msra.gmra.mrb[22].mxu1 %vm274_vm0, %v6056_v31 }
0x172f   : > { %4647 = vmatpush3.bf16.msra.mxu1 %v5563_v55 }
0x1730   : > { %4649 = vmatprep.subr.bf16.mxu1 %v5574_v60 }
0x1733   : > { %4651 = vmatpush3.bf16.msra.mxu1 %v5574_v60 }
0x17aa   : > { %v2773_v46 = vpop.xlane.xlu1 %2772 }
0x17ab   : > { %v2777_v61 = vmul.f32 0.03125, %v2773_v46  ;;  %v5076_v46 = vld [vmem:[%s6216_s5 + $0x8] sm:$0xff] }
0x17ad   : > { %v2779_v18 = vadd.f32 1e-05, %v2777_v61 }
0x17ae   : > { %v2776_v2 = vpop.xlane.xlu1 %2775 }
0x17af   : > { %5044 = vrsqrt.f32 %v2779_v18  ;;  %v2778_v44 = vmul.f32 0.03125, %v2776_v2 }
0x17b1   : > { %v2780_v33 = vadd.f32 1e-05, %v2778_v44 }
0x17b3   : > { %5046 = vrsqrt.f32 %v2780_v33 }
0x17b9   : > { %v5045_v30 = vpop.eup %5044 }
0x17ba   : > { %v2783_v58 = vmul.f32 %v5045_v30, %v2767_v25 }
0x17bc   : > { %v2785_v1 = vmul.f32 %v2783_v58, %v5616_v7 }
0x17bd   : > { %v5047_v49 = vpop.eup %5046 }
0x17be   : > { %v2784_v62 = vmul.f32 %v5047_v49, %v2768_v41  ;;  %v2787_v55 = vadd.f32 %v2785_v1, %v5621_v32  ;;  %v5078_v1 = vld [vmem:[%s6216_s5 + $0x18] sm:$0xff] }
0x17c0   : > { %4310 = vmatprep.mubr.msk.f32.mxu1 %vm274_vm0, %v2787_v55  ;;  %4321 = vmatprep.mubr.msk.f32.mxu0 %vm274_vm0, %v2787_v55  ;;  %v2786_v60 = vmul.f32 %v2784_v62, %v5616_v7  ;;  %v5079_v62 = vld [vmem:[%s6216_s5 + $0x10] sm:$0xff] }
0x17c2   : > { %v2788_v59 = vadd.f32 %v2786_v60, %v5621_v32 }
0x17c4   : > { %4311 = vmatmul.mubr.msk.f32.vlgmr.msra.gmra.mrb[24].mxu1 %vm274_vm0, %v2788_v59  ;;  %4322 = vmatmul.mubr.msk.f32.vlgmr.msra.gmra.mrb[32].mxu0 %vm274_vm0, %v2788_v59 }
0x1801   : > { %v2858_v13 = vpop.f32.mrb[22].mxu1 }
0x1802   : > { %v4301_v35 = vpop.f32.mrb[23].mxu1  ;;  %4340 = vmatprep.mubr.msk.f32.mxu1 %vm485_vm1, %v2858_v13 }
0x1897   : > { %v4312_v53 = vpop.f32.mrb[24].mxu1  ;;  %v4323_v51 = vpop.f32.mrb[32].mxu0 }
0x1898   : > { %v2934_v48 = vpop.f32.mrb[25].mxu1  ;;  %v3009_v4 = vpop.f32.mrb[33].mxu0 }
0x1899   : > { %v4913_v39 = vpack.i.bf16 %v4312_v53, %v2934_v48  ;;  %v6072_v19 = vpack.i.bf16 %v4323_v51, %v3009_v4  ;;  %v4684_v37 = vpack.c.bf16 %v4323_v51, %v3009_v4 }
0x189b   : > { %4904 = vrot.lane.b32.xlu0 %v4913_v39, %s5144_s28  ;;  %4685 = vmatprep.subr.bf16.mxu0 %v4684_v37 }
0x189c   : > { %4899 = vrot.lane.b32.xlu1 %v4913_v39, %s5145_s29  ;;  %4687 = vmatpush3.bf16.msra.mxu0 %v4684_v37 }
0x189f   : > { %3019 = vrot.lane.b32.xlu0 %v2858_v13, %s5145_s29 }
0x18a0   : > { %4909 = vrot.lane.b32.xlu1 %v4913_v39, %s5146_s9 }
0x18a3   : > { %3023 = vrot.lane.b32.xlu0 %v2858_v13, %s5146_s9 }
0x18a4   : > { %4914 = vrot.lane.b32.xlu1 %v4913_v39, %s5147_s10 }
0x190d   : > { %v4905_v7 = vpop.permute.xlu0 %4904 }
0x190e   : > { %v4900_v32 = vpop.permute.xlu1 %4899 }
0x190f   : > { %4919 = vrot.lane.b32.xlu1 %v4900_v32, %s5147_s10 }
0x1911   : > { %v3020_v56 = vpop.permute.xlu0 %3019 }
0x1912   : > { %v4910_v15 = vpop.permute.xlu1 %4909 }
0x1913   : > { %4924 = vrot.lane.b32.xlu1 %v4905_v7, %s5147_s10 }
0x1915   : > { %v3024_v5 = vpop.permute.xlu0 %3023 }
0x1916   : > { %v4915_v12 = vpop.permute.xlu1 %4914 }
0x1917   : > { %v4917_v21 = vunpack.i.h.bf16 %v4915_v12  ;;  %v4916_v9 = vunpack.i.l.bf16 %v4915_v12  ;;  %4929 = vrot.lane.b32.xlu1 %v4910_v15, %s5147_s10 }
0x1919   : > { %v4660_v14 = vpack.c.bf16 %v4917_v21, %v4916_v9 }
0x191b   : > { %4662 = vmatprep.subr.msk.bf16.mxu1 %vm5294_vm2, %v4660_v14  ;;  %3021 = vrot.lane.b32.xlu1 %v2858_v13, %s5144_s28 }
0x191c   : > { %4665 = vmatpush3.bf16.xpose.msk.msra.mxu1 %vm5294_vm2, %v4660_v14 }
0x1981   : > { %v4920_v38 = vpop.permute.xlu1 %4919 }
0x1982   : > { %v4922_v28 = vunpack.i.h.bf16 %v4920_v38  ;;  %v4921_v36 = vunpack.i.l.bf16 %v4920_v38 }
0x1984   : > { %v4666_v34 = vpack.c.bf16 %v4922_v28, %v4921_v36 }
0x1985   : > { %v4925_v41 = vpop.permute.xlu1 %4924 }
0x1986   : > { %v4927_v25 = vunpack.i.h.bf16 %v4925_v41  ;;  %v4926_v45 = vunpack.i.l.bf16 %v4925_v41  ;;  %4668 = vmatprep.subr.msk.bf16.mxu1 %vm5294_vm2, %v4666_v34 }
0x1987   : > { %4671 = vmatpush3.bf16.xpose.msk.msra.mxu1 %vm5294_vm2, %v4666_v34 }
0x1988   : > { %v4672_v27 = vpack.c.bf16 %v4927_v25, %v4926_v45 }
0x1989   : > { %v4930_v16 = vpop.permute.xlu1 %4929 }
0x198a   : > { %v4932_v26 = vunpack.i.h.bf16 %v4930_v16  ;;  %v4931_v10 = vunpack.i.l.bf16 %v4930_v16  ;;  %4674 = vmatprep.subr.msk.bf16.mxu1 %vm5294_vm2, %v4672_v27 }
0x198c   : > { %v4678_v24 = vpack.c.bf16 %v4932_v26, %v4931_v10 }
0x198d   : > { %v3022_v6 = vpop.permute.xlu1 %3021 }
0x198f   : > { %4677 = vmatpush3.bf16.xpose.msk.msra.mxu1 %vm5294_vm2, %v4672_v27 }
0x1990   : > { %4680 = vmatprep.subr.msk.bf16.mxu1 %vm5294_vm2, %v4678_v24 }
0x1997   : > { %4683 = vmatpush3.bf16.xpose.msk.msra.mxu1 %vm5294_vm2, %v4678_v24 }
0x1998   : > { %4700 = vmatprep.subr.bf16.mxu1 %v6237_v40 }
0x199e   : > { %4341 = vmatmul.mubr.msk.f32.vlgmr.msra.gmra.mrb[26].mxu1 %vm485_vm1, %v3020_v56 }
0x199f   : > { %4343 = vmatprep.mubr.msk.f32.mxu1 %vm485_vm1, %v3022_v6  ;;  %4702 = vmatpush3.bf16.msra.mxu1 %v5760_v57  ;;  %v5077_v57 = vld [vmem:[%s6216_s5] sm:$0xff] }
0x19a0   : > { %4703 = vmatprep.subr.bf16.mxu1 %v6237_v40 }
0x19a2   : > { %4344 = vmatmul.mubr.msk.f32.gmra.mrb[28].mxu1 %vm485_vm1, %v3024_v5 }
0x19a3   : > { %4705 = vmatpush3.bf16.msra.mxu1 %v5772_v8  ;;  %4376 = vmatprep.mubr.msk.f32.mxu1 %vm5151_vm4, %v6239_v20 }
0x1a71   : > { %v4342_v23 = vpop.f32.mrb[26].mxu1 }
0x1a72   : > { %v3185_v29 = vmul.f32 0.35355338, %v4342_v23  ;;  %v3165_v47 = vpop.f32.mrb[27].mxu1 }
0x1a73   : > { %v3184_v42 = vmul.f32 0.35355338, %v3165_v47 }
0x1a74   : > { %v3189_v61 = vadd.f32 %v5076_v46, %v3185_v29 }
0x1a75   : > { %v3188_v18 = vadd.f32 %v5077_v57, %v3184_v42  ;;  %v4345_v2 = vpop.f32.mrb[28].mxu1 }
0x1a76   : > { %v3187_v44 = vmul.f32 0.35355338, %v4345_v2  ;;  %v3175_v8 = vpop.f32.mrb[29].mxu1  ;;  %v3195_v33 = vsel %vm647_vm3, %v3189_v61, -inf }
0x1a77   : > { %v3186_v30 = vmul.f32 0.35355338, %v3175_v8  ;;  %3196 = vmax.xlane.f32.xlu0 %v3195_v33  ;;  %v3192_v58 = vsel %vm647_vm3, %v3188_v18, -inf }
0x1a78   : > { %v3191_v49 = vadd.f32 %v5078_v1, %v3187_v44  ;;  %3193 = vmax.xlane.f32.xlu1 %v3192_v58 }
0x1a79   : > { %v3190_v55 = vadd.f32 %v5079_v62, %v3186_v30 }
0x1a7a   : > { %v3201_v60 = vsel %vm647_vm3, %v3191_v49, -inf }
0x1a7b   : > { %v3198_v59 = vsel %vm647_vm3, %v3190_v55, -inf }
0x1a7c   : > { %3202 = vmax.xlane.f32.xlu1 %v3201_v60  ;;  %3199 = vmax.xlane.f32.xlu0 %v3198_v59 }
0x1b04   : > { %v3197_v13 = vpop.xlane.xlu0 %3196 }
0x1b05   : > { %v3205_v35 = vsub.f32 %v3189_v61, %v3197_v13  ;;  %v3194_v53 = vpop.xlane.xlu1 %3193 }
0x1b06   : > { %v3204_v51 = vsub.f32 %v3188_v18, %v3194_v53 }
0x1b07   : > { %v3210_v48 = vmul.f32 1.442695, %v3205_v35 }
0x1b08   : > { %v3208_v4 = vmul.f32 1.442695, %v3204_v51 }
0x1b09   : > { %5048 = vpow2.f32 %v3210_v48  ;;  %v3203_v39 = vpop.xlane.xlu1 %3202  ;;  %v3200_v37 = vpop.xlane.xlu0 %3199 }
0x1b0a   : > { %5050 = vpow2.f32 %v3208_v4  ;;  %v3207_v7 = vsub.f32 %v3191_v49, %v3203_v39  ;;  %v3206_v32 = vsub.f32 %v3190_v55, %v3200_v37 }
0x1b0c   : > { %v3214_v15 = vmul.f32 1.442695, %v3207_v7  ;;  %v3212_v12 = vmul.f32 1.442695, %v3206_v32 }
0x1b0e   : > { %5052 = vpow2.f32 %v3214_v15 }
0x1b0f   : > { %5054 = vpow2.f32 %v3212_v12 }
0x1b13   : > { %v5049_v21 = vpop.eup %5048 }
0x1b14   : > { %v5051_v9 = vpop.eup %5050  ;;  %v3219_v14 = vsel %vm647_vm3, %v5049_v21, 0.0 }
0x1b15   : > { %3220 = vadd.xlane.f32.xlu1 %v3219_v14  ;;  %v3216_v38 = vsel %vm647_vm3, %v5051_v9, 0.0 }
0x1b16   : > { %3217 = vadd.xlane.f32.xlu0 %v3216_v38 }
0x1b18   : > { %v5053_v28 = vpop.eup %5052 }
0x1b19   : > { %v5055_v36 = vpop.eup %5054  ;;  %v3225_v34 = vsel %vm647_vm3, %v5053_v28, 0.0 }
0x1b1a   : > { %3226 = vadd.xlane.f32.xlu1 %v3225_v34  ;;  %v3222_v41 = vsel %vm647_vm3, %v5055_v36, 0.0 }
0x1b1b   : > { %3223 = vadd.xlane.f32.xlu0 %v3222_v41 }
0x1b2b   : > { %4939 = vrot.lane.b32.xlu1 %v6072_v19, %s6235_s16  ;;  %s3734_s16 = sshll.u32 %s5210_s25, 7  ;;  %s5153_s25 = smov [#allocation2]  }
0x1b2c   : > { %s6168_s29 = scalar_lea.hbm %s6217_s6, %s3734_s16  ;;  %s5084_s20 = sshll.u32 %s5153_s25, 4  ;;  %s5085_s20 = int_to_ptr.vmem [resolvable:$false] %s5084_s20 }
0x1b2d   : > { %s5086_s26 = scalar_lea.vmem %s5085_s20, 256 }
0x1b2f   : > { %4944 = vrot.lane.b32.xlu1 %v6072_v19, %s6234_s15 }
0x1b31   : > { %4934 = vrot.lane.b32.xlu0 %v6072_v19, %s5144_s28  ;;  %s255_s28 = sand.u32 1, %s5134_s22  }
0x1b32   : > { %s3619_s15 = sshll.u32 %s255_s28, 3  ;;  %s3531_s9 = scalar_lea.sflag [#allocation3], %s255_s28 }
0x1b33   : > { %s257_s13 = scalar_lea.vmem [#allocation2], %s3619_s15 }
0x1b34   : > { %s3544_s14 = sshll.u32 %s257_s13, 4  ;;  %s6170_s14 = int_to_ptr.vmem [resolvable:$true] %s3544_s14 }
0x1b35   : > { %s5080_s10 = scalar_lea.vmem %s6170_s14, 128  ;;  %p5087_p0 = scmp.lt.s32.totalorder %s6170_s14, %s5085_s20 }
0x1b36   : > { %p5081_p11 = scmp.ne.s32.totalorder %s6170_s14, %s5080_s10  ;;  %p5088_p1 = scmp.lt.s32.totalorder %s5086_s26, %s5080_s10 }
0x1b38   : > { %p5082_p12 = pnand %p5081_p11, %p5227_p5  ;;  %p5089_p2 = por %p5088_p1, %p5087_p0 }
0x1b3a   : > { %p5083_p13 = pneg %p5082_p12 }
0x1b3c   : > { %p5090_p3 = pnand %p5089_p2, %p5083_p13 }
0x1ba2   : > { %v3221_v25 = vpop.xlane.xlu1 %3220 }
0x1ba3   : > { %5056 = vrcp.f32 %v3221_v25  ;;  %v3218_v45 = vpop.xlane.xlu0 %3217 }
0x1ba4   : > { %5058 = vrcp.f32 %v3218_v45 }
0x1ba7   : > { %v3227_v27 = vpop.xlane.xlu1 %3226 }
0x1ba8   : > { %5060 = vrcp.f32 %v3227_v27  ;;  %v3224_v16 = vpop.xlane.xlu0 %3223 }
0x1ba9   : > { %5062 = vrcp.f32 %v3224_v16 }
0x1bab   : > { %v4940_v26 = vpop.permute.xlu1 %4939 }
0x1bac   : > { %v4935_v10 = vpop.permute.xlu0 %4934  ;;  %v4942_v56 = vunpack.i.h.bf16 %v4940_v26  ;;  %v4941_v6 = vunpack.i.l.bf16 %v4940_v26 }
0x1bad   : > { %v5057_v24 = vpop.eup %5056  ;;  %v4937_v5 = vunpack.i.h.bf16 %v4935_v10  ;;  %v4936_v23 = vunpack.i.l.bf16 %v4935_v10 }
0x1bae   : > { %v5059_v29 = vpop.eup %5058  ;;  %v3233_v47 = vmul.f32 %v5057_v24, %v3221_v25  ;;  %v4692_v57 = vpack.c.bf16 %v4942_v56, %v4941_v6  ;;  %v6242_v25 = vld [vmem:[#allocation5_spill] sm:$0xff] }
0x1baf   : > { %v3232_v42 = vmul.f32 %v5059_v29, %v3218_v45  ;;  %v4688_v46 = vpack.c.bf16 %v4937_v5, %v4936_v23  ;;  %v4945_v19 = vpop.permute.xlu1 %4944 }
0x1bb0   : > { %v4947_v18 = vunpack.i.h.bf16 %v4945_v19  ;;  %v4946_v2 = vunpack.i.l.bf16 %v4945_v19  ;;  %v3237_v33 = vsub.f32 2.0, %v3233_v47 }
0x1bb1   : > { %v3236_v61 = vsub.f32 2.0, %v3232_v42  ;;  %4689 = vmatprep.subr.bf16.mxu0 %v4688_v46 }
0x1bb2   : > { %v5061_v44 = vpop.eup %5060  ;;  %4691 = vmatpush3.bf16.msra.mxu0 %v4688_v46  ;;  %v4696_v62 = vpack.c.bf16 %v4947_v18, %v4946_v2  ;;  %v3241_v60 = vmul.f32 %v5057_v24, %v3237_v33 }
0x1bb3   : > { %v5063_v8 = vpop.eup %5062  ;;  %v3240_v30 = vmul.f32 %v5059_v29, %v3236_v61  ;;  %v3235_v58 = vmul.f32 %v5061_v44, %v3227_v27  ;;  %4693 = vmatprep.subr.bf16.mxu0 %v4692_v57 }
0x1bb4   : > { %v3234_v1 = vmul.f32 %v5063_v8, %v3224_v16  ;;  %v3245_v35 = vmul.f32 %v5049_v21, %v3241_v60 }
0x1bb5   : > { %v3244_v49 = vmul.f32 %v5051_v9, %v3240_v30  ;;  %v3239_v59 = vsub.f32 2.0, %v3235_v58 }
0x1bb6   : > { %v3238_v55 = vsub.f32 2.0, %v3234_v1  ;;  %4695 = vmatpush3.bf16.msra.mxu0 %v4692_v57 }
0x1bb7   : > { %4697 = vmatprep.subr.bf16.mxu0 %v4696_v62  ;;  %4362 = vmatprep.mubr.msk.f32.mxu0 %vm647_vm3, %v3244_v49  ;;  %v3243_v53 = vmul.f32 %v5061_v44, %v3239_v59 }
0x1bb8   : > { %v3242_v13 = vmul.f32 %v5063_v8, %v3238_v55 }
0x1bb9   : > { %v3247_v48 = vmul.f32 %v5053_v28, %v3243_v53 }
0x1bba   : > { %4699 = vmatpush3.bf16.msra.mxu0 %v4696_v62  ;;  %v3246_v51 = vmul.f32 %v5055_v36, %v3242_v13 }
0x1bbb   : > { %4706 = vmatprep.subr.bf16.mxu0 %v6237_v40 }
0x1bbd   : > { %4363 = vmatmul.mubr.msk.f32.vlgmr.msra.gmra.mrb[34].mxu0 %vm647_vm3, %v3245_v35 }
0x1bbe   : > { %4365 = vmatprep.mubr.msk.f32.mxu0 %vm647_vm3, %v3246_v51  ;;  %4708 = vmatpush3.bf16.msra.mxu0 %v5816_v43 }
0x1bbf   : > { %4709 = vmatprep.subr.bf16.mxu0 %v6237_v40 }
0x1bc1   : > { %4366 = vmatmul.mubr.msk.f32.gmra.mrb[36].mxu0 %vm647_vm3, %v3247_v48 }
0x1bc2   : > { %4711 = vmatpush3.bf16.msra.mxu0 %v5830_v52  ;;  %4395 = vmatprep.mubr.msk.f32.mxu0 %vm5151_vm4, %v6239_v20 }
0x1bc3   : > { %4712 = vmatprep.subr.bf16.mxu0 %v6237_v40 }
0x1bc6   : > { %4714 = vmatpush3.bf16.msra.mxu0 %v5842_v54 }
0x1bc7   : > { %4715 = vmatprep.subr.bf16.mxu0 %v6237_v40 }
0x1bca   : > { %4717 = vmatpush3.bf16.msra.mxu0 %v5852_v22 }
0x1c90   : > { %v4364_v4 = vpop.f32.mrb[34].mxu0 }
0x1c91   : > { %v3326_v43 = vpop.f32.mrb[35].mxu0 }
0x1c92   : > { %v3345_v39 = vadd.f32 %v4364_v4, %v3326_v43 }
0x1c94   : > { %v4367_v37 = vpop.f32.mrb[36].mxu0 }
0x1c95   : > { %v3336_v7 = vpop.f32.mrb[37].mxu0 }
0x1c96   : > { %v3346_v32 = vadd.f32 %v3345_v39, %v3336_v7 }
0x1c98   : > { %v3347_v15 = vadd.f32 %v4367_v37, %v3346_v32 }
0x1c9a   : > { %v3348_v52 = vadd.f32 %v3347_v15, %v6056_v31 }
0x1c9c   : > { %v3349_v12 = vadd.f32 %v3348_v52, %v5736_v63 }
0x1c9e   : > { %v3350_v20 = vsel %vm274_vm0, %v3349_v12, 0.0 }
0x1c9f   : > { %3351 = vadd.xlane.f32.xlu0 %v3350_v20 }
0x1d2c   : > { %v3352_v21 = vpop.xlane.xlu0 %3351 }
0x1d2d   : > { %v3353_v54 = vmul.f32 0.03125, %v3352_v21 }
0x1d2f   : > { %v3354_v9 = vsub.f32 %v3349_v12, %v3353_v54 }
0x1d31   : > { %v3355_v40 = vmul.f32 %v3354_v9, %v3354_v9 }
0x1d33   : > { %v3356_v22 = vsel %vm274_vm0, %v3355_v40, 0.0 }
0x1d34   : > { %3357 = vadd.xlane.f32.xlu1 %v3356_v22 }
0x1dc1   : > { %v3358_v14 = vpop.xlane.xlu1 %3357 }
0x1dc2   : > { %v3359_v38 = vmul.f32 0.03125, %v3358_v14 }
0x1dc4   : > { %v3360_v28 = vadd.f32 1e-05, %v3359_v38 }
0x1dc6   : > { %5064 = vrsqrt.f32 %v3360_v28 }
0x1dd0   : > { %v5065_v36 = vpop.eup %5064 }
0x1dd1   : > { %v3362_v34 = vmul.f32 %v5065_v36, %v3354_v9 }
0x1dd3   : > { %v3363_v31 = vmul.f32 %v3362_v34, %v5801_v3 }
0x1dd5   : > { %v3364_v63 = vadd.f32 %v3363_v31, %v5807_v50 }
0x1dd7   : > { %4377 = vmatmul.mubr.msk.f32.vlgmr.msra.gmra.mrb[30].mxu1 %vm274_vm0, %v3364_v63 }
0x1eaa   : > { %v3434_v41 = vpop.f32.mrb[30].mxu1 }
0x1eab   : > { %v3435_v45 = vadd.f32 %v3434_v41, %v6242_v25  ;;  %v4378_v27 = vpop.f32.mrb[31].mxu1 }
0x1ead   : > { %v3438_v16 = vmax.f32 %v3435_v45, 0.0 }
0x1eaf   : > { %4396 = vmatmul.mubr.msk.f32.vlgmr.msra.gmra.mrb[38].mxu0 %vm647_vm3, %v3438_v16 }
0x1f82   : > { %v3508_v26 = vpop.f32.mrb[38].mxu0 }
0x1f83   : > { %v3509_v10 = vadd.f32 %v3508_v26, %v6010_v0  ;;  %v4397_v24 = vpop.f32.mrb[39].mxu0 }
0x1f85   : > { %v3512_v56 = vadd.f32 %v3509_v10, %v3364_v63 }
0x1f87   : > { %v3513_v6 = vsel %vm274_vm0, %v3512_v56, 0.0 }
0x1f88   : > { %3514 = vadd.xlane.f32.xlu0 %v3513_v6 }
0x2015   : > { %v3515_v3 = vpop.xlane.xlu0 %3514 }
0x2016   : > { %v3516_v50 = vmul.f32 0.03125, %v3515_v3 }
0x2018   : > { %v3517_v5 = vsub.f32 %v3512_v56, %v3516_v50 }
0x201a   : > { %v3518_v23 = vmul.f32 %v3517_v5, %v3517_v5 }
0x201c   : > { %v3519_v29 = vsel %vm274_vm0, %v3518_v23, 0.0 }
0x201d   : > { %3520 = vadd.xlane.f32.xlu0 %v3519_v29 }
0x20aa   : > { %v3521_v47 = vpop.xlane.xlu0 %3520 }
0x20ab   : > { %v3522_v42 = vmul.f32 0.03125, %v3521_v47 }
0x20ad   : > { %v3523_v46 = vadd.f32 1e-05, %v3522_v42 }
0x20af   : > { %5066 = vrsqrt.f32 %v3523_v46 }
0x20b9   : > { %v5067_v0 = vpop.eup %5066 }
0x20ba   : > { %v3525_v19 = vmul.f32 %v5067_v0, %v3517_v5 }
0x20bc   : > { %v3526_v61 = vmul.f32 %v3525_v19, %v6047_v17 }
0x20be   : > { %v3527_v57 = vadd.f32 %v3526_v61, %v6052_v11 }
0x20c0   : > { %v3528_v18 = vsel %vm274_vm0, %v3527_v57, 0.0 }
0x20c1   : > { %3529 = vst [vmem:[%s257_s13] sm:$0xff] %v3528_v18 }
0x20c2   : > { %5093 = shalt.err (!%p5090_p3)
}
0x20c3   : > { %s5094_s17 = scalar_lea.hbm %s6168_s29, 128  ;;  %s5098_s28 = scalar_lea.hbm %s6217_s6, 256 }
0x20c4   : > { %p5095_p4 = scmp.ne.s32.totalorder %s6168_s29, %s5094_s17  ;;  %p5099_p9 = scmp.lt.u32.totalorder %s6168_s29, %s6217_s6 }
0x20c5   : > { %p5100_p10 = scmp.lt.u32.totalorder %s5098_s28, %s5094_s17  ;;  %p5102_p12 = scmp.lt.u32.totalorder %s5094_s17, %s6168_s29 }
0x20c6   : > { %p5096_p7 = pnand %p5095_p4, %p5227_p5 }
0x20c7   : > { %p5101_p11 = por %p5100_p10, %p5099_p9 }
0x20c8   : > { %p5097_p8 = pneg %p5096_p7 }
0x20c9   : > { %p5103_p13 = por %p5102_p12, %p5101_p11 }
0x20cb   : > { %p5104_p0 = pnand %p5103_p13, %p5097_p8 }
0x20cd   : > { %5107 = shalt.err (!%p5104_p0)
}
0x20ce   : > { %4730 = dma.vmem_to_hbm [thread:$0]  (%p5227_p5), %s6170_s14, 128, %s6168_s29, %s3531_s9  }
0x20cf PF: > { %p4736_p1 = scmp.ge.s32.totalorder %s5142_s24, 2  ;;  %s3556_s13 = sand.u32 1, %s5130_s21  }
0x20d0   : > { %s3557_s18 = scalar_lea.sflag [#allocation3], %s3556_s13 }
0x20d1   : > { %p4733_p2 = pnand %p4736_p1, %p5231_p6 }
0x20d3   : > { %5125 = dma.done.wait (!%p4733_p2), %s3557_s18, 128  }
0x20d4   : > { %5127 = vsyncadd (!%p4733_p2), %s3557_s18, 4294967168  ;;  %p16_p3 = scmp.ge.s32.totalorder %s5214_s27, 4   ;;  %s6243_s21 = smov %s5134_s22 }
0x20d5   : > { %s6244_s22 = smov %s5138_s23  ;;  %s6245_s23 = smov %s5225_s30 }
0x20d6   : > { %s6246_s24 = smov %s5214_s27  ;;  %18 = sbr.rel (!%p16_p3) target bundleno = 3 (0x3), region = 82 }
0x20dd   :  { %3562 = vsyncpa [#allocation3], 1 }
0x20de   :  { %3564 = vsyncpa [#allocation3 + $0x1], 1 }

</bundles_post_ra>
